<compile_context>
chip_gen: v5e
topology: v5e:2x2
jax: 0.10.0
libtpu: 0.0.40
codegen_flags: <defaults>
</compile_context>

<pallas_src>
import math

import jax
import jax.numpy as jnp
from jax import lax
from jax.experimental import pallas as pl
from jax.experimental.pallas import tpu as pltpu


def dense_net_kernel(x_ref, w1_ref, b1_ref, w2_ref, b2_ref, w3_ref, b3_ref,
                     out1_ref, out2_ref, out3_ref):
    # fc1 + ReLU  (bf16 operands, f32 accumulation on the MXU)
    x = x_ref[...]                                                  # (TB, in_dim) bf16
    h1 = jnp.dot(x, w1_ref[...], preferred_element_type=jnp.float32)
    h1 = jnp.maximum(h1 + b1_ref[...], 0.0)                         # f32 epilogue
    out1_ref[...] = h1.astype(out1_ref.dtype)                       # bf16 writeback

    # fc2 + ReLU
    h2 = jnp.dot(h1.astype(jnp.bfloat16), w2_ref[...],
                 preferred_element_type=jnp.float32)
    h2 = jnp.maximum(h2 + b2_ref[...], 0.0)
    out2_ref[...] = h2.astype(out2_ref.dtype)                       # bf16 writeback

    # fc3, then divide each row by its L2 norm (torch.norm(dim=1, keepdim=True)).
    # Columns >= out_dim are zero-padded, so they don't affect the norm.
    h3 = jnp.dot(h2.astype(jnp.bfloat16), w3_ref[...],
                 preferred_element_type=jnp.float32) + b3_ref[...]
    sumsq = jnp.sum(h3 * h3, axis=1, keepdims=True)
    # Tiny eps: below f32 ulp for any real row, but keeps zero-padded batch rows
    # finite (no inf/NaN for debug tooling). Torch itself has no eps.
    out3_ref[...] = h3 * lax.rsqrt(sumsq + 1e-30)                   # rsqrt -> EUP slot


def dense_net_forward(x, params, *, tb=256, intermediate_dtype=jnp.bfloat16):
    """x: (B, input_dim) f32.  params: dict of w1,b1,w2,b2,w3,b3 (f32).

    Returns (out1, out2, out3) matching the PyTorch module:
      out1 = relu(fc1(x)), out2 = relu(fc2(out1)),
      out3 = fc3(out2) / ||fc3(out2)||_2 (per row).
    out1/out2 are emitted in `intermediate_dtype` (bf16 by default) to halve
    HBM writeback; pass jnp.float32 if downstream needs f32 activations.
    """
    w1 = params["w1"].astype(jnp.bfloat16)
    w2 = params["w2"].astype(jnp.bfloat16)
    b1 = params["b1"].astype(jnp.float32)
    b2 = params["b2"].astype(jnp.float32)

    B, in_dim = x.shape
    mid = w1.shape[1]
    out_dim = params["w3"].shape[1]

    # Lane-dense final output: pad out_dim -> multiple of 128 with zero cols.
    out_pad = pl.cdiv(out_dim, 128) * 128
    w3 = jnp.pad(params["w3"], ((0, 0), (0, out_pad - out_dim))).astype(jnp.bfloat16)
    b3 = jnp.pad(params["b3"], ((0, 0), (0, out_pad - out_dim))).astype(jnp.float32)

    # Small-batch clamp: don't pad a tiny batch up to a full 256-row tile.
    # 16-row granularity keeps bf16 sublane packing / (8,128) tiling happy.
    tb_eff = min(tb, pl.cdiv(B, 16) * 16)

    # Number of batch tiles; keep it even when >1 so v7x's two TensorCores
    # both get work under dimension_semantics=("parallel",).
    n_tiles = pl.cdiv(B, tb_eff)
    if n_tiles > 1 and n_tiles % 2 == 1:
        n_tiles += 1
    Bp = n_tiles * tb_eff

    # Pad batch to the tile grid; ship activations as bf16.
    xp = jnp.pad(x, ((0, Bp - B), (0, 0))).astype(jnp.bfloat16)

    # Weights / biases: constant block index -> resident in VMEM across steps.
    const0 = lambda i: (0, 0)
    in_specs = [
        pl.BlockSpec((tb_eff, in_dim), lambda i: (i, 0)),   # x tile
        pl.BlockSpec((in_dim, mid), const0),                # w1
        pl.BlockSpec((1, mid), const0),                     # b1
        pl.BlockSpec((mid, mid), const0),                   # w2
        pl.BlockSpec((1, mid), const0),                     # b2
        pl.BlockSpec((mid, out_pad), const0),               # w3 (padded)
        pl.BlockSpec((1, out_pad), const0),                 # b3 (padded)
    ]
    out_specs = (
        pl.BlockSpec((tb_eff, mid), lambda i: (i, 0)),
        pl.BlockSpec((tb_eff, mid), lambda i: (i, 0)),
        pl.BlockSpec((tb_eff, out_pad), lambda i: (i, 0)),
    )
    out_shapes = (
        jax.ShapeDtypeStruct((Bp, mid), intermediate_dtype),   # out1
        jax.ShapeDtypeStruct((Bp, mid), intermediate_dtype),   # out2
        jax.ShapeDtypeStruct((Bp, out_pad), jnp.float32),      # out3 (padded lanes)
    )

    out1, out2, out3 = pl.pallas_call(
        dense_net_kernel,
        out_shape=out_shapes,
        grid=(n_tiles,),
        in_specs=in_specs,
        out_specs=out_specs,
        compiler_params=pltpu.CompilerParams(
            dimension_semantics=("parallel",),
            # ~11 MiB footprint at TB=256 (~20 MiB at TB=512); 48 MiB leaves
            # headroom on v5e/v6e and stays under v7x's 64 MiB physical VMEM.
            vmem_limit_bytes=48 * 1024 * 1024,
        ),
    )(xp, w1, b1, w2, b2, w3, b3)

    # Strip batch / lane padding outside the kernel.
    return out1[:B], out2[:B], out3[:B, :out_dim]


def init_params(key, input_dim, mid_num, out_dim):
    """Deterministic PyTorch-Linear-style init: U(-1/sqrt(fan_in), 1/sqrt(fan_in))."""
    ks = jax.random.split(key, 6)

    def linear(kw, kb, fan_in, fan_out):
        bound = 1.0 / math.sqrt(fan_in)
        # stored as (in, out) so forward is x @ W + b
        w = jax.random.uniform(kw, (fan_in, fan_out), jnp.float32, -bound, bound)
        b = jax.random.uniform(kb, (1, fan_out), jnp.float32, -bound, bound)
        return w, b

    w1, b1 = linear(ks[0], ks[1], input_dim, mid_num)
    w2, b2 = linear(ks[2], ks[3], mid_num, mid_num)
    w3, b3 = linear(ks[4], ks[5], mid_num, out_dim)
    return {"w1": w1, "b1": b1, "w2": w2, "b2": b2, "w3": w3, "b3": b3}


def dense_net_reference(x, p):
    """Pure-JAX f32 reference matching the torch module."""
    h1 = jnp.maximum(x @ p["w1"] + p["b1"], 0.0)
    h2 = jnp.maximum(h1 @ p["w2"] + p["b2"], 0.0)
    h3 = h2 @ p["w3"] + p["b3"]
    norm = jnp.sqrt(jnp.sum(h3 * h3, axis=1, keepdims=True))
    return h1, h2, h3 / norm


if __name__ == "__main__":
    # Small shapes consistent with the module's forward (mid_num = 1024 is fixed
    # by the module definition).
    batch = 4
    input_dim = 256
    mid_num = 1024
    out_dim = 20

    key = jax.random.PRNGKey(0)
    k_x, k_p = jax.random.split(key)
    x = jax.random.normal(k_x, (batch, input_dim), jnp.float32)
    params = init_params(k_p, input_dim, mid_num, out_dim)

    out1, out2, out3 = dense_net_forward(x, params)
    jax.block_until_ready((out1, out2, out3))

    assert out1.shape == (batch, mid_num)
    assert out2.shape == (batch, mid_num)
    assert out3.shape == (batch, out_dim)

    # Correctness vs the f32 reference (bf16 MXU operands + bf16 out1/out2
    # writeback, f32 accumulation), so use a bf16-consistent tolerance.
    r1, r2, r3 = dense_net_reference(x, params)
    assert jnp.allclose(out1.astype(jnp.float32), r1, atol=5e-2, rtol=5e-2)
    assert jnp.allclose(out2.astype(jnp.float32), r2, atol=5e-2, rtol=5e-2)
    assert jnp.allclose(out3, r3, atol=5e-2, rtol=5e-2)
    # out3 rows should be unit-norm (f32 rsqrt epilogue inside the kernel).
    assert jnp.allclose(jnp.linalg.norm(out3, axis=1), 1.0, atol=2e-3)

    print("KERNEL_OK")
</pallas_src>

<mosaic_0001>
module attributes {stable_mosaic.version = 11 : i64} {
  func.func @dense_net_kernel(%arg0: i32, %arg1: memref<16x256xbf16, #tpu.memory_space<vmem>>, %arg2: memref<256x1024xbf16, #tpu.memory_space<vmem>>, %arg3: memref<1x1024xf32, #tpu.memory_space<vmem>>, %arg4: memref<1024x1024xbf16, #tpu.memory_space<vmem>>, %arg5: memref<1x1024xf32, #tpu.memory_space<vmem>>, %arg6: memref<1024x128xbf16, #tpu.memory_space<vmem>>, %arg7: memref<1x128xf32, #tpu.memory_space<vmem>>, %arg8: memref<16x1024xbf16, #tpu.memory_space<vmem>>, %arg9: memref<16x1024xbf16, #tpu.memory_space<vmem>>, %arg10: memref<16x128xf32, #tpu.memory_space<vmem>>) attributes {dimension_semantics = [#tpu.dimension_semantics<parallel>], iteration_bounds = array<i64: 1>, scalar_prefetch = 0 : i64, scratch_operands = 0 : i64, tpu.core_type = #tpu.core_type<tc>, window_params = [{transform_indices = @transform_0, window_bounds = array<i64: 16, 256>}, {pipeline_mode = #tpu.pipeline_mode<synchronous>, transform_indices = @transform_1, window_bounds = array<i64: 256, 1024>}, {pipeline_mode = #tpu.pipeline_mode<synchronous>, transform_indices = @transform_2, window_bounds = array<i64: 1, 1024>}, {pipeline_mode = #tpu.pipeline_mode<synchronous>, transform_indices = @transform_3, window_bounds = array<i64: 1024, 1024>}, {pipeline_mode = #tpu.pipeline_mode<synchronous>, transform_indices = @transform_4, window_bounds = array<i64: 1, 1024>}, {pipeline_mode = #tpu.pipeline_mode<synchronous>, transform_indices = @transform_5, window_bounds = array<i64: 1024, 128>}, {pipeline_mode = #tpu.pipeline_mode<synchronous>, transform_indices = @transform_6, window_bounds = array<i64: 1, 128>}, {transform_indices = @transform_7, window_bounds = array<i64: 16, 1024>}, {transform_indices = @transform_8, window_bounds = array<i64: 16, 1024>}, {transform_indices = @transform_9, window_bounds = array<i64: 16, 128>}]} {
    %c0 = arith.constant 0 : index
    %c0_0 = arith.constant 0 : index
    %0 = vector.load %arg1[%c0, %c0_0] : memref<16x256xbf16, #tpu.memory_space<vmem>>, vector<16x256xbf16>
    %c0_1 = arith.constant 0 : index
    %c0_2 = arith.constant 0 : index
    %1 = vector.load %arg2[%c0_1, %c0_2] : memref<256x1024xbf16, #tpu.memory_space<vmem>>, vector<256x1024xbf16>
    %cst = arith.constant dense<0.000000e+00> : vector<16x1024xf32>
    %2 = tpu.matmul %0, %1, %cst {dimension_numbers = #tpu.dot_dimension_numbers<[1], [0], [0], [1], [0, 0, 1, 1], [], []>} : vector<16x256xbf16>, vector<256x1024xbf16>, vector<16x1024xf32> -> vector<16x1024xf32>
    %c0_3 = arith.constant 0 : index
    %c0_4 = arith.constant 0 : index
    %3 = vector.load %arg3[%c0_3, %c0_4] : memref<1x1024xf32, #tpu.memory_space<vmem>>, vector<1x1024xf32>
    %4 = vector.broadcast %3 : vector<1x1024xf32> to vector<16x1024xf32>
    %5 = arith.addf %2, %4 : vector<16x1024xf32>
    %cst_5 = arith.constant 0.000000e+00 : f32
    %6 = vector.broadcast %cst_5 : f32 to vector<16x1024xf32>
    %7 = arith.maximumf %5, %6 : vector<16x1024xf32>
    %8 = arith.truncf %7 : vector<16x1024xf32> to vector<16x1024xbf16>
    %c0_6 = arith.constant 0 : index
    %c0_7 = arith.constant 0 : index
    %9 = vector.load %arg8[%c0_6, %c0_7] : memref<16x1024xbf16, #tpu.memory_space<vmem>>, vector<16x1024xbf16>
    tpu.vector_store %arg8[%c0_6, %c0_7], %8 {strides = array<i32>} : memref<16x1024xbf16, #tpu.memory_space<vmem>>, vector<16x1024xbf16>,
    %10 = arith.truncf %7 : vector<16x1024xf32> to vector<16x1024xbf16>
    %c0_8 = arith.constant 0 : index
    %c0_9 = arith.constant 0 : index
    %11 = vector.load %arg4[%c0_8, %c0_9] : memref<1024x1024xbf16, #tpu.memory_space<vmem>>, vector<1024x1024xbf16>
    %cst_10 = arith.constant dense<0.000000e+00> : vector<16x1024xf32>
    %12 = tpu.matmul %10, %11, %cst_10 {dimension_numbers = #tpu.dot_dimension_numbers<[1], [0], [0], [1], [0, 0, 1, 1], [], []>} : vector<16x1024xbf16>, vector<1024x1024xbf16>, vector<16x1024xf32> -> vector<16x1024xf32>
    %c0_11 = arith.constant 0 : index
    %c0_12 = arith.constant 0 : index
    %13 = vector.load %arg5[%c0_11, %c0_12] : memref<1x1024xf32, #tpu.memory_space<vmem>>, vector<1x1024xf32>
    %14 = vector.broadcast %13 : vector<1x1024xf32> to vector<16x1024xf32>
    %15 = arith.addf %12, %14 : vector<16x1024xf32>
    %cst_13 = arith.constant 0.000000e+00 : f32
    %16 = vector.broadcast %cst_13 : f32 to vector<16x1024xf32>
    %17 = arith.maximumf %15, %16 : vector<16x1024xf32>
    %18 = arith.truncf %17 : vector<16x1024xf32> to vector<16x1024xbf16>
    %c0_14 = arith.constant 0 : index
    %c0_15 = arith.constant 0 : index
    %19 = vector.load %arg9[%c0_14, %c0_15] : memref<16x1024xbf16, #tpu.memory_space<vmem>>, vector<16x1024xbf16>
    tpu.vector_store %arg9[%c0_14, %c0_15], %18 {strides = array<i32>} : memref<16x1024xbf16, #tpu.memory_space<vmem>>, vector<16x1024xbf16>,
    %20 = arith.truncf %17 : vector<16x1024xf32> to vector<16x1024xbf16>
    %c0_16 = arith.constant 0 : index
    %c0_17 = arith.constant 0 : index
    %21 = vector.load %arg6[%c0_16, %c0_17] : memref<1024x128xbf16, #tpu.memory_space<vmem>>, vector<1024x128xbf16>
    %cst_18 = arith.constant dense<0.000000e+00> : vector<16x128xf32>
    %22 = tpu.matmul %20, %21, %cst_18 {dimension_numbers = #tpu.dot_dimension_numbers<[1], [0], [0], [1], [0, 0, 1, 1], [], []>} : vector<16x1024xbf16>, vector<1024x128xbf16>, vector<16x128xf32> -> vector<16x128xf32>
    %c0_19 = arith.constant 0 : index
    %c0_20 = arith.constant 0 : index
    %23 = vector.load %arg7[%c0_19, %c0_20] : memref<1x128xf32, #tpu.memory_space<vmem>>, vector<1x128xf32>
    %24 = vector.broadcast %23 : vector<1x128xf32> to vector<16x128xf32>
    %25 = arith.addf %22, %24 : vector<16x128xf32>
    %26 = arith.mulf %25, %25 : vector<16x128xf32>
    %cst_21 = arith.constant dense<0.000000e+00> : vector<16xf32>
    %27 = vector.multi_reduction <add>, %26, %cst_21 [1] : vector<16x128xf32> to vector<16xf32>
    %28 = vector.shape_cast %27 : vector<16xf32> to vector<16x1xf32>
    %cst_22 = arith.constant 1.000000e-30 : f32
    %29 = vector.broadcast %cst_22 : f32 to vector<16x1xf32>
    %30 = arith.addf %28, %29 : vector<16x1xf32>
    %31 = math.rsqrt %30 : vector<16x1xf32>
    %32 = vector.broadcast %31 : vector<16x1xf32> to vector<16x128xf32>
    %33 = arith.mulf %25, %32 : vector<16x128xf32>
    %c0_23 = arith.constant 0 : index
    %c0_24 = arith.constant 0 : index
    %34 = vector.load %arg10[%c0_23, %c0_24] : memref<16x128xf32, #tpu.memory_space<vmem>>, vector<16x128xf32>
    tpu.vector_store %arg10[%c0_23, %c0_24], %33 {strides = array<i32>} : memref<16x128xf32, #tpu.memory_space<vmem>>, vector<16x128xf32>,
    return
  }
  func.func @transform_0(%arg0: i32) -> (i32, i32) {
    %c0_i32 = arith.constant 0 : i32
    %c0_i32_0 = arith.constant 0 : i32
    return %arg0, %c0_i32 : i32, i32
  }
  func.func @transform_1(%arg0: i32) -> (i32, i32) {
    %c0_i32 = arith.constant 0 : i32
    %c0_i32_0 = arith.constant 0 : i32
    %c0_i32_1 = arith.constant 0 : i32
    return %c0_i32, %c0_i32_0 : i32, i32
  }
  func.func @transform_2(%arg0: i32) -> (i32, i32) {
    %c0_i32 = arith.constant 0 : i32
    %c0_i32_0 = arith.constant 0 : i32
    %c0_i32_1 = arith.constant 0 : i32
    return %c0_i32, %c0_i32_0 : i32, i32
  }
  func.func @transform_3(%arg0: i32) -> (i32, i32) {
    %c0_i32 = arith.constant 0 : i32
    %c0_i32_0 = arith.constant 0 : i32
    %c0_i32_1 = arith.constant 0 : i32
    return %c0_i32, %c0_i32_0 : i32, i32
  }
  func.func @transform_4(%arg0: i32) -> (i32, i32) {
    %c0_i32 = arith.constant 0 : i32
    %c0_i32_0 = arith.constant 0 : i32
    %c0_i32_1 = arith.constant 0 : i32
    return %c0_i32, %c0_i32_0 : i32, i32
  }
  func.func @transform_5(%arg0: i32) -> (i32, i32) {
    %c0_i32 = arith.constant 0 : i32
    %c0_i32_0 = arith.constant 0 : i32
    %c0_i32_1 = arith.constant 0 : i32
    return %c0_i32, %c0_i32_0 : i32, i32
  }
  func.func @transform_6(%arg0: i32) -> (i32, i32) {
    %c0_i32 = arith.constant 0 : i32
    %c0_i32_0 = arith.constant 0 : i32
    %c0_i32_1 = arith.constant 0 : i32
    return %c0_i32, %c0_i32_0 : i32, i32
  }
  func.func @transform_7(%arg0: i32) -> (i32, i32) {
    %c0_i32 = arith.constant 0 : i32
    %c0_i32_0 = arith.constant 0 : i32
    return %arg0, %c0_i32 : i32, i32
  }
  func.func @transform_8(%arg0: i32) -> (i32, i32) {
    %c0_i32 = arith.constant 0 : i32
    %c0_i32_0 = arith.constant 0 : i32
    return %arg0, %c0_i32 : i32, i32
  }
  func.func @transform_9(%arg0: i32) -> (i32, i32) {
    %c0_i32 = arith.constant 0 : i32
    %c0_i32_0 = arith.constant 0 : i32
    return %arg0, %c0_i32 : i32, i32
  }
}

</mosaic_0001>

<bundles_post_ra>
// kernel: tpu_custom_call.1
= control target key start
LH: loop header
LB: loop body
LE: loop exit
PB: predicated region body
PF: predicated region fallthrough
CT: control target
= control target key end

     0   :  { %15 = vsyncpa [#allocation3], 0  ;;  %s10249_s0 = inlined_call_operand.hbm [shape: bf16[16,256], index: 0, kind: input, shape index: {}]   ;;  %s10250_s1 = inlined_call_operand.hbm [shape: bf16[256,1024], index: 1, kind: input, shape index: {}]   ;;  %s10251_s2 = inlined_call_operand.hbm [shape: f32[1,1024], index: 2, kind: input, shape index: {}]   ;;  %s10252_s3 = inlined_call_operand.hbm [shape: bf16[1024,1024], index: 3, kind: input, shape index: {}]   ;;  %s10253_s4 = inlined_call_operand.hbm [shape: f32[1,1024], index: 4, kind: input, shape index: {}]   ;;  %s10254_s5 = inlined_call_operand.hbm [shape: bf16[1024,128], index: 5, kind: input, shape index: {}]   ;;  %s10255_s6 = inlined_call_operand.hbm [shape: f32[1,128], index: 6, kind: input, shape index: {}]   ;;  %s10256_s7 = inlined_call_operand.hbm [shape: bf16[16,1024], index: 7, kind: output, shape index: {0}]   ;;  %s10257_s8 = inlined_call_operand.hbm [shape: bf16[16,1024], index: 8, kind: output, shape index: {1}]   ;;  %s10258_s9 = inlined_call_operand.hbm [shape: f32[16,128], index: 9, kind: output, shape index: {2}]  }
   0x1   :  { %16 = vsyncpa [#allocation6], 0 }
   0x2   :  { %17 = vsyncpa [#allocation9], 0 }
   0x3   :  { %18 = vsyncpa [#allocation12], 0 }
   0x4   :  { %19 = vsyncpa [#allocation4], 0  ;;  %s38_s11 = sshll.u32 %s10250_s1, 4  ;;  %s39_s11 = int_to_ptr.hbm [resolvable:$true] %s38_s11 }
   0x5   :  { %20 = vsyncpa [#allocation16], 0  ;;  %s9808_s12 = smov [#allocation5]   ;;  %s62_s16 = sshll.u32 %s10252_s3, 4  ;;  %s63_s16 = int_to_ptr.hbm [resolvable:$true] %s62_s16 }
   0x6   :  { %s40_s13 = sshll.u32 %s9808_s12, 4  ;;  %s9809_s17 = smov 512   ;;  %s41_s13 = int_to_ptr.vmem [resolvable:$true] %s40_s13 }
   0x7   :  { %s9810_s18 = smov 32   ;;  %s9811_s19 = smov [#allocation8]  }
   0x8   :  { %46 = dma.hbm_to_vmem [thread:$0]  %s39_s11, 16384, %s41_s13, [#allocation6], %s9809_s17, %s9809_s17, %s9810_s18  }
   0x9   :  { %s64_s20 = sshll.u32 %s9811_s19, 4  ;;  %s86_s22 = sshll.u32 %s10254_s5, 4  ;;  %s65_s20 = int_to_ptr.vmem [resolvable:$true] %s64_s20  ;;  %s87_s22 = int_to_ptr.hbm [resolvable:$true] %s86_s22 }
   0xa   :  { %70 = dma.hbm_to_vmem [thread:$0]  %s63_s16, 65536, %s65_s20, [#allocation9], %s9809_s17, %s9809_s17, %s9810_s18  }
   0xb   :  { %s9812_s3 = smov [#allocation11]   ;;  %s25_s26 = sshll.u32 %s10249_s0, 4  ;;  %s26_s26 = int_to_ptr.hbm [resolvable:$true] %s25_s26 }
   0xc   :  { %s88_s23 = sshll.u32 %s9812_s3, 4  ;;  %s9813_s27 = smov 64   ;;  %s89_s23 = int_to_ptr.vmem [resolvable:$true] %s88_s23 }
   0xd   :  { %s9814_s28 = smov 4   ;;  %s9815_s29 = smov [#allocation2]  }
   0xe   :  { %94 = dma.hbm_to_vmem [thread:$0]  %s87_s22, 8192, %s89_s23, [#allocation12], %s9813_s27, %s9813_s27, %s9814_s28  }
   0xf   :  { %s27_s30 = sshll.u32 %s9815_s29, 4  ;;  %s9816_s5 = smov 128   ;;  %s28_s30 = int_to_ptr.vmem [resolvable:$true] %s27_s30 }
  0x10   :  { %s9817_s10 = smov 8   ;;  %s52_s13 = sshll.u32 %s10251_s2, 4  ;;  %s53_s13 = int_to_ptr.hbm [resolvable:$true] %s52_s13 }
  0x11   :  { %33 = dma.hbm_to_vmem [thread:$0]  %s26_s26, 256, %s28_s30, [#allocation3], %s9816_s5, %s9816_s5, %s9817_s10  }
  0x12   :  { %s9818_s14 = smov [#allocation7]   ;;  %s76_s19 = sshll.u32 %s10253_s4, 4  ;;  %s77_s19 = int_to_ptr.hbm [resolvable:$true] %s76_s19 }
  0x13   :  { %s54_s0 = sshll.u32 %s9818_s14, 4  ;;  %s9819_s20 = smov [#allocation10]   ;;  %s55_s0 = int_to_ptr.vmem [resolvable:$true] %s54_s0 }
  0x14   :  { %57 = dma.hbm_to_vmem [thread:$0]  %s53_s13, 128, %s55_s0, [#allocation6]  }
  0x15   :  { %s78_s21 = sshll.u32 %s9819_s20, 4  ;;  %s100_s3 = sshll.u32 %s10255_s6, 4  ;;  %s79_s21 = int_to_ptr.vmem [resolvable:$true] %s78_s21  ;;  %s101_s3 = int_to_ptr.hbm [resolvable:$true] %s100_s3 }
  0x16   :  { %81 = dma.hbm_to_vmem [thread:$0]  %s77_s19, 128, %s79_s21, [#allocation9]  }
  0x17   :  { %s9820_s2 = smov [#allocation13]  }
  0x18   :  { %s102_s23 = sshll.u32 %s9820_s2, 4  ;;  %s103_s23 = int_to_ptr.vmem [resolvable:$true] %s102_s23 }
  0x19   :  { %105 = dma.hbm_to_vmem [thread:$0]  %s101_s3, 16, %s103_s23, [#allocation12]  }
  0x1a   :  { %9796 = dma.done.wait [#allocation3], 256  }
  0x1b   :  { %9797 = vsyncadd [#allocation3], 4294967040 }
  0x1c   :  { %9798 = dma.done.wait [#allocation6], 16512  }
  0x1d   :  { %9799 = vsyncadd [#allocation6], 4294950784 }
  0x1e   :  { %9800 = dma.done.wait [#allocation9], 65664  }
  0x1f   :  { %9801 = vsyncadd [#allocation9], 4294901632 }
  0x20   :  { %9802 = dma.done.wait [#allocation12], 8208  }
  0x21   :  { %9803 = vsyncadd [#allocation12], 4294959088  ;;  %v6237_v0 = vld [vmem:[#allocation5 + $0x1c0] sm:$0xf]  ;;  %v8885_v5 = vld [vmem:[#allocation5 + $0x1c4] sm:$0xf] }
  0x22   :  { %v8889_v1 = vld [vmem:[#allocation5 + $0x1dc] sm:$0xf0]  ;;  %v6239_v6 = vld [vmem:[#allocation5 + $0x1e0] sm:$0xf0]  ;;  %s9821_s4 = smov [#allocation15]   ;;  %s5965_s26 = sshll.u32 %s10257_s8, 4  ;;  %s5966_s26 = int_to_ptr.hbm [resolvable:$true] %s5965_s26 }
  0x23   :  { %v6493_v2 = vld [vmem:[#allocation5 + $0x3c0] sm:$0xf]  ;;  %v6238_v3 = vor.u32 %v8889_v1, %v6237_v0  ;;  %v6242_v8 = vor.u32 %v8885_v5, %v6239_v6  ;;  %v8949_v9 = vld [vmem:[#allocation5 + $0x3c4] sm:$0xf]  ;;  %s5963_s6 = sshll.u32 %s9821_s4, 4  ;;  %s5952_s29 = sshll.u32 %s10256_s7, 4  ;;  %s5964_s6 = int_to_ptr.vmem [resolvable:$true] %s5963_s6  ;;  %s5953_s29 = int_to_ptr.hbm [resolvable:$true] %s5952_s29 }
  0x24   :  { %v8953_v4 = vld [vmem:[#allocation5 + $0x3dc] sm:$0xf0]  ;;  %v6495_v10 = vld [vmem:[#allocation5 + $0x3e0] sm:$0xf0]  ;;  %s9822_s30 = smov [#allocation14]   ;;  %s9823_s7 = smov [#allocation17]  }
  0x25   :  { %v6494_v7 = vor.u32 %v8953_v4, %v6493_v2  ;;  %v6205_v11 = vld [vmem:[#allocation5 + $0x180] sm:$0xf]  ;;  %932 = vmatpush.bf16.msra.mxu0 %v6238_v3  ;;  %v6498_v12 = vor.u32 %v8949_v9, %v6495_v10  ;;  %960 = vmatpush.bf16.msra.mxu2 %v6242_v8  ;;  %v8877_v18 = vld [vmem:[#allocation5 + $0x184] sm:$0xf]  ;;  %s5950_s11 = sshll.u32 %s9822_s30, 4  ;;  %s5976_s8 = sshll.u32 %s9823_s7, 4  ;;  %s5951_s11 = int_to_ptr.vmem [resolvable:$true] %s5950_s11  ;;  %s5977_s8 = int_to_ptr.vmem [resolvable:$true] %s5976_s8 }
  0x26   :  { %v8881_v13 = vld [vmem:[#allocation5 + $0x19c] sm:$0xf0]  ;;  %v6207_v19 = vld [vmem:[#allocation5 + $0x1a0] sm:$0xf0]  ;;  %s5978_s12 = sshll.u32 %s10258_s9, 4  ;;  %s5979_s12 = int_to_ptr.hbm [resolvable:$true] %s5978_s12 }
  0x27   :  { %v6461_v14 = vld [vmem:[#allocation5 + $0x380] sm:$0xf]  ;;  %946 = vmatpush.bf16.msra.mxu1 %v6494_v7  ;;  %v6206_v16 = vor.u32 %v8881_v13, %v6205_v11  ;;  %v8941_v20 = vld [vmem:[#allocation5 + $0x384] sm:$0xf]  ;;  %974 = vmatpush.bf16.msra.mxu3 %v6498_v12  ;;  %v6210_v21 = vor.u32 %v8877_v18, %v6207_v19 }
  0x28   :  { %v8945_v15 = vld [vmem:[#allocation5 + $0x39c] sm:$0xf0]  ;;  %v6463_v22 = vld [vmem:[#allocation5 + $0x3a0] sm:$0xf0] }
  0x29   :  { %v6462_v17 = vor.u32 %v8945_v15, %v6461_v14  ;;  %v6173_v23 = vld [vmem:[#allocation5 + $0x140] sm:$0xf]  ;;  %v6466_v25 = vor.u32 %v8941_v20, %v6463_v22  ;;  %v8869_v28 = vld [vmem:[#allocation5 + $0x144] sm:$0xf]  ;;  %933 = vmatpush.bf16.msra.mxu0 %v6206_v16  ;;  %961 = vmatpush.bf16.msra.mxu2 %v6210_v21 }
  0x2a   :  { %v8873_v24 = vld [vmem:[#allocation5 + $0x15c] sm:$0xf0]  ;;  %v6175_v30 = vld [vmem:[#allocation5 + $0x160] sm:$0xf0] }
  0x2b   :  { %v6429_v26 = vld [vmem:[#allocation5 + $0x340] sm:$0xf]  ;;  %v6174_v29 = vor.u32 %v8873_v24, %v6173_v23  ;;  %v8933_v31 = vld [vmem:[#allocation5 + $0x344] sm:$0xf]  ;;  %947 = vmatpush.bf16.msra.mxu1 %v6462_v17  ;;  %v6178_v34 = vor.u32 %v8869_v28, %v6175_v30  ;;  %975 = vmatpush.bf16.msra.mxu3 %v6466_v25  ;;  %v6245_v28 = vld [vmem:[#allocation5 + $0x1c8] sm:$0xf] }
  0x2c   :  { %v8937_v27 = vld [vmem:[#allocation5 + $0x35c] sm:$0xf0]  ;;  %v6431_v32 = vld [vmem:[#allocation5 + $0x360] sm:$0xf0]  ;;  %v6501_v30 = vld [vmem:[#allocation5 + $0x3c8] sm:$0xf] }
  0x2d   :  { %v6430_v33 = vor.u32 %v8937_v27, %v6429_v26  ;;  %v6141_v35 = vld [vmem:[#allocation5 + $0x100] sm:$0xf]  ;;  %v6434_v38 = vor.u32 %v8933_v31, %v6431_v32  ;;  %v8861_v40 = vld [vmem:[#allocation5 + $0x104] sm:$0xf]  ;;  %934 = vmatpush.bf16.msra.mxu0 %v6174_v29  ;;  %962 = vmatpush.bf16.msra.mxu2 %v6178_v34  ;;  %v8890_v29 = vld [vmem:[#allocation5 + $0x1e4] sm:$0xf0] }
  0x2e   :  { %v8865_v36 = vld [vmem:[#allocation5 + $0x11c] sm:$0xf0]  ;;  %v6143_v41 = vld [vmem:[#allocation5 + $0x120] sm:$0xf0]  ;;  %v8954_v32 = vld [vmem:[#allocation5 + $0x3e4] sm:$0xf0] }
  0x2f   :  { %v6397_v37 = vld [vmem:[#allocation5 + $0x300] sm:$0xf]  ;;  %v8925_v42 = vld [vmem:[#allocation5 + $0x304] sm:$0xf]  ;;  %v6142_v44 = vor.u32 %v8865_v36, %v6141_v35  ;;  %948 = vmatpush.bf16.msra.mxu1 %v6430_v33  ;;  %v6146_v46 = vor.u32 %v8861_v40, %v6143_v41  ;;  %976 = vmatpush.bf16.msra.mxu3 %v6434_v38  ;;  %v8886_v33 = vld [vmem:[#allocation5 + $0x1cc] sm:$0xf]  ;;  %v6246_v40 = vor.u32 %v8890_v29, %v6245_v28 }
  0x30   :  { %v8929_v39 = vld [vmem:[#allocation5 + $0x31c] sm:$0xf0]  ;;  %v6399_v43 = vld [vmem:[#allocation5 + $0x320] sm:$0xf0]  ;;  %v6247_v34 = vld [vmem:[#allocation5 + $0x1e8] sm:$0xf0] }
  0x31   :  { %v6398_v45 = vor.u32 %v8929_v39, %v6397_v37  ;;  %v6109_v47 = vld [vmem:[#allocation5 + $0xc0] sm:$0xf]  ;;  %v6402_v50 = vor.u32 %v8925_v42, %v6399_v43  ;;  %v8853_v52 = vld [vmem:[#allocation5 + $0xc4] sm:$0xf]  ;;  %935 = vmatpush.bf16.msra.mxu0 %v6142_v44  ;;  %963 = vmatpush.bf16.msra.mxu2 %v6146_v46  ;;  %v8950_v37 = vld [vmem:[#allocation5 + $0x3cc] sm:$0xf]  ;;  %v6502_v43 = vor.u32 %v8954_v32, %v6501_v30 }
  0x32   :  { %v8857_v48 = vld [vmem:[#allocation5 + $0xdc] sm:$0xf0]  ;;  %v6111_v53 = vld [vmem:[#allocation5 + $0xe0] sm:$0xf0]  ;;  %v6503_v38 = vld [vmem:[#allocation5 + $0x3e8] sm:$0xf0]  ;;  %v6250_v44 = vor.u32 %v8886_v33, %v6247_v34 }
  0x33   :  { %v6365_v49 = vld [vmem:[#allocation5 + $0x2c0] sm:$0xf]  ;;  %v8917_v54 = vld [vmem:[#allocation5 + $0x2c4] sm:$0xf]  ;;  %v6110_v56 = vor.u32 %v8857_v48, %v6109_v47  ;;  %949 = vmatpush.bf16.msra.mxu1 %v6398_v45  ;;  %v6114_v58 = vor.u32 %v8853_v52, %v6111_v53  ;;  %977 = vmatpush.bf16.msra.mxu3 %v6402_v50  ;;  %v6005_v41 = vld [vmem:[#allocation2] sm:$0xf]  ;;  %v6506_v48 = vor.u32 %v8950_v37, %v6503_v38 }
  0x34   :  { %v8921_v51 = vld [vmem:[#allocation5 + $0x2dc] sm:$0xf0]  ;;  %v6367_v55 = vld [vmem:[#allocation5 + $0x2e0] sm:$0xf0]  ;;  %v8828_v42 = vld [vmem:[#allocation2 + $0x4] sm:$0xf0] }
  0x35   :  { %v6366_v57 = vor.u32 %v8921_v51, %v6365_v49  ;;  %v6077_v59 = vld [vmem:[#allocation5 + $0x80] sm:$0xf]  ;;  %v6370_v62 = vor.u32 %v8917_v54, %v6367_v55  ;;  %v8845_v0 = vld [vmem:[#allocation5 + $0x84] sm:$0xf]  ;;  %936 = vmatpush.bf16.msra.mxu0 %v6110_v56  ;;  %964 = vmatpush.bf16.msra.mxu2 %v6114_v58  ;;  %v6213_v45 = vld [vmem:[#allocation5 + $0x188] sm:$0xf]  ;;  %v9904_v52 = vor.u32 %v8828_v42, %v6005_v41 }
  0x36   :  { %v8849_v60 = vld [vmem:[#allocation5 + $0x9c] sm:$0xf0]  ;;  %v6079_v1 = vld [vmem:[#allocation5 + $0xa0] sm:$0xf0]  ;;  %v8882_v46 = vld [vmem:[#allocation5 + $0x1a4] sm:$0xf0] }
  0x37   :  { %v6333_v61 = vld [vmem:[#allocation5 + $0x280] sm:$0xf]  ;;  %v8909_v2 = vld [vmem:[#allocation5 + $0x284] sm:$0xf]  ;;  %v6078_v4 = vor.u32 %v8849_v60, %v6077_v59  ;;  %950 = vmatpush.bf16.msra.mxu1 %v6366_v57  ;;  %v6082_v6 = vor.u32 %v8845_v0, %v6079_v1  ;;  %978 = vmatpush.bf16.msra.mxu3 %v6370_v62  ;;  %v6469_v47 = vld [vmem:[#allocation5 + $0x388] sm:$0xf]  ;;  %v6214_v56 = vor.u32 %v8882_v46, %v6213_v45 }
  0x38   :  { %v8913_v63 = vld [vmem:[#allocation5 + $0x29c] sm:$0xf0]  ;;  %v6335_v3 = vld [vmem:[#allocation5 + $0x2a0] sm:$0xf0]  ;;  %v8946_v49 = vld [vmem:[#allocation5 + $0x3a4] sm:$0xf0] }
  0x39   :  { %v6334_v5 = vor.u32 %v8913_v63, %v6333_v61  ;;  %v6045_v7 = vld [vmem:[#allocation5 + $0x40] sm:$0xf]  ;;  %v6338_v10 = vor.u32 %v8909_v2, %v6335_v3  ;;  %v8837_v12 = vld [vmem:[#allocation5 + $0x44] sm:$0xf]  ;;  %937 = vmatpush.bf16.msra.mxu0 %v6078_v4  ;;  %965 = vmatpush.bf16.msra.mxu2 %v6082_v6  ;;  %v8878_v50 = vld [vmem:[#allocation5 + $0x18c] sm:$0xf]  ;;  %v6470_v58 = vor.u32 %v8946_v49, %v6469_v47 }
  0x3a   :  { %v8841_v8 = vld [vmem:[#allocation5 + $0x5c] sm:$0xf0]  ;;  %v6047_v13 = vld [vmem:[#allocation5 + $0x60] sm:$0xf0]  ;;  %v6215_v51 = vld [vmem:[#allocation5 + $0x1a8] sm:$0xf0] }
  0x3b   :  { %v6301_v9 = vld [vmem:[#allocation5 + $0x240] sm:$0xf]  ;;  %v8901_v14 = vld [vmem:[#allocation5 + $0x244] sm:$0xf]  ;;  %v6046_v16 = vor.u32 %v8841_v8, %v6045_v7  ;;  %951 = vmatpush.bf16.msra.mxu1 %v6334_v5  ;;  %v6050_v20 = vor.u32 %v8837_v12, %v6047_v13  ;;  %979 = vmatpush.bf16.msra.mxu3 %v6338_v10  ;;  %v8942_v53 = vld [vmem:[#allocation5 + $0x38c] sm:$0xf]  ;;  %v6218_v59 = vor.u32 %v8878_v50, %v6215_v51 }
  0x3c   :  { %v8905_v11 = vld [vmem:[#allocation5 + $0x25c] sm:$0xf0]  ;;  %v6303_v15 = vld [vmem:[#allocation5 + $0x260] sm:$0xf0]  ;;  %v6471_v54 = vld [vmem:[#allocation5 + $0x3a8] sm:$0xf0] }
  0x3d   :  { %v6013_v17 = vld [vmem:[#allocation5] sm:$0xf]  ;;  %v6302_v19 = vor.u32 %v8905_v11, %v6301_v9  ;;  %v8829_v23 = vld [vmem:[#allocation5 + $0x4] sm:$0xf]  ;;  %v6306_v24 = vor.u32 %v8901_v14, %v6303_v15  ;;  %938 = vmatpush.bf16.msra.mxu0 %v6046_v16  ;;  %966 = vmatpush.bf16.msra.mxu2 %v6050_v20  ;;  %v8827_v55 = vld [vmem:[#allocation2 + $0x4] sm:$0xf]  ;;  %v6474_v0 = vor.u32 %v8942_v53, %v6471_v54 }
  0x3e   :  { %v8833_v18 = vld [vmem:[#allocation5 + $0x1c] sm:$0xf0]  ;;  %v6015_v25 = vld [vmem:[#allocation5 + $0x20] sm:$0xf0]  ;;  %v6007_v57 = vld [vmem:[#allocation2 + $0x8] sm:$0xf0] }
  0x3f   :  { %v6269_v21 = vld [vmem:[#allocation5 + $0x200] sm:$0xf]  ;;  %v8893_v26 = vld [vmem:[#allocation5 + $0x204] sm:$0xf]  ;;  %v6014_v31 = vor.u32 %v8833_v18, %v6013_v17  ;;  %952 = vmatpush.bf16.msra.mxu1 %v6302_v19  ;;  %v6018_v36 = vor.u32 %v8829_v23, %v6015_v25  ;;  %980 = vmatpush.bf16.msra.mxu3 %v6306_v24  ;;  %v6181_v60 = vld [vmem:[#allocation5 + $0x148] sm:$0xf]  ;;  %v9906_v63 = vor.u32 %v8827_v55, %v6007_v57 }
  0x40   :  { %v8897_v22 = vld [vmem:[#allocation5 + $0x21c] sm:$0xf0]  ;;  %v6271_v27 = vld [vmem:[#allocation5 + $0x220] sm:$0xf0]  ;;  %v8874_v61 = vld [vmem:[#allocation5 + $0x164] sm:$0xf0] }
  0x41   :  { %v6270_v35 = vor.u32 %v8897_v22, %v6269_v21  ;;  %v6274_v39 = vor.u32 %v8893_v26, %v6271_v27  ;;  %939 = vmatpush.bf16.msra.mxu0 %v6014_v31  ;;  %967 = vmatpush.bf16.msra.mxu2 %v6018_v36  ;;  %v6437_v62 = vld [vmem:[#allocation5 + $0x348] sm:$0xf]  ;;  %v8870_v2 = vld [vmem:[#allocation5 + $0x14c] sm:$0xf]  ;;  %v6182_v6 = vor.u32 %v8874_v61, %v6181_v60 }
  0x42   :  { %v8938_v1 = vld [vmem:[#allocation5 + $0x364] sm:$0xf0]  ;;  %v6183_v3 = vld [vmem:[#allocation5 + $0x168] sm:$0xf0] }
  0x43   :  { %953 = vmatpush.bf16.msra.mxu1 %v6270_v35  ;;  %981 = vmatpush.bf16.msra.mxu3 %v6274_v39  ;;  %v8934_v4 = vld [vmem:[#allocation5 + $0x34c] sm:$0xf]  ;;  %v6438_v7 = vor.u32 %v8938_v1, %v6437_v62  ;;  %v6186_v8 = vor.u32 %v8870_v2, %v6183_v3  ;;  %v6149_v9 = vld [vmem:[#allocation5 + $0x108] sm:$0xf] }
  0x44   :  { %968 = vmatmul.bf16.vlgmr.msra.gmra.mxu2 %v9904_v52  ;;  %v6439_v5 = vld [vmem:[#allocation5 + $0x368] sm:$0xf0]  ;;  %940 = vmatmul.bf16.vlgmr.msra.gmra.mxu0 %v9904_v52  ;;  %v8866_v10 = vld [vmem:[#allocation5 + $0x124] sm:$0xf0] }
  0x45   :  { %988 = vmatpush.bf16.msrb.mxu0 %v6246_v40  ;;  %1016 = vmatpush.bf16.msrb.mxu2 %v6250_v44  ;;  %v6405_v11 = vld [vmem:[#allocation5 + $0x308] sm:$0xf]  ;;  %v6442_v12 = vor.u32 %v8934_v4, %v6439_v5  ;;  %v8862_v14 = vld [vmem:[#allocation5 + $0x10c] sm:$0xf]  ;;  %v6150_v18 = vor.u32 %v8866_v10, %v6149_v9  ;;  %v6253_v4 = vld [vmem:[#allocation5 + $0x1d0] sm:$0xf] }
  0x46   :  { %982 = vmatmul.bf16.vlgmr.msra.gmra.mxu3 %v9906_v63  ;;  %954 = vmatmul.bf16.vlgmr.msra.gmra.mxu1 %v9906_v63  ;;  %v8930_v13 = vld [vmem:[#allocation5 + $0x324] sm:$0xf0]  ;;  %v6151_v15 = vld [vmem:[#allocation5 + $0x128] sm:$0xf0]  ;;  %v8891_v5 = vld [vmem:[#allocation5 + $0x1ec] sm:$0xf0] }
  0x47   :  { %1002 = vmatpush.bf16.msrb.mxu1 %v6502_v43  ;;  %1030 = vmatpush.bf16.msrb.mxu3 %v6506_v48  ;;  %v8926_v16 = vld [vmem:[#allocation5 + $0x30c] sm:$0xf]  ;;  %v6406_v19 = vor.u32 %v8930_v13, %v6405_v11  ;;  %v6154_v20 = vor.u32 %v8862_v14, %v6151_v15  ;;  %v6117_v21 = vld [vmem:[#allocation5 + $0xc8] sm:$0xf]  ;;  %v8887_v9 = vld [vmem:[#allocation5 + $0x1d4] sm:$0xf] }
  0x48   :  { %v6407_v17 = vld [vmem:[#allocation5 + $0x328] sm:$0xf0]  ;;  %v8858_v22 = vld [vmem:[#allocation5 + $0xe4] sm:$0xf0]  ;;  %v6255_v10 = vld [vmem:[#allocation5 + $0x1f0] sm:$0xf0] }
  0x49   :  { %989 = vmatpush.bf16.msrb.mxu0 %v6214_v56  ;;  %1017 = vmatpush.bf16.msrb.mxu2 %v6218_v59  ;;  %v6373_v23 = vld [vmem:[#allocation5 + $0x2c8] sm:$0xf]  ;;  %v6410_v24 = vor.u32 %v8926_v16, %v6407_v17  ;;  %v8854_v26 = vld [vmem:[#allocation5 + $0xcc] sm:$0xf]  ;;  %v6118_v30 = vor.u32 %v8858_v22, %v6117_v21  ;;  %v8951_v13 = vld [vmem:[#allocation5 + $0x3d4] sm:$0xf]  ;;  %v6254_v16 = vor.u32 %v8891_v5, %v6253_v4 }
  0x4a   :  { %v8922_v25 = vld [vmem:[#allocation5 + $0x2e4] sm:$0xf0]  ;;  %v6119_v27 = vld [vmem:[#allocation5 + $0xe8] sm:$0xf0]  ;;  %v6511_v14 = vld [vmem:[#allocation5 + $0x3f0] sm:$0xf0] }
  0x4b   :  { %1003 = vmatpush.bf16.msrb.mxu1 %v6470_v58  ;;  %1031 = vmatpush.bf16.msrb.mxu3 %v6474_v0  ;;  %v8918_v28 = vld [vmem:[#allocation5 + $0x2cc] sm:$0xf]  ;;  %v6374_v31 = vor.u32 %v8922_v25, %v6373_v23  ;;  %v6122_v32 = vor.u32 %v8854_v26, %v6119_v27  ;;  %v6085_v33 = vld [vmem:[#allocation5 + $0x88] sm:$0xf]  ;;  %v6477_v21 = vld [vmem:[#allocation5 + $0x390] sm:$0xf]  ;;  %v6514_v22 = vor.u32 %v8951_v13, %v6511_v14 }
  0x4c   :  { %v6375_v29 = vld [vmem:[#allocation5 + $0x2e8] sm:$0xf0]  ;;  %v8850_v34 = vld [vmem:[#allocation5 + $0xa4] sm:$0xf0]  ;;  %v8947_v23 = vld [vmem:[#allocation5 + $0x3ac] sm:$0xf0] }
  0x4d   :  { %990 = vmatpush.bf16.msrb.mxu0 %v6182_v6  ;;  %1018 = vmatpush.bf16.msrb.mxu2 %v6186_v8  ;;  %v6341_v35 = vld [vmem:[#allocation5 + $0x288] sm:$0xf]  ;;  %v6378_v36 = vor.u32 %v8918_v28, %v6375_v29  ;;  %v8846_v38 = vld [vmem:[#allocation5 + $0x8c] sm:$0xf]  ;;  %v6086_v42 = vor.u32 %v8850_v34, %v6085_v33  ;;  %v6509_v6 = vld [vmem:[#allocation5 + $0x3d0] sm:$0xf]  ;;  %v6478_v29 = vor.u32 %v8947_v23, %v6477_v21 }
  0x4e   :  { %v8914_v37 = vld [vmem:[#allocation5 + $0x2a4] sm:$0xf0]  ;;  %v6087_v39 = vld [vmem:[#allocation5 + $0xa8] sm:$0xf0]  ;;  %v8955_v8 = vld [vmem:[#allocation5 + $0x3ec] sm:$0xf0] }
  0x4f   :  { %1004 = vmatpush.bf16.msrb.mxu1 %v6438_v7  ;;  %1032 = vmatpush.bf16.msrb.mxu3 %v6442_v12  ;;  %v8910_v40 = vld [vmem:[#allocation5 + $0x28c] sm:$0xf]  ;;  %v6342_v43 = vor.u32 %v8914_v37, %v6341_v35  ;;  %v6090_v44 = vor.u32 %v8846_v38, %v6087_v39  ;;  %v6053_v45 = vld [vmem:[#allocation5 + $0x48] sm:$0xf]  ;;  %v6510_v17 = vor.u32 %v8955_v8, %v6509_v6  ;;  %v6223_v25 = vld [vmem:[#allocation5 + $0x1b0] sm:$0xf0] }
  0x50   :  { %v6343_v41 = vld [vmem:[#allocation5 + $0x2a8] sm:$0xf0]  ;;  %v8842_v46 = vld [vmem:[#allocation5 + $0x64] sm:$0xf0]  ;;  %v8943_v26 = vld [vmem:[#allocation5 + $0x394] sm:$0xf] }
  0x51   :  { %991 = vmatpush.bf16.msrb.mxu0 %v6150_v18  ;;  %1019 = vmatpush.bf16.msrb.mxu2 %v6154_v20  ;;  %v6309_v47 = vld [vmem:[#allocation5 + $0x248] sm:$0xf]  ;;  %v6346_v48 = vor.u32 %v8910_v40, %v6343_v41  ;;  %v8838_v50 = vld [vmem:[#allocation5 + $0x4c] sm:$0xf]  ;;  %v6054_v55 = vor.u32 %v8842_v46, %v6053_v45  ;;  %v6258_v18 = vor.u32 %v8887_v9, %v6255_v10  ;;  %v8883_v20 = vld [vmem:[#allocation5 + $0x1ac] sm:$0xf0] }
  0x52   :  { %v8906_v49 = vld [vmem:[#allocation5 + $0x264] sm:$0xf0]  ;;  %v6055_v51 = vld [vmem:[#allocation5 + $0x68] sm:$0xf0]  ;;  %v6479_v27 = vld [vmem:[#allocation5 + $0x3b0] sm:$0xf0] }
  0x53   :  { %1005 = vmatpush.bf16.msrb.mxu1 %v6406_v19  ;;  %1033 = vmatpush.bf16.msrb.mxu3 %v6410_v24  ;;  %v8902_v53 = vld [vmem:[#allocation5 + $0x24c] sm:$0xf]  ;;  %v6021_v56 = vld [vmem:[#allocation5 + $0x8] sm:$0xf]  ;;  %v6310_v58 = vor.u32 %v8906_v49, %v6309_v47  ;;  %v6058_v59 = vor.u32 %v8838_v50, %v6055_v51  ;;  %v6221_v19 = vld [vmem:[#allocation5 + $0x190] sm:$0xf]  ;;  %v6482_v34 = vor.u32 %v8943_v26, %v6479_v27 }
  0x54   :  { %v6311_v54 = vld [vmem:[#allocation5 + $0x268] sm:$0xf0]  ;;  %v8834_v57 = vld [vmem:[#allocation5 + $0x24] sm:$0xf0]  ;;  %v8879_v24 = vld [vmem:[#allocation5 + $0x194] sm:$0xf]  ;;  %v6222_v28 = vor.u32 %v8883_v20, %v6221_v19 }
  0x55   :  { %992 = vmatpush.bf16.msrb.mxu0 %v6118_v30  ;;  %1020 = vmatpush.bf16.msrb.mxu2 %v6122_v32  ;;  %v6277_v60 = vld [vmem:[#allocation5 + $0x208] sm:$0xf]  ;;  %v8830_v62 = vld [vmem:[#allocation5 + $0xc] sm:$0xf]  ;;  %v6314_v0 = vor.u32 %v8902_v53, %v6311_v54  ;;  %v6022_v7 = vor.u32 %v8834_v57, %v6021_v56  ;;  %v6226_v30 = vor.u32 %v8879_v24, %v6223_v25  ;;  %v8875_v32 = vld [vmem:[#allocation5 + $0x16c] sm:$0xf0] }
  0x56   :  { %v8898_v61 = vld [vmem:[#allocation5 + $0x224] sm:$0xf0]  ;;  %v6023_v1 = vld [vmem:[#allocation5 + $0x28] sm:$0xf0]  ;;  %v6445_v33 = vld [vmem:[#allocation5 + $0x350] sm:$0xf] }
  0x57   :  { %1006 = vmatpush.bf16.msrb.mxu1 %v6374_v31  ;;  %1034 = vmatpush.bf16.msrb.mxu3 %v6378_v36  ;;  %v8894_v2 = vld [vmem:[#allocation5 + $0x20c] sm:$0xf]  ;;  %v6278_v11 = vor.u32 %v8898_v61, %v6277_v60  ;;  %v6026_v12 = vor.u32 %v8830_v62, %v6023_v1  ;;  %v6189_v31 = vld [vmem:[#allocation5 + $0x150] sm:$0xf]  ;;  %v8871_v36 = vld [vmem:[#allocation5 + $0x154] sm:$0xf] }
  0x58   :  { %v6279_v3 = vld [vmem:[#allocation5 + $0x228] sm:$0xf0]  ;;  %v8939_v35 = vld [vmem:[#allocation5 + $0x36c] sm:$0xf0]  ;;  %v6191_v37 = vld [vmem:[#allocation5 + $0x170] sm:$0xf0]  ;;  %v6190_v40 = vor.u32 %v8875_v32, %v6189_v31 }
  0x59   :  { %993 = vmatpush.bf16.msrb.mxu0 %v6086_v42  ;;  %1021 = vmatpush.bf16.msrb.mxu2 %v6090_v44  ;;  %v6282_v15 = vor.u32 %v8894_v2, %v6279_v3  ;;  %v8935_v38 = vld [vmem:[#allocation5 + $0x354] sm:$0xf]  ;;  %v6446_v41 = vor.u32 %v8939_v35, %v6445_v33  ;;  %v6194_v42 = vor.u32 %v8871_v36, %v6191_v37  ;;  %v8867_v44 = vld [vmem:[#allocation5 + $0x12c] sm:$0xf0] }
  0x5a   :  { %v6447_v39 = vld [vmem:[#allocation5 + $0x370] sm:$0xf0]  ;;  %v6413_v45 = vld [vmem:[#allocation5 + $0x310] sm:$0xf] }
  0x5b   :  { %1007 = vmatpush.bf16.msrb.mxu1 %v6342_v43  ;;  %1035 = vmatpush.bf16.msrb.mxu3 %v6346_v48  ;;  %v6157_v43 = vld [vmem:[#allocation5 + $0x110] sm:$0xf]  ;;  %v6450_v46 = vor.u32 %v8935_v38, %v6447_v39  ;;  %v8863_v48 = vld [vmem:[#allocation5 + $0x114] sm:$0xf]  ;;  %v6261_v38 = vld [vmem:[#allocation5 + $0x1d8] sm:$0xf] }
  0x5c   :  { %v8931_v47 = vld [vmem:[#allocation5 + $0x32c] sm:$0xf0]  ;;  %v6159_v49 = vld [vmem:[#allocation5 + $0x130] sm:$0xf0]  ;;  %v6158_v53 = vor.u32 %v8867_v44, %v6157_v43  ;;  %v8892_v39 = vld [vmem:[#allocation5 + $0x1f4] sm:$0xf0] }
  0x5d   :  { %994 = vmatpush.bf16.msrb.mxu0 %v6054_v55  ;;  %1022 = vmatpush.bf16.msrb.mxu2 %v6058_v59  ;;  %v8927_v50 = vld [vmem:[#allocation5 + $0x314] sm:$0xf]  ;;  %v6414_v54 = vor.u32 %v8931_v47, %v6413_v45  ;;  %v6162_v55 = vor.u32 %v8863_v48, %v6159_v49  ;;  %v6125_v56 = vld [vmem:[#allocation5 + $0xd0] sm:$0xf]  ;;  %v8888_v43 = vld [vmem:[#allocation5 + $0x1dc] sm:$0xf] }
  0x5e   :  { %v6415_v51 = vld [vmem:[#allocation5 + $0x330] sm:$0xf0]  ;;  %v8859_v57 = vld [vmem:[#allocation5 + $0xec] sm:$0xf0]  ;;  %v6263_v44 = vld [vmem:[#allocation5 + $0x1f8] sm:$0xf0] }
  0x5f   :  { %1008 = vmatpush.bf16.msrb.mxu1 %v6310_v58  ;;  %1036 = vmatpush.bf16.msrb.mxu3 %v6314_v0  ;;  %v6381_v58 = vld [vmem:[#allocation5 + $0x2d0] sm:$0xf]  ;;  %v6418_v59 = vor.u32 %v8927_v50, %v6415_v51  ;;  %v8855_v61 = vld [vmem:[#allocation5 + $0xd4] sm:$0xf]  ;;  %v6126_v2 = vor.u32 %v8859_v57, %v6125_v56  ;;  %v8952_v47 = vld [vmem:[#allocation5 + $0x3dc] sm:$0xf]  ;;  %v6262_v50 = vor.u32 %v8892_v39, %v6261_v38 }
  0x60   :  { %v8923_v60 = vld [vmem:[#allocation5 + $0x2ec] sm:$0xf0]  ;;  %v6127_v62 = vld [vmem:[#allocation5 + $0xf0] sm:$0xf0]  ;;  %v6519_v48 = vld [vmem:[#allocation5 + $0x3f8] sm:$0xf0] }
  0x61   :  { %995 = vmatpush.bf16.msrb.mxu0 %v6022_v7  ;;  %1023 = vmatpush.bf16.msrb.mxu2 %v6026_v12  ;;  %v8919_v0 = vld [vmem:[#allocation5 + $0x2d4] sm:$0xf]  ;;  %v6382_v3 = vor.u32 %v8923_v60, %v6381_v58  ;;  %v6130_v4 = vor.u32 %v8855_v61, %v6127_v62  ;;  %v6093_v5 = vld [vmem:[#allocation5 + $0x90] sm:$0xf]  ;;  %v6485_v56 = vld [vmem:[#allocation5 + $0x398] sm:$0xf]  ;;  %v6522_v57 = vor.u32 %v8952_v47, %v6519_v48 }
  0x62   :  { %v6383_v1 = vld [vmem:[#allocation5 + $0x2f0] sm:$0xf0]  ;;  %v8851_v6 = vld [vmem:[#allocation5 + $0xac] sm:$0xf0]  ;;  %v8948_v58 = vld [vmem:[#allocation5 + $0x3b4] sm:$0xf0] }
  0x63   :  { %1009 = vmatpush.bf16.msrb.mxu1 %v6278_v11  ;;  %1037 = vmatpush.bf16.msrb.mxu3 %v6282_v15  ;;  %v6349_v7 = vld [vmem:[#allocation5 + $0x290] sm:$0xf]  ;;  %v6386_v8 = vor.u32 %v8919_v0, %v6383_v1  ;;  %v8847_v10 = vld [vmem:[#allocation5 + $0x94] sm:$0xf]  ;;  %v6094_v14 = vor.u32 %v8851_v6, %v6093_v5  ;;  %v6231_v60 = vld [vmem:[#allocation5 + $0x1b8] sm:$0xf0]  ;;  %v6486_v1 = vor.u32 %v8948_v58, %v6485_v56 }
  0x64   :  { %1024 = vmatmul.bf16.vlgmr.msrb.gmra.mxu2 %v9904_v52  ;;  %996 = vmatmul.bf16.vlgmr.msrb.gmra.mxu0 %v9904_v52  ;;  %v8915_v9 = vld [vmem:[#allocation5 + $0x2ac] sm:$0xf0]  ;;  %v6095_v11 = vld [vmem:[#allocation5 + $0xb0] sm:$0xf0]  ;;  %v8944_v61 = vld [vmem:[#allocation5 + $0x39c] sm:$0xf] }
  0x65   :  { %1044 = vmatpush.bf16.msra.mxu0 %v6254_v16  ;;  %1072 = vmatpush.bf16.msra.mxu2 %v6258_v18  ;;  %v8911_v12 = vld [vmem:[#allocation5 + $0x294] sm:$0xf]  ;;  %v6350_v15 = vor.u32 %v8915_v9, %v6349_v7  ;;  %v6098_v16 = vor.u32 %v8847_v10, %v6095_v11  ;;  %v8843_v18 = vld [vmem:[#allocation5 + $0x6c] sm:$0xf0]  ;;  %v6487_v62 = vld [vmem:[#allocation5 + $0x3b8] sm:$0xf0] }
  0x66   :  { %1038 = vmatmul.bf16.vlgmr.msrb.gmra.mxu3 %v9906_v63  ;;  %1010 = vmatmul.bf16.vlgmr.msrb.gmra.mxu1 %v9906_v63  ;;  %v6351_v13 = vld [vmem:[#allocation5 + $0x2b0] sm:$0xf0]  ;;  %v6317_v19 = vld [vmem:[#allocation5 + $0x250] sm:$0xf]  ;;  %v6453_v5 = vld [vmem:[#allocation5 + $0x358] sm:$0xf]  ;;  %v6490_v6 = vor.u32 %v8944_v61, %v6487_v62 }
  0x67   :  { %1058 = vmatpush.bf16.msra.mxu1 %v6510_v17  ;;  %1086 = vmatpush.bf16.msra.mxu3 %v6514_v22  ;;  %v6061_v17 = vld [vmem:[#allocation5 + $0x50] sm:$0xf]  ;;  %v6354_v20 = vor.u32 %v8911_v12, %v6351_v13  ;;  %v8839_v22 = vld [vmem:[#allocation5 + $0x54] sm:$0xf]  ;;  %v8940_v7 = vld [vmem:[#allocation5 + $0x374] sm:$0xf0] }
  0x68   :  { %v8907_v21 = vld [vmem:[#allocation5 + $0x26c] sm:$0xf0]  ;;  %v6063_v23 = vld [vmem:[#allocation5 + $0x70] sm:$0xf0]  ;;  %v6062_v26 = vor.u32 %v8843_v18, %v6061_v17  ;;  %v6199_v9 = vld [vmem:[#allocation5 + $0x178] sm:$0xf0]  ;;  %v6454_v13 = vor.u32 %v8940_v7, %v6453_v5 }
  0x69   :  { %1045 = vmatpush.bf16.msra.mxu0 %v6222_v28  ;;  %1073 = vmatpush.bf16.msra.mxu2 %v6226_v30  ;;  %v8903_v24 = vld [vmem:[#allocation5 + $0x254] sm:$0xf]  ;;  %v6029_v27 = vld [vmem:[#allocation5 + $0x10] sm:$0xf]  ;;  %v6066_v30 = vor.u32 %v8839_v22, %v6063_v23  ;;  %v8936_v10 = vld [vmem:[#allocation5 + $0x35c] sm:$0xf] }
  0x6a   :  { %v6319_v25 = vld [vmem:[#allocation5 + $0x270] sm:$0xf0]  ;;  %v8835_v28 = vld [vmem:[#allocation5 + $0x2c] sm:$0xf0]  ;;  %v6455_v11 = vld [vmem:[#allocation5 + $0x378] sm:$0xf0] }
  0x6b   :  { %1059 = vmatpush.bf16.msra.mxu1 %v6478_v29  ;;  %1087 = vmatpush.bf16.msra.mxu3 %v6482_v34  ;;  %v6318_v29 = vor.u32 %v8907_v21, %v6317_v19  ;;  %v6285_v31 = vld [vmem:[#allocation5 + $0x210] sm:$0xf]  ;;  %v8831_v33 = vld [vmem:[#allocation5 + $0x14] sm:$0xf]  ;;  %v6322_v34 = vor.u32 %v8903_v24, %v6319_v25  ;;  %v6421_v17 = vld [vmem:[#allocation5 + $0x318] sm:$0xf]  ;;  %v6458_v18 = vor.u32 %v8936_v10, %v6455_v11 }
  0x6c   :  { %v8899_v32 = vld [vmem:[#allocation5 + $0x22c] sm:$0xf0]  ;;  %v6031_v35 = vld [vmem:[#allocation5 + $0x30] sm:$0xf0]  ;;  %v8932_v19 = vld [vmem:[#allocation5 + $0x334] sm:$0xf0] }
  0x6d   :  { %1046 = vmatpush.bf16.msra.mxu0 %v6190_v40  ;;  %1074 = vmatpush.bf16.msra.mxu2 %v6194_v42  ;;  %v8895_v36 = vld [vmem:[#allocation5 + $0x214] sm:$0xf]  ;;  %v6517_v40 = vld [vmem:[#allocation5 + $0x3d8] sm:$0xf]  ;;  %v6286_v45 = vor.u32 %v8899_v32, %v6285_v31  ;;  %v6167_v21 = vld [vmem:[#allocation5 + $0x138] sm:$0xf0]  ;;  %v6422_v25 = vor.u32 %v8932_v19, %v6421_v17 }
  0x6e   :  { %v6287_v37 = vld [vmem:[#allocation5 + $0x230] sm:$0xf0]  ;;  %v8956_v42 = vld [vmem:[#allocation5 + $0x3f4] sm:$0xf0]  ;;  %v8928_v22 = vld [vmem:[#allocation5 + $0x31c] sm:$0xf] }
  0x6f   :  { %1060 = vmatpush.bf16.msra.mxu1 %v6446_v41  ;;  %1088 = vmatpush.bf16.msra.mxu3 %v6450_v46  ;;  %v6030_v41 = vor.u32 %v8835_v28, %v6029_v27  ;;  %v6034_v46 = vor.u32 %v8831_v33, %v6031_v35  ;;  %v6290_v49 = vor.u32 %v8895_v36, %v6287_v37  ;;  %v6423_v23 = vld [vmem:[#allocation5 + $0x338] sm:$0xf0]  ;;  %v6133_v27 = vld [vmem:[#allocation5 + $0xd8] sm:$0xf]  ;;  %v6749_v10 = vld [vmem:[#allocation8 + $0x1c0] sm:$0xf] }
  0x70   :  { %v6518_v51 = vor.u32 %v8956_v42, %v6517_v40  ;;  %v8860_v28 = vld [vmem:[#allocation5 + $0xf4] sm:$0xf0]  ;;  %v8856_v32 = vld [vmem:[#allocation5 + $0xdc] sm:$0xf]  ;;  %v9017_v11 = vld [vmem:[#allocation8 + $0x1dc] sm:$0xf0] }
  0x71   :  { %1047 = vmatpush.bf16.msra.mxu0 %v6158_v53  ;;  %1075 = vmatpush.bf16.msra.mxu2 %v6162_v55  ;;  %v6266_v53 = vor.u32 %v8888_v43, %v6263_v44  ;;  %v8884_v55 = vld [vmem:[#allocation5 + $0x1b4] sm:$0xf0]  ;;  %v6135_v33 = vld [vmem:[#allocation5 + $0xf8] sm:$0xf0]  ;;  %v6134_v36 = vor.u32 %v8860_v28, %v6133_v27  ;;  %v9001_v27 = vld [vmem:[#allocation8 + $0x15c] sm:$0xf0] }
  0x72   :  { %v8924_v31 = vld [vmem:[#allocation5 + $0x2f4] sm:$0xf0]  ;;  %v6391_v35 = vld [vmem:[#allocation5 + $0x2f8] sm:$0xf0]  ;;  %v6138_v38 = vor.u32 %v8856_v32, %v6135_v33  ;;  %v6941_v28 = vld [vmem:[#allocation8 + $0x340] sm:$0xf] }
  0x73   :  { %1061 = vmatpush.bf16.msra.mxu1 %v6414_v54  ;;  %1089 = vmatpush.bf16.msra.mxu3 %v6418_v59  ;;  %v6229_v54 = vld [vmem:[#allocation5 + $0x198] sm:$0xf]  ;;  %v8880_v59 = vld [vmem:[#allocation5 + $0x19c] sm:$0xf]  ;;  %v6653_v32 = vld [vmem:[#allocation8 + $0x100] sm:$0xf] }
  0x74   :  { %v6230_v0 = vor.u32 %v8884_v55, %v6229_v54  ;;  %v6101_v39 = vld [vmem:[#allocation5 + $0x98] sm:$0xf]  ;;  %v8848_v44 = vld [vmem:[#allocation5 + $0x9c] sm:$0xf]  ;;  %v8993_v33 = vld [vmem:[#allocation8 + $0x11c] sm:$0xf0] }
  0x75   :  { %1048 = vmatpush.bf16.msra.mxu0 %v6126_v2  ;;  %1076 = vmatpush.bf16.msra.mxu2 %v6130_v4  ;;  %v6234_v2 = vor.u32 %v8880_v59, %v6231_v60  ;;  %v8876_v4 = vld [vmem:[#allocation5 + $0x174] sm:$0xf0]  ;;  %v6359_v47 = vld [vmem:[#allocation5 + $0x2b8] sm:$0xf0] }
  0x76   :  { %v8852_v40 = vld [vmem:[#allocation5 + $0xb4] sm:$0xf0]  ;;  %v6071_v58 = vld [vmem:[#allocation5 + $0x78] sm:$0xf0] }
  0x77   :  { %1062 = vmatpush.bf16.msra.mxu1 %v6382_v3  ;;  %1090 = vmatpush.bf16.msra.mxu3 %v6386_v8  ;;  %v6197_v3 = vld [vmem:[#allocation5 + $0x158] sm:$0xf]  ;;  %v8872_v8 = vld [vmem:[#allocation5 + $0x15c] sm:$0xf]  ;;  %v6102_v48 = vor.u32 %v8852_v40, %v6101_v39  ;;  %v8985_v39 = vld [vmem:[#allocation8 + $0xdc] sm:$0xf0] }
  0x78   :  { %v6198_v12 = vor.u32 %v8876_v4, %v6197_v3  ;;  %v8916_v43 = vld [vmem:[#allocation5 + $0x2b4] sm:$0xf0]  ;;  %v8904_v59 = vld [vmem:[#allocation5 + $0x25c] sm:$0xf]  ;;  %v6877_v40 = vld [vmem:[#allocation8 + $0x2c0] sm:$0xf] }
  0x79   :  { %1049 = vmatpush.bf16.msra.mxu0 %v6094_v14  ;;  %1077 = vmatpush.bf16.msra.mxu2 %v6098_v16  ;;  %v6202_v14 = vor.u32 %v8872_v8, %v6199_v9  ;;  %v8868_v16 = vld [vmem:[#allocation5 + $0x134] sm:$0xf0]  ;;  %v6327_v60 = vld [vmem:[#allocation5 + $0x278] sm:$0xf0] }
  0x7a   :  { %v6325_v54 = vld [vmem:[#allocation5 + $0x258] sm:$0xf]  ;;  %v6330_v5 = vor.u32 %v8904_v59, %v6327_v60  ;;  %v6039_v7 = vld [vmem:[#allocation5 + $0x38] sm:$0xf0]  ;;  %v6525_v59 = vld [vmem:[#allocation8] sm:$0xf] }
  0x7b   :  { %1063 = vmatpush.bf16.msra.mxu1 %v6350_v15  ;;  %1091 = vmatpush.bf16.msra.mxu3 %v6354_v20  ;;  %v6165_v15 = vld [vmem:[#allocation5 + $0x118] sm:$0xf]  ;;  %v8864_v20 = vld [vmem:[#allocation5 + $0x11c] sm:$0xf] }
  0x7c   :  { %v6166_v24 = vor.u32 %v8868_v16, %v6165_v15  ;;  %v8908_v56 = vld [vmem:[#allocation5 + $0x274] sm:$0xf0]  ;;  %v8896_v8 = vld [vmem:[#allocation5 + $0x21c] sm:$0xf] }
  0x7d   :  { %1050 = vmatpush.bf16.msra.mxu0 %v6062_v26  ;;  %1078 = vmatpush.bf16.msra.mxu2 %v6066_v30  ;;  %v6170_v26 = vor.u32 %v8864_v20, %v6167_v21  ;;  %v6426_v30 = vor.u32 %v8928_v22, %v6423_v23  ;;  %v6037_v62 = vld [vmem:[#allocation5 + $0x18] sm:$0xf]  ;;  %v6295_v9 = vld [vmem:[#allocation5 + $0x238] sm:$0xf0]  ;;  %v6717_v20 = vld [vmem:[#allocation8 + $0x180] sm:$0xf] }
  0x7e   :  { %v6293_v3 = vld [vmem:[#allocation5 + $0x218] sm:$0xf]  ;;  %v6298_v17 = vor.u32 %v8896_v8, %v6295_v9  ;;  %v9009_v21 = vld [vmem:[#allocation8 + $0x19c] sm:$0xf0] }
  0x7f   :  { %1064 = vmatpush.bf16.msra.mxu1 %v6318_v29  ;;  %1092 = vmatpush.bf16.msra.mxu3 %v6322_v34  ;;  %v6389_v29 = vld [vmem:[#allocation5 + $0x2d8] sm:$0xf]  ;;  %v8920_v34 = vld [vmem:[#allocation5 + $0x2dc] sm:$0xf]  ;;  %v6973_v22 = vld [vmem:[#allocation8 + $0x380] sm:$0xf] }
  0x80   :  { %v6390_v37 = vor.u32 %v8924_v31, %v6389_v29  ;;  %v6394_v42 = vor.u32 %v8920_v34, %v6391_v35  ;;  %v8900_v4 = vld [vmem:[#allocation5 + $0x234] sm:$0xf0]  ;;  %v9073_v23 = vld [vmem:[#allocation8 + $0x39c] sm:$0xf0] }
  0x81   :  { %1051 = vmatpush.bf16.msra.mxu0 %v6030_v41  ;;  %1079 = vmatpush.bf16.msra.mxu2 %v6034_v46  ;;  %v6357_v41 = vld [vmem:[#allocation5 + $0x298] sm:$0xf]  ;;  %v8912_v46 = vld [vmem:[#allocation5 + $0x29c] sm:$0xf]  ;;  %v6294_v15 = vor.u32 %v8900_v4, %v6293_v3  ;;  %v9065_v29 = vld [vmem:[#allocation8 + $0x35c] sm:$0xf0] }
  0x82   :  { %v6362_v55 = vor.u32 %v8912_v46, %v6359_v47  ;;  %v6942_v31 = vor.u32 %v9065_v29, %v6941_v28  ;;  %v6909_v34 = vld [vmem:[#allocation8 + $0x300] sm:$0xf] }
  0x83   :  { %1065 = vmatpush.bf16.msra.mxu1 %v6286_v45  ;;  %1093 = vmatpush.bf16.msra.mxu3 %v6290_v49  ;;  %v6103_v45 = vld [vmem:[#allocation5 + $0xb8] sm:$0xf0]  ;;  %v6358_v49 = vor.u32 %v8916_v43, %v6357_v41  ;;  %v9057_v35 = vld [vmem:[#allocation8 + $0x31c] sm:$0xf0] }
  0x84   :  { %1080 = vmatmul.bf16.vlgmr.msra.gmra.mxu2 %v9904_v52  ;;  %1052 = vmatmul.bf16.vlgmr.msra.gmra.mxu0 %v9904_v52  ;;  %v8977_v43 = vld [vmem:[#allocation8 + $0x9c] sm:$0xf0] }
  0x85   :  { %1100 = vmatpush.bf16.msrb.mxu0 %v6262_v50  ;;  %1128 = vmatpush.bf16.msrb.mxu2 %v6266_v53  ;;  %v6106_v50 = vor.u32 %v8848_v44, %v6103_v45  ;;  %v8844_v53 = vld [vmem:[#allocation5 + $0x74] sm:$0xf0]  ;;  %v6845_v44 = vld [vmem:[#allocation8 + $0x280] sm:$0xf] }
  0x86   :  { %1094 = vmatmul.bf16.vlgmr.msra.gmra.mxu3 %v9906_v63  ;;  %1066 = vmatmul.bf16.vlgmr.msra.gmra.mxu1 %v9906_v63  ;;  %v9041_v46 = vld [vmem:[#allocation8 + $0x29c] sm:$0xf0] }
  0x87   :  { %1114 = vmatpush.bf16.msrb.mxu1 %v6518_v51  ;;  %1142 = vmatpush.bf16.msrb.mxu3 %v6522_v57  ;;  %v6069_v51 = vld [vmem:[#allocation5 + $0x58] sm:$0xf]  ;;  %v8840_v57 = vld [vmem:[#allocation5 + $0x5c] sm:$0xf]  ;;  %v6557_v47 = vld [vmem:[#allocation8 + $0x40] sm:$0xf] }
  0x88   :  { %v6070_v61 = vor.u32 %v8844_v53, %v6069_v51  ;;  %v9033_v51 = vld [vmem:[#allocation8 + $0x25c] sm:$0xf0] }
  0x89   :  { %1101 = vmatpush.bf16.msrb.mxu0 %v6230_v0  ;;  %1129 = vmatpush.bf16.msrb.mxu2 %v6234_v2  ;;  %v6326_v0 = vor.u32 %v8908_v56, %v6325_v54  ;;  %v8836_v2 = vld [vmem:[#allocation5 + $0x34] sm:$0xf0]  ;;  %v7517_v3 = vld [vmem:[#allocation8 + $0x7c0] sm:$0xf] }
  0x8a   :  { %v9209_v4 = vld [vmem:[#allocation8 + $0x7dc] sm:$0xf0] }
  0x8b   :  { %1115 = vmatpush.bf16.msrb.mxu1 %v6486_v1  ;;  %1143 = vmatpush.bf16.msrb.mxu3 %v6490_v6  ;;  %v6074_v1 = vor.u32 %v8840_v57, %v6071_v58  ;;  %v8832_v6 = vld [vmem:[#allocation5 + $0x1c] sm:$0xf]  ;;  %v7261_v57 = vld [vmem:[#allocation8 + $0x5c0] sm:$0xf] }
  0x8c   :  { %v6042_v16 = vor.u32 %v8832_v6, %v6039_v7  ;;  %v9145_v58 = vld [vmem:[#allocation8 + $0x5dc] sm:$0xf0]  ;;  %v7518_v6 = vor.u32 %v9209_v4, %v7517_v3 }
  0x8d   :  { %1102 = vmatpush.bf16.msrb.mxu0 %v6198_v12  ;;  %1130 = vmatpush.bf16.msrb.mxu2 %v6202_v14  ;;  %v6038_v12 = vor.u32 %v8836_v2, %v6037_v62  ;;  %v9081_v14 = vld [vmem:[#allocation8 + $0x3dc] sm:$0xf0]  ;;  %v7262_v60 = vor.u32 %v9145_v58, %v7261_v57 }
  0x8e   :  { %v6781_v62 = vld [vmem:[#allocation8 + $0x200] sm:$0xf] }
  0x8f   :  { %1116 = vmatpush.bf16.msrb.mxu1 %v6454_v13  ;;  %1144 = vmatpush.bf16.msrb.mxu3 %v6458_v18  ;;  %v7005_v13 = vld [vmem:[#allocation8 + $0x3c0] sm:$0xf]  ;;  %v6750_v18 = vor.u32 %v9017_v11, %v6749_v10 }
  0x90   :  { %v7006_v19 = vor.u32 %v9081_v14, %v7005_v13  ;;  %v9273_v7 = vld [vmem:[#allocation8 + $0x9dc] sm:$0xf0] }
  0x91   :  { %1103 = vmatpush.bf16.msrb.mxu0 %v6166_v24  ;;  %1131 = vmatpush.bf16.msrb.mxu2 %v6170_v26  ;;  %v6718_v24 = vor.u32 %v9009_v21, %v6717_v20  ;;  %v6685_v26 = vld [vmem:[#allocation8 + $0x140] sm:$0xf] }
  0x92   :  { %v8029_v8 = vld [vmem:[#allocation8 + $0xbc0] sm:$0xf] }
  0x93   :  { %1117 = vmatpush.bf16.msrb.mxu1 %v6422_v25  ;;  %1145 = vmatpush.bf16.msrb.mxu3 %v6426_v30  ;;  %v6974_v25 = vor.u32 %v9073_v23, %v6973_v22  ;;  %v6686_v30 = vor.u32 %v9001_v27, %v6685_v26  ;;  %v9337_v9 = vld [vmem:[#allocation8 + $0xbdc] sm:$0xf0] }
  0x94   :  { %v8030_v11 = vor.u32 %v9337_v9, %v8029_v8  ;;  %v9137_v13 = vld [vmem:[#allocation8 + $0x59c] sm:$0xf0] }
  0x95   :  { %1104 = vmatpush.bf16.msrb.mxu0 %v6134_v36  ;;  %1132 = vmatpush.bf16.msrb.mxu2 %v6138_v38  ;;  %v6654_v36 = vor.u32 %v8993_v33, %v6653_v32  ;;  %v6621_v38 = vld [vmem:[#allocation8 + $0xc0] sm:$0xf] }
  0x96   :  { %v6622_v41 = vor.u32 %v8985_v39, %v6621_v38  ;;  %v7485_v14 = vld [vmem:[#allocation8 + $0x780] sm:$0xf] }
  0x97   :  { %1118 = vmatpush.bf16.msrb.mxu1 %v6390_v37  ;;  %1146 = vmatpush.bf16.msrb.mxu3 %v6394_v42  ;;  %v6910_v37 = vor.u32 %v9057_v35, %v6909_v34  ;;  %v6589_v42 = vld [vmem:[#allocation8 + $0x80] sm:$0xf] }
  0x98   :  { %v6590_v45 = vor.u32 %v8977_v43, %v6589_v42  ;;  %v7997_v21 = vld [vmem:[#allocation8 + $0xb80] sm:$0xf] }
  0x99   :  { %1105 = vmatpush.bf16.msrb.mxu0 %v6102_v48  ;;  %1133 = vmatpush.bf16.msrb.mxu2 %v6106_v50  ;;  %v8969_v48 = vld [vmem:[#allocation8 + $0x5c] sm:$0xf0] }
  0x9a   :  { %v6813_v50 = vld [vmem:[#allocation8 + $0x240] sm:$0xf]  ;;  %v6558_v53 = vor.u32 %v8969_v48, %v6557_v47 }
  0x9b   :  { %1119 = vmatpush.bf16.msrb.mxu1 %v6358_v49  ;;  %1147 = vmatpush.bf16.msrb.mxu3 %v6362_v55  ;;  %v6846_v49 = vor.u32 %v9041_v46, %v6845_v44  ;;  %v6814_v54 = vor.u32 %v9033_v51, %v6813_v50  ;;  %v9924_v55 = vld [vmem:[#allocation7] sm:$0xff]  ;;  %v9329_v22 = vld [vmem:[#allocation8 + $0xb9c] sm:$0xf0] }
  0x9c   :  { %v266_v56 = vperm.slane %v9924_v55, 0  ;;  %v7197_v23 = vld [vmem:[#allocation8 + $0x540] sm:$0xf] }
  0x9d   :  { %1106 = vmatpush.bf16.msrb.mxu0 %v6070_v61  ;;  %1134 = vmatpush.bf16.msrb.mxu2 %v6074_v1  ;;  %v8961_v61 = vld [vmem:[#allocation8 + $0x1c] sm:$0xf0] }
  0x9e   :  { %v6526_v1 = vor.u32 %v8961_v61, %v6525_v59  ;;  %v7453_v32 = vld [vmem:[#allocation8 + $0x740] sm:$0xf] }
  0x9f   :  { %1120 = vmatpush.bf16.msrb.mxu1 %v6326_v0  ;;  %1148 = vmatpush.bf16.msrb.mxu3 %v6330_v5  ;;  %v9025_v0 = vld [vmem:[#allocation8 + $0x21c] sm:$0xf0] }
  0xa0   :  { %v6782_v2 = vor.u32 %v9025_v0, %v6781_v62  ;;  %v7773_v5 = vld [vmem:[#allocation8 + $0x9c0] sm:$0xf] }
  0xa1   :  { %1107 = vmatpush.bf16.msrb.mxu0 %v6038_v12  ;;  %1135 = vmatpush.bf16.msrb.mxu2 %v6042_v16  ;;  %v7774_v10 = vor.u32 %v9273_v7, %v7773_v5  ;;  %v7229_v12 = vld [vmem:[#allocation8 + $0x580] sm:$0xf] }
  0xa2   :  { %v9201_v16 = vld [vmem:[#allocation8 + $0x79c] sm:$0xf0] }
  0xa3   :  { %1121 = vmatpush.bf16.msrb.mxu1 %v6294_v15  ;;  %1149 = vmatpush.bf16.msrb.mxu3 %v6298_v17  ;;  %v7230_v15 = vor.u32 %v9137_v13, %v7229_v12  ;;  %v7741_v17 = vld [vmem:[#allocation8 + $0x980] sm:$0xf] }
  0xa4   :  { %1108 = vmatmul.bf16.vlgmr.msrb.gmra.mxu0 %v9904_v52  ;;  %1136 = vmatmul.bf16.vlgmr.msrb.gmra.mxu2 %v9904_v52  ;;  %v9049_v52 = vld [vmem:[#allocation8 + $0x2dc] sm:$0xf0] }
  0xa5   :  { %4318 = vmatpush.bf16.msra.mxu0 %v6750_v18  ;;  %4346 = vmatpush.bf16.msra.mxu2 %v7262_v60  ;;  %v9265_v18 = vld [vmem:[#allocation8 + $0x99c] sm:$0xf0] }
  0xa6   :  { %1122 = vmatmul.bf16.vlgmr.msrb.gmra.mxu1 %v9906_v63  ;;  %1150 = vmatmul.bf16.vlgmr.msrb.gmra.mxu3 %v9906_v63  ;;  %v6878_v63 = vor.u32 %v9049_v52, %v6877_v40  ;;  %v7742_v20 = vor.u32 %v9265_v18, %v7741_v17  ;;  %v9193_v33 = vld [vmem:[#allocation8 + $0x75c] sm:$0xf0] }
  0xa7   :  { %4332 = vmatpush.bf16.msra.mxu1 %v7006_v19  ;;  %4360 = vmatpush.bf16.msra.mxu3 %v7518_v6  ;;  %v7486_v19 = vor.u32 %v9201_v16, %v7485_v14  ;;  %v7709_v34 = vld [vmem:[#allocation8 + $0x940] sm:$0xf]  ;;  %v7454_v35 = vor.u32 %v9193_v33, %v7453_v32 }
  0xa8   :  { %v9321_v38 = vld [vmem:[#allocation8 + $0xb5c] sm:$0xf0] }
  0xa9   :  { %4319 = vmatpush.bf16.msra.mxu0 %v6718_v24  ;;  %4347 = vmatpush.bf16.msra.mxu2 %v7230_v15  ;;  %v7998_v24 = vor.u32 %v9329_v22, %v7997_v21  ;;  %v7421_v46 = vld [vmem:[#allocation8 + $0x700] sm:$0xf] }
  0xaa   :  { %v9185_v47 = vld [vmem:[#allocation8 + $0x71c] sm:$0xf0] }
  0xab   :  { %4333 = vmatpush.bf16.msra.mxu1 %v6974_v25  ;;  %v9129_v25 = vld [vmem:[#allocation8 + $0x55c] sm:$0xf0]  ;;  %4361 = vmatpush.bf16.msra.mxu3 %v7486_v19  ;;  %v7422_v51 = vor.u32 %v9185_v47, %v7421_v46 }
  0xac   :  { %v7198_v27 = vor.u32 %v9129_v25, %v7197_v23  ;;  %v7677_v48 = vld [vmem:[#allocation8 + $0x900] sm:$0xf] }
  0xad   :  { %4320 = vmatpush.bf16.msra.mxu0 %v6686_v30  ;;  %v267_v30 = vperm.slane %v9924_v55, 1  ;;  %v9313_v57 = vld [vmem:[#allocation8 + $0xb1c] sm:$0xf0] }
  0xae   :  { %4348 = vmatpush.bf16.msra.mxu2 %v7198_v27  ;;  %v7133_v62 = vld [vmem:[#allocation8 + $0x4c0] sm:$0xf] }
  0xaf   :  { %4334 = vmatpush.bf16.msra.mxu1 %v6942_v31  ;;  %4362 = vmatpush.bf16.msra.mxu3 %v7454_v35  ;;  %v9113_v0 = vld [vmem:[#allocation8 + $0x4dc] sm:$0xf0] }
  0xb0   :  { %v7389_v4 = vld [vmem:[#allocation8 + $0x6c0] sm:$0xf] }
  0xb1   :  { %4321 = vmatpush.bf16.msra.mxu0 %v6654_v36  ;;  %v9257_v36 = vld [vmem:[#allocation8 + $0x95c] sm:$0xf0] }
  0xb2   :  { %v7710_v40 = vor.u32 %v9257_v36, %v7709_v34  ;;  %v9177_v5 = vld [vmem:[#allocation8 + $0x6dc] sm:$0xf0] }
  0xb3   :  { %4335 = vmatpush.bf16.msra.mxu1 %v6910_v37  ;;  %v7965_v37 = vld [vmem:[#allocation8 + $0xb40] sm:$0xf]  ;;  %4363 = vmatpush.bf16.msra.mxu3 %v7422_v51  ;;  %v7390_v8 = vor.u32 %v9177_v5, %v7389_v4 }
  0xb4   :  { %v7966_v52 = vor.u32 %v9321_v38, %v7965_v37  ;;  %v7645_v6 = vld [vmem:[#allocation8 + $0x8c0] sm:$0xf] }
  0xb5   :  { %4322 = vmatpush.bf16.msra.mxu0 %v6622_v41  ;;  %v7165_v41 = vld [vmem:[#allocation8 + $0x500] sm:$0xf] }
  0xb6   :  { %v9241_v9 = vld [vmem:[#allocation8 + $0x8dc] sm:$0xf0] }
  0xb7   :  { %4336 = vmatpush.bf16.msra.mxu1 %v6878_v63  ;;  %v9121_v63 = vld [vmem:[#allocation8 + $0x51c] sm:$0xf0]  ;;  %v7646_v12 = vor.u32 %v9241_v9, %v7645_v6  ;;  %4364 = vmatpush.bf16.msra.mxu3 %v7390_v8  ;;  %v9013_v6 = vld [vmem:[#allocation8 + $0x1c4] sm:$0xf] }
  0xb8   :  { %v7101_v14 = vld [vmem:[#allocation8 + $0x480] sm:$0xf]  ;;  %v6751_v8 = vld [vmem:[#allocation8 + $0x1e0] sm:$0xf0] }
  0xb9   :  { %4323 = vmatpush.bf16.msra.mxu0 %v6590_v45  ;;  %v7166_v45 = vor.u32 %v9121_v63, %v7165_v41  ;;  %v9105_v15 = vld [vmem:[#allocation8 + $0x49c] sm:$0xf0]  ;;  %v9077_v9 = vld [vmem:[#allocation8 + $0x3c4] sm:$0xf] }
  0xba   :  { %v7102_v19 = vor.u32 %v9105_v15, %v7101_v14  ;;  %v9169_v21 = vld [vmem:[#allocation8 + $0x69c] sm:$0xf0] }
  0xbb   :  { %4337 = vmatpush.bf16.msra.mxu1 %v6846_v49  ;;  %4349 = vmatpush.bf16.msra.mxu2 %v7166_v45  ;;  %v7613_v22 = vld [vmem:[#allocation8 + $0x880] sm:$0xf] }
  0xbc   :  { %v9233_v25 = vld [vmem:[#allocation8 + $0x89c] sm:$0xf0] }
  0xbd   :  { %4324 = vmatpush.bf16.msra.mxu0 %v6558_v53  ;;  %v9249_v53 = vld [vmem:[#allocation8 + $0x91c] sm:$0xf0] }
  0xbe   :  { %v7678_v60 = vor.u32 %v9249_v53, %v7677_v48  ;;  %v9297_v27 = vld [vmem:[#allocation8 + $0xa9c] sm:$0xf0]  ;;  %v268_v48 = vperm.slane %v9924_v55, 2 }
  0xbf   :  { %4338 = vmatpush.bf16.msra.mxu1 %v6814_v54  ;;  %v7933_v54 = vld [vmem:[#allocation8 + $0xb00] sm:$0xf] }
  0xc0   :  { %v7934_v61 = vor.u32 %v9313_v57, %v7933_v54  ;;  %v9097_v32 = vld [vmem:[#allocation8 + $0x45c] sm:$0xf0] }
  0xc1   :  { %4325 = vmatpush.bf16.msra.mxu0 %v6526_v1  ;;  %v941_v26 = vpop.f32.mrf.mxu0  ;;  %v7325_v34 = vld [vmem:[#allocation8 + $0x640] sm:$0xf] }
  0xc2   :  { %v942_v28 = vadd.f32 %v941_v26, %v266_v56  ;;  %v7869_v26 = vld [vmem:[#allocation8 + $0xa80] sm:$0xf] }
  0xc3   :  { %4339 = vmatpush.bf16.msra.mxu1 %v6782_v2  ;;  %v955_v29 = vpop.f32.mrf.mxu1  ;;  %v7134_v2 = vor.u32 %v9113_v0, %v7133_v62  ;;  %v9161_v35 = vld [vmem:[#allocation8 + $0x65c] sm:$0xf0] }
  0xc4   :  { %v956_v31 = vadd.f32 %v955_v29, %v942_v28  ;;  %v7614_v28 = vor.u32 %v9233_v25, %v7613_v22  ;;  %v7870_v29 = vor.u32 %v9297_v27, %v7869_v26  ;;  %v7581_v36 = vld [vmem:[#allocation8 + $0x840] sm:$0xf]  ;;  %v6975_v22 = vld [vmem:[#allocation8 + $0x3a0] sm:$0xf0]  ;;  %v269_v26 = vperm.slane %v9924_v55, 3 }
  0xc5   :  { %4374 = vmatpush.bf16.msrb.mxu0 %v7774_v10  ;;  %4350 = vmatpush.bf16.msra.mxu2 %v7134_v2  ;;  %v9305_v10 = vld [vmem:[#allocation8 + $0xadc] sm:$0xf0] }
  0xc6   :  { %v1156_v43 = vmax.f32 %v956_v31, 0.0  ;;  %v7069_v31 = vld [vmem:[#allocation8 + $0x440] sm:$0xf] }
  0xc7   :  { %4388 = vmatpush.bf16.msrb.mxu1 %v8030_v11  ;;  %v969_v39 = vpop.f32.mrf.mxu2  ;;  %v7070_v33 = vor.u32 %v9097_v32, %v7069_v31  ;;  %v7837_v41 = vld [vmem:[#allocation8 + $0xa40] sm:$0xf] }
  0xc8   :  { %v970_v42 = vadd.f32 %v969_v39, %v267_v30  ;;  %v9289_v63 = vld [vmem:[#allocation8 + $0xa5c] sm:$0xf0] }
  0xc9   :  { %4375 = vmatpush.bf16.msrb.mxu0 %v7742_v20  ;;  %v983_v44 = vpop.f32.mrf.mxu3  ;;  %v943_v50 = vpop.f32.mrf.mxu0  ;;  %v7357_v20 = vld [vmem:[#allocation8 + $0x680] sm:$0xf]  ;;  %4351 = vmatpush.bf16.msra.mxu2 %v7102_v19 }
  0xca   :  { %v984_v49 = vadd.f32 %v983_v44, %v970_v42  ;;  %v944_v58 = vadd.f32 %v943_v50, %v266_v56  ;;  %v7901_v56 = vld [vmem:[#allocation8 + $0xac0] sm:$0xf] }
  0xcb   :  { %4389 = vmatpush.bf16.msrb.mxu1 %v7998_v24  ;;  %v957_v59 = vpop.f32.mrf.mxu1  ;;  %v7902_v13 = vor.u32 %v9305_v10, %v7901_v56  ;;  %v7358_v24 = vor.u32 %v9169_v21, %v7357_v20  ;;  %v7037_v44 = vld [vmem:[#allocation8 + $0x400] sm:$0xf]  ;;  %v7007_v56 = vld [vmem:[#allocation8 + $0x3e0] sm:$0xf0]  ;;  %v6754_v10 = vor.u32 %v9013_v6, %v6751_v8 }
  0xcc   :  { %v1157_v1 = vmax.f32 %v984_v49, 0.0  ;;  %v958_v3 = vadd.f32 %v957_v59, %v944_v58  ;;  %v9089_v45 = vld [vmem:[#allocation8 + $0x41c] sm:$0xf0]  ;;  %v9069_v21 = vld [vmem:[#allocation8 + $0x384] sm:$0xf] }
  0xcd   :  { %4376 = vmatpush.bf16.msrb.mxu0 %v7710_v40  ;;  %4365 = vmatpush.bf16.msra.mxu3 %v7358_v24  ;;  %v7326_v40 = vor.u32 %v9161_v35, %v7325_v34  ;;  %v7038_v49 = vor.u32 %v9089_v45, %v7037_v44  ;;  %v7293_v50 = vld [vmem:[#allocation8 + $0x600] sm:$0xf]  ;;  %v6978_v24 = vor.u32 %v9069_v21, %v6975_v22  ;;  %v6687_v34 = vld [vmem:[#allocation8 + $0x160] sm:$0xf0] }
  0xce   :  { %v9932_v7 = vpack.c.bf16 %v1157_v1, %v1156_v43  ;;  %v1164_v17 = vmax.f32 %v958_v3, 0.0  ;;  %4352 = vmatpush.bf16.msra.mxu2 %v7070_v33  ;;  %v7838_v43 = vor.u32 %v9289_v63, %v7837_v41  ;;  %v9153_v51 = vld [vmem:[#allocation8 + $0x61c] sm:$0xf0]  ;;  %v8997_v33 = vld [vmem:[#allocation8 + $0x144] sm:$0xf] }
  0xcf   :  { %4390 = vmatpush.bf16.msrb.mxu1 %v7966_v52  ;;  %v971_v11 = vpop.f32.mrf.mxu2  ;;  %v9225_v52 = vld [vmem:[#allocation8 + $0x85c] sm:$0xf0]  ;;  %v7294_v53 = vor.u32 %v9153_v51, %v7293_v50 }
  0xd0   :  { %1180 = vst [vmem:[#allocation14] sm:$0xff] %v9932_v7  ;;  %v972_v16 = vadd.f32 %v971_v11, %v267_v30  ;;  %v1726_v37 = vunpack.c.l.b16 %v9932_v7  ;;  %v1727_v38 = vunpack.c.h.b16 %v9932_v7  ;;  %v7582_v42 = vor.u32 %v9225_v52, %v7581_v36  ;;  %v7549_v54 = vld [vmem:[#allocation8 + $0x800] sm:$0xf] }
  0xd1   :  { %4377 = vmatpush.bf16.msrb.mxu0 %v7678_v60  ;;  %v985_v18 = vpop.f32.mrf.mxu3  ;;  %4366 = vmatpush.bf16.msra.mxu3 %v7326_v40  ;;  %v9217_v57 = vld [vmem:[#allocation8 + $0x81c] sm:$0xf0]  ;;  %v7010_v11 = vor.u32 %v9077_v9, %v7007_v56  ;;  %v8981_v9 = vld [vmem:[#allocation8 + $0xc4] sm:$0xf] }
  0xd2   :  { %v986_v23 = vadd.f32 %v985_v18, %v972_v16  ;;  %v7805_v58 = vld [vmem:[#allocation8 + $0xa00] sm:$0xf]  ;;  %4353 = vmatpush.bf16.msra.mxu2 %v7038_v49  ;;  %v6719_v18 = vld [vmem:[#allocation8 + $0x1a0] sm:$0xf0] }
  0xd3   :  { %4391 = vmatpush.bf16.msrb.mxu1 %v7934_v61  ;;  %v7550_v61 = vor.u32 %v9217_v57, %v7549_v54  ;;  %v9281_v62 = vld [vmem:[#allocation8 + $0xa1c] sm:$0xf0]  ;;  %v6655_v49 = vld [vmem:[#allocation8 + $0x120] sm:$0xf0] }
  0xd4   :  { %v1165_v30 = vmax.f32 %v986_v23, 0.0  ;;  %v8285_v0 = vld [vmem:[#allocation8 + $0xdc0] sm:$0xf]  ;;  %v7806_v2 = vor.u32 %v9281_v62, %v7805_v58  ;;  %v9053_v58 = vld [vmem:[#allocation8 + $0x304] sm:$0xf] }
  0xd5   :  { %4378 = vmatpush.bf16.msrb.mxu0 %v7646_v12  ;;  %v9401_v1 = vld [vmem:[#allocation8 + $0xddc] sm:$0xf0]  ;;  %4367 = vmatpush.bf16.msra.mxu3 %v7294_v53 }
  0xd6   :  { %v1176_v39 = vpack.c.bf16 %v1165_v30, %v1164_v17  ;;  %v8286_v3 = vor.u32 %v9401_v1, %v8285_v0  ;;  %v8541_v4 = vld [vmem:[#allocation8 + $0xfc0] sm:$0xf]  ;;  %v9005_v17 = vld [vmem:[#allocation8 + $0x184] sm:$0xf] }
  0xd7   :  { %4392 = vmatpush.bf16.msrb.mxu1 %v7902_v13  ;;  %v9465_v5 = vld [vmem:[#allocation8 + $0xfdc] sm:$0xf0]  ;;  %v6722_v20 = vor.u32 %v9005_v17, %v6719_v18 }
  0xd8   :  { %1184 = vst [vmem:[#allocation14 + $0x20] sm:$0xff] %v1176_v39  ;;  %v1734_v46 = vunpack.c.l.b16 %v1176_v39  ;;  %v1735_v47 = vunpack.c.h.b16 %v1176_v39  ;;  %v8542_v7 = vor.u32 %v9465_v5, %v8541_v4  ;;  %v8253_v12 = vld [vmem:[#allocation8 + $0xd80] sm:$0xf]  ;;  %4402 = vmatpush.bf16.msrb.mxu2 %v8286_v3  ;;  %v6943_v39 = vld [vmem:[#allocation8 + $0x360] sm:$0xf0] }
  0xd9   :  { %4379 = vmatpush.bf16.msrb.mxu0 %v7614_v28  ;;  %v9393_v13 = vld [vmem:[#allocation8 + $0xd9c] sm:$0xf0] }
  0xda   :  { %v9938_v59 = vpack.c.b16 %v1734_v46, %v1726_v37  ;;  %v9940_v60 = vpack.c.b16 %v1735_v47, %v1727_v38  ;;  %v8509_v14 = vld [vmem:[#allocation8 + $0xf80] sm:$0xf]  ;;  %v8254_v15 = vor.u32 %v9393_v13, %v8253_v12  ;;  %4416 = vmatpush.bf16.msrb.mxu3 %v8542_v7  ;;  %v6690_v37 = vor.u32 %v8997_v33, %v6687_v34  ;;  %v9061_v38 = vld [vmem:[#allocation8 + $0x344] sm:$0xf] }
  0xdb   :  { %4393 = vmatpush.bf16.msrb.mxu1 %v7870_v29  ;;  %v9457_v16 = vld [vmem:[#allocation8 + $0xf9c] sm:$0xf0]  ;;  %v6946_v52 = vor.u32 %v9061_v38, %v6943_v39  ;;  %v8989_v47 = vld [vmem:[#allocation8 + $0x104] sm:$0xf] }
  0xdc   :  { %4326 = vmatmul.bf16.vlgmr.msra.gmra.mxu0 %v9938_v59  ;;  %4340 = vmatmul.bf16.vlgmr.msra.gmra.mxu1 %v9940_v60  ;;  %v8510_v19 = vor.u32 %v9457_v16, %v8509_v14  ;;  %v8221_v28 = vld [vmem:[#allocation8 + $0xd40] sm:$0xf]  ;;  %v6658_v57 = vor.u32 %v8989_v47, %v6655_v49  ;;  %v9045_v12 = vld [vmem:[#allocation8 + $0x2c4] sm:$0xf] }
  0xdd   :  { %4380 = vmatpush.bf16.msrb.mxu0 %v7582_v42  ;;  %4403 = vmatpush.bf16.msrb.mxu2 %v8254_v15  ;;  %v9385_v29 = vld [vmem:[#allocation8 + $0xd5c] sm:$0xf0]  ;;  %v8965_v38 = vld [vmem:[#allocation8 + $0x44] sm:$0xf] }
  0xde   :  { %v8477_v31 = vld [vmem:[#allocation8 + $0xf40] sm:$0xf]  ;;  %4417 = vmatpush.bf16.msrb.mxu3 %v8510_v19  ;;  %v8222_v32 = vor.u32 %v9385_v29, %v8221_v28  ;;  %v6591_v28 = vld [vmem:[#allocation8 + $0xa0] sm:$0xf0] }
  0xdf   :  { %4394 = vmatpush.bf16.msrb.mxu1 %v7838_v43  ;;  %v9449_v30 = vld [vmem:[#allocation8 + $0xf5c] sm:$0xf0]  ;;  %v9037_v29 = vld [vmem:[#allocation8 + $0x284] sm:$0xf] }
  0xe0   :  { %v8478_v36 = vor.u32 %v9449_v30, %v8477_v31  ;;  %v8189_v42 = vld [vmem:[#allocation8 + $0xd00] sm:$0xf]  ;;  %v6847_v31 = vld [vmem:[#allocation8 + $0x2a0] sm:$0xf0] }
  0xe1   :  { %4381 = vmatpush.bf16.msrb.mxu0 %v7550_v61  ;;  %v997_v23 = vpop.f32.mrf.mxu0  ;;  %4404 = vmatpush.bf16.msrb.mxu2 %v8222_v32  ;;  %v9377_v43 = vld [vmem:[#allocation8 + $0xd1c] sm:$0xf0]  ;;  %v6911_v61 = vld [vmem:[#allocation8 + $0x320] sm:$0xf0]  ;;  %v6850_v30 = vor.u32 %v9037_v29, %v6847_v31 }
  0xe2   :  { %v998_v25 = vadd.f32 %v997_v23, %v268_v48  ;;  %v8445_v44 = vld [vmem:[#allocation8 + $0xf00] sm:$0xf]  ;;  %4418 = vmatpush.bf16.msrb.mxu3 %v8478_v36  ;;  %v8190_v45 = vor.u32 %v9377_v43, %v8189_v42  ;;  %v6914_v1 = vor.u32 %v9053_v58, %v6911_v61  ;;  %v9029_v42 = vld [vmem:[#allocation8 + $0x244] sm:$0xf] }
  0xe3   :  { %4395 = vmatpush.bf16.msrb.mxu1 %v7806_v2  ;;  %v1011_v27 = vpop.f32.mrf.mxu1  ;;  %v9441_v46 = vld [vmem:[#allocation8 + $0xf1c] sm:$0xf0]  ;;  %v6815_v43 = vld [vmem:[#allocation8 + $0x260] sm:$0xf0] }
  0xe4   :  { %v1012_v35 = vadd.f32 %v1011_v27, %v998_v25  ;;  %v8446_v54 = vor.u32 %v9441_v46, %v8445_v44  ;;  %v8157_v3 = vld [vmem:[#allocation8 + $0xcc0] sm:$0xf]  ;;  %v9117_v29 = vld [vmem:[#allocation8 + $0x504] sm:$0xf] }
  0xe5   :  { %4430 = vmatpush.bf16.msra.mxu0 %v6754_v10  ;;  %4405 = vmatpush.bf16.msrb.mxu2 %v8190_v45  ;;  %v9369_v4 = vld [vmem:[#allocation8 + $0xcdc] sm:$0xf0]  ;;  %v6818_v45 = vor.u32 %v9029_v42, %v6815_v43  ;;  %v7167_v31 = vld [vmem:[#allocation8 + $0x520] sm:$0xf0] }
  0xe6   :  { %v1158_v50 = vmax.f32 %v1012_v35, 0.0  ;;  %4419 = vmatpush.bf16.msrb.mxu3 %v8446_v54  ;;  %v8158_v6 = vor.u32 %v9369_v4, %v8157_v3  ;;  %v8413_v7 = vld [vmem:[#allocation8 + $0xec0] sm:$0xf]  ;;  %v7391_v43 = vld [vmem:[#allocation8 + $0x6e0] sm:$0xf0] }
  0xe7   :  { %4444 = vmatpush.bf16.msra.mxu1 %v7010_v11  ;;  %v1025_v40 = vpop.f32.mrf.mxu2  ;;  %v9433_v8 = vld [vmem:[#allocation8 + $0xedc] sm:$0xf0]  ;;  %v6623_v11 = vld [vmem:[#allocation8 + $0xe0] sm:$0xf0] }
  0xe8   :  { %v1026_v41 = vadd.f32 %v1025_v40, %v269_v26  ;;  %v8414_v10 = vor.u32 %v9433_v8, %v8413_v7  ;;  %v6626_v14 = vor.u32 %v8981_v9, %v6623_v11  ;;  %v8125_v19 = vld [vmem:[#allocation8 + $0xc80] sm:$0xf]  ;;  %v9205_v7 = vld [vmem:[#allocation8 + $0x7c4] sm:$0xf] }
  0xe9   :  { %4431 = vmatpush.bf16.msra.mxu0 %v6722_v20  ;;  %v1039_v63 = vpop.f32.mrf.mxu3  ;;  %v999_v53 = vpop.f32.mrf.mxu0  ;;  %4406 = vmatpush.bf16.msrb.mxu2 %v8158_v6  ;;  %v9361_v20 = vld [vmem:[#allocation8 + $0xc9c] sm:$0xf0]  ;;  %v7263_v6 = vld [vmem:[#allocation8 + $0x5e0] sm:$0xf0] }
  0xea   :  { %v1040_v51 = vadd.f32 %v1039_v63, %v1026_v41  ;;  %v1000_v62 = vadd.f32 %v999_v53, %v268_v48  ;;  %v6879_v48 = vld [vmem:[#allocation8 + $0x2e0] sm:$0xf0]  ;;  %4420 = vmatpush.bf16.msrb.mxu3 %v8414_v10  ;;  %v8126_v21 = vor.u32 %v9361_v20, %v8125_v19  ;;  %v8381_v22 = vld [vmem:[#allocation8 + $0xe80] sm:$0xf] }
  0xeb   :  { %4445 = vmatpush.bf16.msra.mxu1 %v6978_v24  ;;  %v1013_v0 = vpop.f32.mrf.mxu1  ;;  %v6882_v15 = vor.u32 %v9045_v12, %v6879_v48  ;;  %v9425_v23 = vld [vmem:[#allocation8 + $0xe9c] sm:$0xf0]  ;;  %v8973_v24 = vld [vmem:[#allocation8 + $0x84] sm:$0xf] }
  0xec   :  { %v1159_v2 = vmax.f32 %v1040_v51, 0.0  ;;  %v1014_v5 = vadd.f32 %v1013_v0, %v1000_v62  ;;  %v8382_v27 = vor.u32 %v9425_v23, %v8381_v22  ;;  %v6594_v32 = vor.u32 %v8973_v24, %v6591_v28  ;;  %v8093_v33 = vld [vmem:[#allocation8 + $0xc40] sm:$0xf]  ;;  %v6559_v63 = vld [vmem:[#allocation8 + $0x60] sm:$0xf0] }
  0xed   :  { %4432 = vmatpush.bf16.msra.mxu0 %v6690_v37  ;;  %4407 = vmatpush.bf16.msrb.mxu2 %v8126_v21  ;;  %v9353_v34 = vld [vmem:[#allocation8 + $0xc5c] sm:$0xf0]  ;;  %v6562_v44 = vor.u32 %v8965_v38, %v6559_v63  ;;  %v6527_v0 = vld [vmem:[#allocation8 + $0x20] sm:$0xf0]  ;;  %v271_v21 = vperm.slane %v9924_v55, 5 }
  0xee   :  { %v9951_v56 = vpack.c.bf16 %v1159_v2, %v1158_v50  ;;  %v1166_v17 = vmax.f32 %v1014_v5, 0.0  ;;  %4421 = vmatpush.bf16.msrb.mxu3 %v8382_v27  ;;  %v8094_v35 = vor.u32 %v9353_v34, %v8093_v33  ;;  %v8349_v36 = vld [vmem:[#allocation8 + $0xe40] sm:$0xf]  ;;  %v6783_v2 = vld [vmem:[#allocation8 + $0x220] sm:$0xf0]  ;;  %v7170_v34 = vor.u32 %v9117_v29, %v7167_v31 }
  0xef   :  { %4446 = vmatpush.bf16.msra.mxu1 %v6946_v52  ;;  %v1027_v13 = vpop.f32.mrf.mxu2  ;;  %v9417_v37 = vld [vmem:[#allocation8 + $0xe5c] sm:$0xf0]  ;;  %v9141_v5 = vld [vmem:[#allocation8 + $0x5c4] sm:$0xf] }
  0xf0   :  { %1181 = vst [vmem:[#allocation14 + $0x8] sm:$0xff] %v9951_v56  ;;  %v1028_v16 = vadd.f32 %v1027_v13, %v269_v26  ;;  %v1728_v39 = vunpack.c.l.b16 %v9951_v56  ;;  %v1729_v40 = vunpack.c.h.b16 %v9951_v56  ;;  %v8350_v41 = vor.u32 %v9417_v37, %v8349_v36  ;;  %v8061_v49 = vld [vmem:[#allocation8 + $0xc00] sm:$0xf]  ;;  %v7519_v9 = vld [vmem:[#allocation8 + $0x7e0] sm:$0xf0] }
  0xf1   :  { %4433 = vmatpush.bf16.msra.mxu0 %v6658_v57  ;;  %v1041_v18 = vpop.f32.mrf.mxu3  ;;  %4408 = vmatpush.bf16.msrb.mxu2 %v8094_v35  ;;  %v9345_v50 = vld [vmem:[#allocation8 + $0xc1c] sm:$0xf0]  ;;  %v8957_v57 = vld [vmem:[#allocation8 + $0x4] sm:$0xf]  ;;  %v7266_v8 = vor.u32 %v9141_v5, %v7263_v6  ;;  %v270_v56 = vperm.slane %v9924_v55, 4  ;;  %v7522_v10 = vor.u32 %v9205_v7, %v7519_v9 }
  0xf2   :  { %v1042_v25 = vadd.f32 %v1041_v18, %v1028_v16  ;;  %4422 = vmatpush.bf16.msrb.mxu3 %v8350_v41  ;;  %v8062_v51 = vor.u32 %v9345_v50, %v8061_v49  ;;  %v8317_v53 = vld [vmem:[#allocation8 + $0xe00] sm:$0xf]  ;;  %v6530_v3 = vor.u32 %v8957_v57, %v6527_v0  ;;  %v9133_v11 = vld [vmem:[#allocation8 + $0x584] sm:$0xf] }
  0xf3   :  { %4447 = vmatpush.bf16.msra.mxu1 %v6914_v1  ;;  %v9409_v54 = vld [vmem:[#allocation8 + $0xe1c] sm:$0xf0]  ;;  %v9021_v1 = vld [vmem:[#allocation8 + $0x204] sm:$0xf] }
  0xf4   :  { %v1167_v26 = vmax.f32 %v1042_v25, 0.0  ;;  %v8318_v62 = vor.u32 %v9409_v54, %v8317_v53  ;;  %v6786_v4 = vor.u32 %v9021_v1, %v6783_v2  ;;  %v7231_v12 = vld [vmem:[#allocation8 + $0x5a0] sm:$0xf0] }
  0xf5   :  { %4434 = vmatpush.bf16.msra.mxu0 %v6626_v14  ;;  %4409 = vmatpush.bf16.msrb.mxu2 %v8062_v51  ;;  %v9197_v48 = vld [vmem:[#allocation8 + $0x784] sm:$0xf]  ;;  %v7234_v13 = vor.u32 %v9133_v11, %v7231_v12 }
  0xf6   :  { %v1177_v52 = vpack.c.bf16 %v1167_v26, %v1166_v17  ;;  %4423 = vmatpush.bf16.msrb.mxu3 %v8318_v62  ;;  %v7487_v14 = vld [vmem:[#allocation8 + $0x7a0] sm:$0xf0] }
  0xf7   :  { %4448 = vmatpush.bf16.msra.mxu1 %v6882_v15  ;;  %v7490_v16 = vor.u32 %v9197_v48, %v7487_v14  ;;  %v9125_v19 = vld [vmem:[#allocation8 + $0x544] sm:$0xf] }
  0xf8   :  { %1185 = vst [vmem:[#allocation14 + $0x28] sm:$0xff] %v1177_v52  ;;  %v1736_v46 = vunpack.c.l.b16 %v1177_v52  ;;  %v1737_v47 = vunpack.c.h.b16 %v1177_v52  ;;  %v7199_v20 = vld [vmem:[#allocation8 + $0x560] sm:$0xf0] }
  0xf9   :  { %4435 = vmatpush.bf16.msra.mxu0 %v6594_v32  ;;  %v9189_v22 = vld [vmem:[#allocation8 + $0x744] sm:$0xf]  ;;  %v7202_v24 = vor.u32 %v9125_v19, %v7199_v20 }
  0xfa   :  { %v9958_v58 = vpack.c.b16 %v1736_v46, %v1728_v39  ;;  %v9960_v61 = vpack.c.b16 %v1737_v47, %v1729_v40  ;;  %v7455_v23 = vld [vmem:[#allocation8 + $0x760] sm:$0xf0] }
  0xfb   :  { %4449 = vmatpush.bf16.msra.mxu1 %v6850_v30  ;;  %v7458_v25 = vor.u32 %v9189_v22, %v7455_v23  ;;  %v9181_v26 = vld [vmem:[#allocation8 + $0x704] sm:$0xf] }
  0xfc   :  { %4354 = vmatmul.bf16.vlgmr.msra.gmra.mxu2 %v9958_v58  ;;  %4368 = vmatmul.bf16.vlgmr.msra.gmra.mxu3 %v9960_v61  ;;  %v7423_v33 = vld [vmem:[#allocation8 + $0x720] sm:$0xf0] }
  0xfd   :  { %4436 = vmatpush.bf16.msra.mxu0 %v6562_v44  ;;  %4458 = vmatpush.bf16.msra.mxu2 %v7266_v8  ;;  %v7426_v35 = vor.u32 %v9181_v26, %v7423_v33  ;;  %v9109_v52 = vld [vmem:[#allocation8 + $0x4c4] sm:$0xf]  ;;  %v272_v26 = vperm.slane %v9924_v55, 6 }
  0xfe   :  { %4472 = vmatpush.bf16.msra.mxu3 %v7522_v10  ;;  %v7135_v41 = vld [vmem:[#allocation8 + $0x4e0] sm:$0xf0] }
  0xff   :  { %4450 = vmatpush.bf16.msra.mxu1 %v6818_v45  ;;  %v9173_v63 = vld [vmem:[#allocation8 + $0x6c4] sm:$0xf]  ;;  %v7138_v44 = vor.u32 %v9109_v52, %v7135_v41  ;;  %v273_v52 = vperm.slane %v9924_v55, 7 }
 0x100   :  { %v7394_v45 = vor.u32 %v9173_v63, %v7391_v43  ;;  %v9101_v50 = vld [vmem:[#allocation8 + $0x484] sm:$0xf] }
 0x101   :  { %4437 = vmatpush.bf16.msra.mxu0 %v6530_v3  ;;  %v1053_v15 = vpop.f32.mrf.mxu0  ;;  %4459 = vmatpush.bf16.msra.mxu2 %v7234_v13  ;;  %v7103_v51 = vld [vmem:[#allocation8 + $0x4a0] sm:$0xf0] }
 0x102   :  { %v1054_v17 = vadd.f32 %v1053_v15, %v270_v56  ;;  %4473 = vmatpush.bf16.msra.mxu3 %v7490_v16  ;;  %v9165_v57 = vld [vmem:[#allocation8 + $0x684] sm:$0xf]  ;;  %v7106_v0 = vor.u32 %v9101_v50, %v7103_v51 }
 0x103   :  { %4451 = vmatpush.bf16.msra.mxu1 %v6786_v4  ;;  %v1067_v18 = vpop.f32.mrf.mxu1  ;;  %v7359_v62 = vld [vmem:[#allocation8 + $0x6a0] sm:$0xf0] }
 0x104   :  { %v1068_v27 = vadd.f32 %v1067_v18, %v1054_v17  ;;  %v7362_v1 = vor.u32 %v9165_v57, %v7359_v62  ;;  %v9093_v4 = vld [vmem:[#allocation8 + $0x444] sm:$0xf] }
 0x105   :  { %4460 = vmatpush.bf16.msra.mxu2 %v7202_v24  ;;  %v7071_v5 = vld [vmem:[#allocation8 + $0x460] sm:$0xf0] }
 0x106   :  { %4474 = vmatpush.bf16.msra.mxu3 %v7458_v25  ;;  %v1160_v36 = vmax.f32 %v1068_v27, 0.0  ;;  %v9157_v6 = vld [vmem:[#allocation8 + $0x644] sm:$0xf] }
 0x107   :  { %v1081_v28 = vpop.f32.mrf.mxu2  ;;  %v7327_v8 = vld [vmem:[#allocation8 + $0x660] sm:$0xf0] }
 0x108   :  { %v1082_v32 = vadd.f32 %v1081_v28, %v271_v21  ;;  %v9269_v9 = vld [vmem:[#allocation8 + $0x9c4] sm:$0xf]  ;;  %v7330_v10 = vor.u32 %v9157_v6, %v7327_v8 }
 0x109   :  { %v1095_v30 = vpop.f32.mrf.mxu3  ;;  %v1055_v38 = vpop.f32.mrf.mxu0  ;;  %4461 = vmatpush.bf16.msra.mxu2 %v7170_v34  ;;  %v7775_v13 = vld [vmem:[#allocation8 + $0x9e0] sm:$0xf0] }
 0x10a   :  { %v1096_v37 = vadd.f32 %v1095_v30, %v1082_v32  ;;  %v1056_v39 = vadd.f32 %v1055_v38, %v270_v56  ;;  %4475 = vmatpush.bf16.msra.mxu3 %v7426_v35  ;;  %v7074_v56 = vor.u32 %v9093_v4, %v7071_v5  ;;  %v9333_v14 = vld [vmem:[#allocation8 + $0xbc4] sm:$0xf]  ;;  %v7778_v22 = vor.u32 %v9269_v9, %v7775_v13 }
 0x10b   :  { %v1069_v40 = vpop.f32.mrf.mxu1  ;;  %v8031_v15 = vld [vmem:[#allocation8 + $0xbe0] sm:$0xf0] }
 0x10c   :  { %v1161_v42 = vmax.f32 %v1096_v37, 0.0  ;;  %v1070_v47 = vadd.f32 %v1069_v40, %v1056_v39  ;;  %v9085_v16 = vld [vmem:[#allocation8 + $0x404] sm:$0xf]  ;;  %v8034_v23 = vor.u32 %v9333_v14, %v8031_v15 }
 0x10d   :  { %4462 = vmatpush.bf16.msra.mxu2 %v7138_v44  ;;  %v7039_v17 = vld [vmem:[#allocation8 + $0x420] sm:$0xf0] }
 0x10e   :  { %v1174_v46 = vpack.c.bf16 %v1161_v42, %v1160_v36  ;;  %4476 = vmatpush.bf16.msra.mxu3 %v7394_v45  ;;  %v1168_v2 = vmax.f32 %v1070_v47, 0.0  ;;  %v9149_v18 = vld [vmem:[#allocation8 + $0x604] sm:$0xf]  ;;  %v7042_v32 = vor.u32 %v9085_v16, %v7039_v17 }
 0x10f   :  { %v1083_v49 = vpop.f32.mrf.mxu2  ;;  %v9261_v24 = vld [vmem:[#allocation8 + $0x984] sm:$0xf] }
 0x110   :  { %1182 = vst [vmem:[#allocation14 + $0x10] sm:$0xff] %v1174_v46  ;;  %v1084_v53 = vadd.f32 %v1083_v49, %v271_v21  ;;  %v1730_v11 = vunpack.c.l.b16 %v1174_v46  ;;  %v1731_v12 = vunpack.c.h.b16 %v1174_v46  ;;  %v7295_v21 = vld [vmem:[#allocation8 + $0x620] sm:$0xf0] }
 0x111   :  { %v1097_v54 = vpop.f32.mrf.mxu3  ;;  %4463 = vmatpush.bf16.msra.mxu2 %v7106_v0  ;;  %v7743_v28 = vld [vmem:[#allocation8 + $0x9a0] sm:$0xf0]  ;;  %v7298_v30 = vor.u32 %v9149_v18, %v7295_v21 }
 0x112   :  { %v1098_v3 = vadd.f32 %v1097_v54, %v1084_v53  ;;  %4477 = vmatpush.bf16.msra.mxu3 %v7362_v1  ;;  %v9325_v29 = vld [vmem:[#allocation8 + $0xb84] sm:$0xf]  ;;  %v7746_v33 = vor.u32 %v9261_v24, %v7743_v28 }
 0x113   :  { %v7999_v31 = vld [vmem:[#allocation8 + $0xba0] sm:$0xf0] }
 0x114   :  { %v1169_v7 = vmax.f32 %v1098_v3, 0.0  ;;  %v8002_v34 = vor.u32 %v9325_v29, %v7999_v31  ;;  %v9253_v35 = vld [vmem:[#allocation8 + $0x944] sm:$0xf] }
 0x115   :  { %4464 = vmatpush.bf16.msra.mxu2 %v7074_v56  ;;  %v7711_v37 = vld [vmem:[#allocation8 + $0x960] sm:$0xf0] }
 0x116   :  { %v1178_v48 = vpack.c.bf16 %v1169_v7, %v1168_v2  ;;  %4478 = vmatpush.bf16.msra.mxu3 %v7330_v10  ;;  %v9317_v38 = vld [vmem:[#allocation8 + $0xb44] sm:$0xf]  ;;  %v7714_v41 = vor.u32 %v9253_v35, %v7711_v37 }
 0x117   :  { %v7967_v39 = vld [vmem:[#allocation8 + $0xb60] sm:$0xf0] }
 0x118   :  { %1186 = vst [vmem:[#allocation14 + $0x30] sm:$0xff] %v1178_v48  ;;  %v1738_v19 = vunpack.c.l.b16 %v1178_v48  ;;  %v1739_v20 = vunpack.c.h.b16 %v1178_v48  ;;  %v7970_v63 = vor.u32 %v9317_v38, %v7967_v39  ;;  %v9245_v42 = vld [vmem:[#allocation8 + $0x904] sm:$0xf]  ;;  %v6757_v38 = vld [vmem:[#allocation8 + $0x1c8] sm:$0xf] }
 0x119   :  { %4465 = vmatpush.bf16.msra.mxu2 %v7042_v32  ;;  %v7679_v43 = vld [vmem:[#allocation8 + $0x920] sm:$0xf0] }
 0x11a   :  { %v9966_v25 = vpack.c.b16 %v1738_v19, %v1730_v11  ;;  %v9968_v27 = vpack.c.b16 %v1739_v20, %v1731_v12  ;;  %4479 = vmatpush.bf16.msra.mxu3 %v7298_v30  ;;  %v9309_v44 = vld [vmem:[#allocation8 + $0xb04] sm:$0xf]  ;;  %v7682_v50 = vor.u32 %v9245_v42, %v7679_v43 }
 0x11b   :  { %v7935_v45 = vld [vmem:[#allocation8 + $0xb20] sm:$0xf0] }
 0x11c   :  { %4382 = vmatmul.bf16.vlgmr.msrb.gmra.mxu0 %v9966_v25  ;;  %4396 = vmatmul.bf16.vlgmr.msrb.gmra.mxu1 %v9968_v27  ;;  %v7938_v51 = vor.u32 %v9309_v44, %v7935_v45  ;;  %v9237_v53 = vld [vmem:[#allocation8 + $0x8c4] sm:$0xf] }
 0x11d   :  { %4486 = vmatpush.bf16.msrb.mxu0 %v7778_v22  ;;  %4500 = vmatpush.bf16.msrb.mxu1 %v8034_v23  ;;  %v7647_v62 = vld [vmem:[#allocation8 + $0x8e0] sm:$0xf0] }
 0x11e   :  { %v9301_v0 = vld [vmem:[#allocation8 + $0xac4] sm:$0xf]  ;;  %v7650_v4 = vor.u32 %v9237_v53, %v7647_v62 }
 0x11f   :  { %v7903_v1 = vld [vmem:[#allocation8 + $0xae0] sm:$0xf0] }
 0x120   :  { %v7906_v5 = vor.u32 %v9301_v0, %v7903_v1  ;;  %v9229_v6 = vld [vmem:[#allocation8 + $0x884] sm:$0xf]  ;;  %v6725_v1 = vld [vmem:[#allocation8 + $0x188] sm:$0xf] }
 0x121   :  { %v1109_v36 = vpop.f32.mrf.mxu0  ;;  %4487 = vmatpush.bf16.msrb.mxu0 %v7746_v33  ;;  %4501 = vmatpush.bf16.msrb.mxu1 %v8002_v34  ;;  %v7615_v7 = vld [vmem:[#allocation8 + $0x8a0] sm:$0xf0] }
 0x122   :  { %v1110_v40 = vadd.f32 %v1109_v36, %v272_v26  ;;  %v9293_v56 = vld [vmem:[#allocation8 + $0xa84] sm:$0xf]  ;;  %v7618_v13 = vor.u32 %v9229_v6, %v7615_v7 }
 0x123   :  { %v1123_v46 = vpop.f32.mrf.mxu1  ;;  %v7871_v10 = vld [vmem:[#allocation8 + $0xaa0] sm:$0xf0] }
 0x124   :  { %v1124_v47 = vadd.f32 %v1123_v46, %v1110_v40  ;;  %v7874_v14 = vor.u32 %v9293_v56, %v7871_v10  ;;  %v9221_v15 = vld [vmem:[#allocation8 + $0x844] sm:$0xf] }
 0x125   :  { %4488 = vmatpush.bf16.msrb.mxu0 %v7714_v41  ;;  %4502 = vmatpush.bf16.msrb.mxu1 %v7970_v63  ;;  %v7583_v16 = vld [vmem:[#allocation8 + $0x860] sm:$0xf0]  ;;  %v7013_v41 = vld [vmem:[#allocation8 + $0x3c8] sm:$0xf] }
 0x126   :  { %v1162_v2 = vmax.f32 %v1124_v47, 0.0  ;;  %v9285_v19 = vld [vmem:[#allocation8 + $0xa44] sm:$0xf]  ;;  %v7586_v23 = vor.u32 %v9221_v15, %v7583_v16  ;;  %v9082_v63 = vld [vmem:[#allocation8 + $0x3e4] sm:$0xf0] }
 0x127   :  { %v1137_v49 = vpop.f32.mrf.mxu2  ;;  %v7839_v20 = vld [vmem:[#allocation8 + $0xa60] sm:$0xf0] }
 0x128   :  { %v1138_v54 = vadd.f32 %v1137_v49, %v273_v52  ;;  %v7842_v24 = vor.u32 %v9285_v19, %v7839_v20  ;;  %v9213_v28 = vld [vmem:[#allocation8 + $0x804] sm:$0xf] }
 0x129   :  { %v1151_v57 = vpop.f32.mrf.mxu3  ;;  %v1111_v55 = vpop.f32.mrf.mxu0  ;;  %4489 = vmatpush.bf16.msrb.mxu0 %v7682_v50  ;;  %4503 = vmatpush.bf16.msrb.mxu1 %v7938_v51  ;;  %v7551_v29 = vld [vmem:[#allocation8 + $0x820] sm:$0xf0] }
 0x12a   :  { %v1152_v3 = vadd.f32 %v1151_v57, %v1138_v54  ;;  %v1112_v9 = vadd.f32 %v1111_v55, %v272_v26  ;;  %v9277_v30 = vld [vmem:[#allocation8 + $0xa04] sm:$0xf]  ;;  %v7554_v39 = vor.u32 %v9213_v28, %v7551_v29  ;;  %v7014_v57 = vor.u32 %v9082_v63, %v7013_v41  ;;  %v9010_v55 = vld [vmem:[#allocation8 + $0x1a4] sm:$0xf0] }
 0x12b   :  { %v1125_v12 = vpop.f32.mrf.mxu1  ;;  %v7807_v26 = vld [vmem:[#allocation8 + $0xa20] sm:$0xf0]  ;;  %v9058_v28 = vld [vmem:[#allocation8 + $0x324] sm:$0xf0] }
 0x12c   :  { %v1163_v8 = vmax.f32 %v1152_v3, 0.0  ;;  %4438 = vmatmul.bf16.vlgmr.msra.gmra.mxu0 %v9938_v59  ;;  %4452 = vmatmul.bf16.vlgmr.msra.gmra.mxu1 %v9940_v60  ;;  %v1126_v17 = vadd.f32 %v1125_v12, %v1112_v9  ;;  %v9397_v33 = vld [vmem:[#allocation8 + $0xdc4] sm:$0xf]  ;;  %v7810_v40 = vor.u32 %v9277_v30, %v7807_v26  ;;  %v9074_v3 = vld [vmem:[#allocation8 + $0x3a4] sm:$0xf0] }
 0x12d   :  { %4490 = vmatpush.bf16.msrb.mxu0 %v7650_v4  ;;  %4504 = vmatpush.bf16.msrb.mxu1 %v7906_v5  ;;  %v8287_v34 = vld [vmem:[#allocation8 + $0xde0] sm:$0xf0]  ;;  %v9002_v12 = vld [vmem:[#allocation8 + $0x164] sm:$0xf0] }
 0x12e   :  { %v1175_v11 = vpack.c.bf16 %v1163_v8, %v1162_v2  ;;  %v1170_v31 = vmax.f32 %v1126_v17, 0.0  ;;  %v9461_v36 = vld [vmem:[#allocation8 + $0xfc4] sm:$0xf]  ;;  %v8290_v46 = vor.u32 %v9397_v33, %v8287_v34  ;;  %v6981_v2 = vld [vmem:[#allocation8 + $0x388] sm:$0xf]  ;;  %v6726_v8 = vor.u32 %v9010_v55, %v6725_v1 }
 0x12f   :  { %v1139_v48 = vpop.f32.mrf.mxu2  ;;  %v8543_v37 = vld [vmem:[#allocation8 + $0xfe0] sm:$0xf0]  ;;  %v6982_v9 = vor.u32 %v9074_v3, %v6981_v2 }
 0x130   :  { %1183 = vst [vmem:[#allocation14 + $0x18] sm:$0xff] %v1175_v11  ;;  %v1140_v18 = vadd.f32 %v1139_v48, %v273_v52  ;;  %v9018_v52 = vld [vmem:[#allocation8 + $0x1e4] sm:$0xf0]  ;;  %v1732_v42 = vunpack.c.l.b16 %v1175_v11  ;;  %v1733_v43 = vunpack.c.h.b16 %v1175_v11  ;;  %v8546_v47 = vor.u32 %v9461_v36, %v8543_v37  ;;  %v9389_v49 = vld [vmem:[#allocation8 + $0xd84] sm:$0xf] }
 0x131   :  { %v1153_v21 = vpop.f32.mrf.mxu3  ;;  %4491 = vmatpush.bf16.msrb.mxu0 %v7618_v13  ;;  %4505 = vmatpush.bf16.msrb.mxu1 %v7874_v14  ;;  %v8255_v50 = vld [vmem:[#allocation8 + $0xda0] sm:$0xf0]  ;;  %v6758_v54 = vor.u32 %v9018_v52, %v6757_v38  ;;  %v6693_v11 = vld [vmem:[#allocation8 + $0x148] sm:$0xf] }
 0x132   :  { %v1154_v22 = vadd.f32 %v1153_v21, %v1140_v18  ;;  %v9453_v62 = vld [vmem:[#allocation8 + $0xf84] sm:$0xf]  ;;  %v8258_v4 = vor.u32 %v9389_v49, %v8255_v50  ;;  %v6949_v48 = vld [vmem:[#allocation8 + $0x348] sm:$0xf]  ;;  %v6694_v18 = vor.u32 %v9002_v12, %v6693_v11 }
 0x133   :  { %v8511_v0 = vld [vmem:[#allocation8 + $0xfa0] sm:$0xf0]  ;;  %v9066_v13 = vld [vmem:[#allocation8 + $0x364] sm:$0xf0] }
 0x134   :  { %v1171_v32 = vmax.f32 %v1154_v22, 0.0  ;;  %v8514_v5 = vor.u32 %v9453_v62, %v8511_v0  ;;  %v9381_v6 = vld [vmem:[#allocation8 + $0xd44] sm:$0xf]  ;;  %v6950_v19 = vor.u32 %v9066_v13, %v6949_v48  ;;  %v6661_v22 = vld [vmem:[#allocation8 + $0x108] sm:$0xf] }
 0x135   :  { %4492 = vmatpush.bf16.msrb.mxu0 %v7586_v23  ;;  %4506 = vmatpush.bf16.msrb.mxu1 %v7842_v24  ;;  %v8223_v7 = vld [vmem:[#allocation8 + $0xd60] sm:$0xf0]  ;;  %v8994_v23 = vld [vmem:[#allocation8 + $0x124] sm:$0xf0] }
 0x136   :  { %v1179_v35 = vpack.c.bf16 %v1171_v32, %v1170_v31  ;;  %v9445_v56 = vld [vmem:[#allocation8 + $0xf44] sm:$0xf]  ;;  %v8226_v14 = vor.u32 %v9381_v6, %v8223_v7  ;;  %v6917_v24 = vld [vmem:[#allocation8 + $0x308] sm:$0xf]  ;;  %v6662_v26 = vor.u32 %v8994_v23, %v6661_v22 }
 0x137   :  { %v8479_v10 = vld [vmem:[#allocation8 + $0xf60] sm:$0xf0]  ;;  %v6918_v33 = vor.u32 %v9058_v28, %v6917_v24  ;;  %v6629_v36 = vld [vmem:[#allocation8 + $0xc8] sm:$0xf] }
 0x138   :  { %1187 = vst [vmem:[#allocation14 + $0x38] sm:$0xff] %v1179_v35  ;;  %v1740_v44 = vunpack.c.l.b16 %v1179_v35  ;;  %v1741_v45 = vunpack.c.h.b16 %v1179_v35  ;;  %v8482_v15 = vor.u32 %v9445_v56, %v8479_v10  ;;  %v9373_v16 = vld [vmem:[#allocation8 + $0xd04] sm:$0xf]  ;;  %v8986_v37 = vld [vmem:[#allocation8 + $0xe4] sm:$0xf0] }
 0x139   :  { %4493 = vmatpush.bf16.msrb.mxu0 %v7554_v39  ;;  %4507 = vmatpush.bf16.msrb.mxu1 %v7810_v40  ;;  %v8191_v17 = vld [vmem:[#allocation8 + $0xd20] sm:$0xf0]  ;;  %v6885_v38 = vld [vmem:[#allocation8 + $0x2c8] sm:$0xf]  ;;  %5958 = dma.vmem_to_hbm [thread:$0]  %s5951_s11, 1024, %s5953_s29, [#allocation4], %s9809_s17, %s9809_s17, %s9810_s18  }
 0x13a   :  { %v9976_v51 = vpack.c.b16 %v1740_v44, %v1732_v42  ;;  %v9978_v53 = vpack.c.b16 %v1741_v45, %v1733_v43  ;;  %v9437_v20 = vld [vmem:[#allocation8 + $0xf04] sm:$0xf]  ;;  %v8194_v29 = vor.u32 %v9373_v16, %v8191_v17  ;;  %v9050_v39 = vld [vmem:[#allocation8 + $0x2e4] sm:$0xf0]  ;;  %v6630_v42 = vor.u32 %v8986_v37, %v6629_v36 }
 0x13b   :  { %v8447_v21 = vld [vmem:[#allocation8 + $0xf20] sm:$0xf0]  ;;  %v6886_v43 = vor.u32 %v9050_v39, %v6885_v38  ;;  %v6853_v49 = vld [vmem:[#allocation8 + $0x288] sm:$0xf] }
 0x13c   :  { %4410 = vmatmul.bf16.vlgmr.msrb.gmra.mxu2 %v9976_v51  ;;  %4424 = vmatmul.bf16.vlgmr.msrb.gmra.mxu3 %v9978_v53  ;;  %v8450_v31 = vor.u32 %v9437_v20, %v8447_v21  ;;  %v9365_v32 = vld [vmem:[#allocation8 + $0xcc4] sm:$0xf]  ;;  %v9042_v50 = vld [vmem:[#allocation8 + $0x2a4] sm:$0xf0] }
 0x13d   :  { %4514 = vmatpush.bf16.msrb.mxu2 %v8290_v46  ;;  %4528 = vmatpush.bf16.msrb.mxu3 %v8546_v47  ;;  %v8159_v30 = vld [vmem:[#allocation8 + $0xce0] sm:$0xf0]  ;;  %v6597_v46 = vld [vmem:[#allocation8 + $0x88] sm:$0xf]  ;;  %v6854_v55 = vor.u32 %v9042_v50, %v6853_v49 }
 0x13e   :  { %4542 = vmatpush.bf16.msra.mxu0 %v6758_v54  ;;  %4556 = vmatpush.bf16.msra.mxu1 %v7014_v57  ;;  %v9429_v34 = vld [vmem:[#allocation8 + $0xec4] sm:$0xf]  ;;  %v8162_v40 = vor.u32 %v9365_v32, %v8159_v30  ;;  %v8978_v47 = vld [vmem:[#allocation8 + $0xa4] sm:$0xf0] }
 0x13f   :  { %4494 = vmatmul.bf16.vlgmr.msrb.gmra.mxu0 %v9966_v25  ;;  %4508 = vmatmul.bf16.vlgmr.msrb.gmra.mxu1 %v9968_v27  ;;  %v8415_v35 = vld [vmem:[#allocation8 + $0xee0] sm:$0xf0]  ;;  %v6598_v1 = vor.u32 %v8978_v47, %v6597_v46  ;;  %v6821_v6 = vld [vmem:[#allocation8 + $0x248] sm:$0xf] }
 0x140   :  { %v8418_v52 = vor.u32 %v9429_v34, %v8415_v35  ;;  %v9357_v41 = vld [vmem:[#allocation8 + $0xc84] sm:$0xf]  ;;  %v9034_v7 = vld [vmem:[#allocation8 + $0x264] sm:$0xf0] }
 0x141   :  { %4515 = vmatpush.bf16.msrb.mxu2 %v8258_v4  ;;  %4529 = vmatpush.bf16.msrb.mxu3 %v8514_v5  ;;  %v8127_v63 = vld [vmem:[#allocation8 + $0xca0] sm:$0xf0]  ;;  %v6565_v4 = vld [vmem:[#allocation8 + $0x48] sm:$0xf]  ;;  %v6822_v13 = vor.u32 %v9034_v7, %v6821_v6 }
 0x142   :  { %4543 = vmatpush.bf16.msra.mxu0 %v6726_v8  ;;  %4557 = vmatpush.bf16.msra.mxu1 %v6982_v9  ;;  %v9421_v44 = vld [vmem:[#allocation8 + $0xe84] sm:$0xf]  ;;  %v8130_v54 = vor.u32 %v9357_v41, %v8127_v63  ;;  %v8970_v5 = vld [vmem:[#allocation8 + $0x64] sm:$0xf0] }
 0x143   :  { %v8383_v45 = vld [vmem:[#allocation8 + $0xea0] sm:$0xf0]  ;;  %v6566_v48 = vor.u32 %v8970_v5, %v6565_v4  ;;  %v6789_v16 = vld [vmem:[#allocation8 + $0x208] sm:$0xf] }
 0x144   :  { %v8386_v57 = vor.u32 %v9421_v44, %v8383_v45  ;;  %v9349_v62 = vld [vmem:[#allocation8 + $0xc44] sm:$0xf]  ;;  %v9026_v17 = vld [vmem:[#allocation8 + $0x224] sm:$0xf0] }
 0x145   :  { %4516 = vmatpush.bf16.msrb.mxu2 %v8226_v14  ;;  %4530 = vmatpush.bf16.msrb.mxu3 %v8482_v15  ;;  %v8095_v0 = vld [vmem:[#allocation8 + $0xc60] sm:$0xf0]  ;;  %v6533_v14 = vld [vmem:[#allocation8 + $0x8] sm:$0xf]  ;;  %v6790_v30 = vor.u32 %v9026_v17, %v6789_v16 }
 0x146   :  { %4544 = vmatpush.bf16.msra.mxu0 %v6694_v18  ;;  %4558 = vmatpush.bf16.msra.mxu1 %v6950_v19  ;;  %v9413_v2 = vld [vmem:[#allocation8 + $0xe44] sm:$0xf]  ;;  %v8098_v9 = vor.u32 %v9349_v62, %v8095_v0  ;;  %v8962_v15 = vld [vmem:[#allocation8 + $0x24] sm:$0xf0] }
 0x147   :  { %v8351_v3 = vld [vmem:[#allocation8 + $0xe60] sm:$0xf0]  ;;  %v7269_v18 = vld [vmem:[#allocation8 + $0x5c8] sm:$0xf]  ;;  %v6534_v32 = vor.u32 %v8962_v15, %v6533_v14 }
 0x148   :  { %v9341_v8 = vld [vmem:[#allocation8 + $0xc04] sm:$0xf]  ;;  %v8354_v56 = vor.u32 %v9413_v2, %v8351_v3  ;;  %v9146_v19 = vld [vmem:[#allocation8 + $0x5e4] sm:$0xf0] }
 0x149   :  { %4517 = vmatpush.bf16.msrb.mxu2 %v8194_v29  ;;  %4531 = vmatpush.bf16.msrb.mxu3 %v8450_v31  ;;  %v8063_v10 = vld [vmem:[#allocation8 + $0xc20] sm:$0xf0]  ;;  %v7525_v20 = vld [vmem:[#allocation8 + $0x7c8] sm:$0xf] }
 0x14a   :  { %4545 = vmatpush.bf16.msra.mxu0 %v6662_v26  ;;  %4559 = vmatpush.bf16.msra.mxu1 %v6918_v33  ;;  %v9405_v11 = vld [vmem:[#allocation8 + $0xe04] sm:$0xf]  ;;  %v9210_v21 = vld [vmem:[#allocation8 + $0x7e4] sm:$0xf0]  ;;  %v8066_v23 = vor.u32 %v9341_v8, %v8063_v10  ;;  %v7270_v26 = vor.u32 %v9146_v19, %v7269_v18 }
 0x14b   :  { %v8319_v12 = vld [vmem:[#allocation8 + $0xe20] sm:$0xf0]  ;;  %v7781_v22 = vld [vmem:[#allocation8 + $0x9c8] sm:$0xf]  ;;  %v7526_v33 = vor.u32 %v9210_v21, %v7525_v20 }
 0x14c   :  { %4466 = vmatmul.bf16.vlgmr.msra.gmra.mxu2 %v9958_v58  ;;  %4480 = vmatmul.bf16.vlgmr.msra.gmra.mxu3 %v9960_v61  ;;  %v8322_v24 = vor.u32 %v9405_v11, %v8319_v12  ;;  %v9274_v28 = vld [vmem:[#allocation8 + $0x9e4] sm:$0xf0] }
 0x14d   :  { %4518 = vmatpush.bf16.msrb.mxu2 %v8162_v40  ;;  %4532 = vmatpush.bf16.msrb.mxu3 %v8418_v52  ;;  %v8037_v29 = vld [vmem:[#allocation8 + $0xbc8] sm:$0xf]  ;;  %v7782_v36 = vor.u32 %v9274_v28, %v7781_v22 }
 0x14e   :  { %4546 = vmatpush.bf16.msra.mxu0 %v6630_v42  ;;  %4560 = vmatpush.bf16.msra.mxu1 %v6886_v43  ;;  %v9338_v31 = vld [vmem:[#allocation8 + $0xbe4] sm:$0xf0] }
 0x14f   :  { %v7237_v34 = vld [vmem:[#allocation8 + $0x588] sm:$0xf]  ;;  %v8038_v37 = vor.u32 %v9338_v31, %v8037_v29 }
 0x150   :  { %v9138_v35 = vld [vmem:[#allocation8 + $0x5a4] sm:$0xf0] }
 0x151   :  { %4519 = vmatpush.bf16.msrb.mxu2 %v8130_v54  ;;  %4533 = vmatpush.bf16.msrb.mxu3 %v8386_v57  ;;  %v7493_v38 = vld [vmem:[#allocation8 + $0x788] sm:$0xf]  ;;  %v7238_v42 = vor.u32 %v9138_v35, %v7237_v34 }
 0x152   :  { %4547 = vmatpush.bf16.msra.mxu0 %v6598_v1  ;;  %4561 = vmatpush.bf16.msra.mxu1 %v6854_v55  ;;  %v9202_v39 = vld [vmem:[#allocation8 + $0x7a4] sm:$0xf0] }
 0x153   :  { %v7749_v40 = vld [vmem:[#allocation8 + $0x988] sm:$0xf]  ;;  %v7494_v43 = vor.u32 %v9202_v39, %v7493_v38 }
 0x154   :  { %v9266_v52 = vld [vmem:[#allocation8 + $0x9a4] sm:$0xf0] }
 0x155   :  { %4520 = vmatpush.bf16.msrb.mxu2 %v8098_v9  ;;  %4534 = vmatpush.bf16.msrb.mxu3 %v8354_v56  ;;  %v8005_v41 = vld [vmem:[#allocation8 + $0xb88] sm:$0xf]  ;;  %v7750_v46 = vor.u32 %v9266_v52, %v7749_v40 }
 0x156   :  { %4548 = vmatpush.bf16.msra.mxu0 %v6566_v48  ;;  %4562 = vmatpush.bf16.msra.mxu1 %v6822_v13  ;;  %v9330_v63 = vld [vmem:[#allocation8 + $0xba4] sm:$0xf0] }
 0x157   :  { %v7205_v44 = vld [vmem:[#allocation8 + $0x548] sm:$0xf]  ;;  %v8006_v47 = vor.u32 %v9330_v63, %v8005_v41 }
 0x158   :  { %v9130_v45 = vld [vmem:[#allocation8 + $0x564] sm:$0xf0] }
 0x159   :  { %4521 = vmatpush.bf16.msrb.mxu2 %v8066_v23  ;;  %4535 = vmatpush.bf16.msrb.mxu3 %v8322_v24  ;;  %v7461_v49 = vld [vmem:[#allocation8 + $0x748] sm:$0xf]  ;;  %v7206_v1 = vor.u32 %v9130_v45, %v7205_v44 }
 0x15a   :  { %4549 = vmatpush.bf16.msra.mxu0 %v6534_v32  ;;  %4563 = vmatpush.bf16.msra.mxu1 %v6790_v30  ;;  %v9194_v50 = vld [vmem:[#allocation8 + $0x764] sm:$0xf0] }
 0x15b   :  { %v7717_v54 = vld [vmem:[#allocation8 + $0x948] sm:$0xf]  ;;  %v7462_v55 = vor.u32 %v9194_v50, %v7461_v49 }
 0x15c   :  { %v9258_v57 = vld [vmem:[#allocation8 + $0x964] sm:$0xf0]  ;;  %4522 = vmatmul.bf16.vlgmr.msrb.gmra.mxu2 %v9976_v51  ;;  %4536 = vmatmul.bf16.vlgmr.msrb.gmra.mxu3 %v9978_v53 }
 0x15d   :  { %4570 = vmatpush.bf16.msra.mxu2 %v7270_v26  ;;  %4584 = vmatpush.bf16.msra.mxu3 %v7526_v33  ;;  %v7973_v62 = vld [vmem:[#allocation8 + $0xb48] sm:$0xf]  ;;  %v7718_v4 = vor.u32 %v9258_v57, %v7717_v54 }
 0x15e   :  { %4598 = vmatpush.bf16.msrb.mxu0 %v7782_v36  ;;  %4612 = vmatpush.bf16.msrb.mxu1 %v8038_v37  ;;  %v9322_v0 = vld [vmem:[#allocation8 + $0xb64] sm:$0xf0] }
 0x15f   :  { %4550 = vmatmul.bf16.vlgmr.msra.gmra.mxu0 %v9938_v59  ;;  %4564 = vmatmul.bf16.vlgmr.msra.gmra.mxu1 %v9940_v60  ;;  %v7173_v2 = vld [vmem:[#allocation8 + $0x508] sm:$0xf]  ;;  %v7974_v5 = vor.u32 %v9322_v0, %v7973_v62 }
 0x160   :  { %v9122_v3 = vld [vmem:[#allocation8 + $0x524] sm:$0xf0] }
 0x161   :  { %4571 = vmatpush.bf16.msra.mxu2 %v7238_v42  ;;  %4585 = vmatpush.bf16.msra.mxu3 %v7494_v43  ;;  %v7429_v6 = vld [vmem:[#allocation8 + $0x708] sm:$0xf]  ;;  %v7174_v11 = vor.u32 %v9122_v3, %v7173_v2 }
 0x162   :  { %4599 = vmatpush.bf16.msrb.mxu0 %v7750_v46  ;;  %4613 = vmatpush.bf16.msrb.mxu1 %v8006_v47  ;;  %v9186_v7 = vld [vmem:[#allocation8 + $0x724] sm:$0xf0] }
 0x163   :  { %v7685_v8 = vld [vmem:[#allocation8 + $0x908] sm:$0xf]  ;;  %v7430_v12 = vor.u32 %v9186_v7, %v7429_v6 }
 0x164   :  { %v9250_v9 = vld [vmem:[#allocation8 + $0x924] sm:$0xf0] }
 0x165   :  { %v7941_v56 = vld [vmem:[#allocation8 + $0xb08] sm:$0xf]  ;;  %4572 = vmatpush.bf16.msra.mxu2 %v7206_v1  ;;  %4586 = vmatpush.bf16.msra.mxu3 %v7462_v55  ;;  %v7686_v14 = vor.u32 %v9250_v9, %v7685_v8  ;;  %v9014_v8 = vld [vmem:[#allocation8 + $0x1cc] sm:$0xf] }
 0x166   :  { %v9314_v10 = vld [vmem:[#allocation8 + $0xb24] sm:$0xf0]  ;;  %4600 = vmatpush.bf16.msrb.mxu0 %v7718_v4  ;;  %4614 = vmatpush.bf16.msrb.mxu1 %v7974_v5 }
 0x167   :  { %v7141_v48 = vld [vmem:[#allocation8 + $0x4c8] sm:$0xf]  ;;  %v7942_v15 = vor.u32 %v9314_v10, %v7941_v56  ;;  %v6759_v10 = vld [vmem:[#allocation8 + $0x1e8] sm:$0xf0] }
 0x168   :  { %v9114_v13 = vld [vmem:[#allocation8 + $0x4e4] sm:$0xf0] }
 0x169   :  { %v7397_v16 = vld [vmem:[#allocation8 + $0x6c8] sm:$0xf]  ;;  %4573 = vmatpush.bf16.msra.mxu2 %v7174_v11  ;;  %4587 = vmatpush.bf16.msra.mxu3 %v7430_v12  ;;  %v7142_v22 = vor.u32 %v9114_v13, %v7141_v48  ;;  %v9078_v11 = vld [vmem:[#allocation8 + $0x3cc] sm:$0xf] }
 0x16a   :  { %v9178_v17 = vld [vmem:[#allocation8 + $0x6e4] sm:$0xf0]  ;;  %4601 = vmatpush.bf16.msrb.mxu0 %v7686_v14  ;;  %4615 = vmatpush.bf16.msrb.mxu1 %v7942_v15  ;;  %v7015_v12 = vld [vmem:[#allocation8 + $0x3e8] sm:$0xf0] }
 0x16b   :  { %v7653_v18 = vld [vmem:[#allocation8 + $0x8c8] sm:$0xf]  ;;  %v7398_v23 = vor.u32 %v9178_v17, %v7397_v16 }
 0x16c   :  { %v9242_v19 = vld [vmem:[#allocation8 + $0x8e4] sm:$0xf0] }
 0x16d   :  { %v7909_v20 = vld [vmem:[#allocation8 + $0xac8] sm:$0xf]  ;;  %v7654_v29 = vor.u32 %v9242_v19, %v7653_v18  ;;  %4574 = vmatpush.bf16.msra.mxu2 %v7142_v22  ;;  %4588 = vmatpush.bf16.msra.mxu3 %v7398_v23  ;;  %v6762_v18 = vor.u32 %v9014_v8, %v6759_v10  ;;  %v7018_v19 = vor.u32 %v9078_v11, %v7015_v12  ;;  %v9006_v22 = vld [vmem:[#allocation8 + $0x18c] sm:$0xf] }
 0x16e   :  { %v9306_v21 = vld [vmem:[#allocation8 + $0xae4] sm:$0xf0]  ;;  %v6727_v23 = vld [vmem:[#allocation8 + $0x1a8] sm:$0xf0] }
 0x16f   :  { %v7109_v24 = vld [vmem:[#allocation8 + $0x488] sm:$0xf]  ;;  %v7910_v31 = vor.u32 %v9306_v21, %v7909_v20  ;;  %4602 = vmatpush.bf16.msrb.mxu0 %v7654_v29 }
 0x170   :  { %v9106_v28 = vld [vmem:[#allocation8 + $0x4a4] sm:$0xf0] }
 0x171   :  { %v7365_v32 = vld [vmem:[#allocation8 + $0x688] sm:$0xf]  ;;  %v7110_v36 = vor.u32 %v9106_v28, %v7109_v24  ;;  %4616 = vmatpush.bf16.msrb.mxu1 %v7910_v31  ;;  %v9070_v24 = vld [vmem:[#allocation8 + $0x38c] sm:$0xf] }
 0x172   :  { %v9170_v30 = vld [vmem:[#allocation8 + $0x6a4] sm:$0xf0]  ;;  %v6983_v28 = vld [vmem:[#allocation8 + $0x3a8] sm:$0xf0] }
 0x173   :  { %v7621_v26 = vld [vmem:[#allocation8 + $0x888] sm:$0xf]  ;;  %v7366_v37 = vor.u32 %v9170_v30, %v7365_v32  ;;  %4575 = vmatpush.bf16.msra.mxu2 %v7110_v36  ;;  %v8998_v36 = vld [vmem:[#allocation8 + $0x14c] sm:$0xf] }
 0x174   :  { %v9234_v33 = vld [vmem:[#allocation8 + $0x8a4] sm:$0xf0] }
 0x175   :  { %v7877_v34 = vld [vmem:[#allocation8 + $0xa88] sm:$0xf]  ;;  %v7622_v40 = vor.u32 %v9234_v33, %v7621_v26  ;;  %4589 = vmatpush.bf16.msra.mxu3 %v7366_v37  ;;  %v6730_v26 = vor.u32 %v9006_v22, %v6727_v23  ;;  %v6986_v33 = vor.u32 %v9070_v24, %v6983_v28  ;;  %v6695_v37 = vld [vmem:[#allocation8 + $0x168] sm:$0xf0] }
 0x176   :  { %v9298_v35 = vld [vmem:[#allocation8 + $0xaa4] sm:$0xf0] }
 0x177   :  { %v7077_v38 = vld [vmem:[#allocation8 + $0x448] sm:$0xf]  ;;  %v7878_v52 = vor.u32 %v9298_v35, %v7877_v34  ;;  %4603 = vmatpush.bf16.msrb.mxu0 %v7622_v40 }
 0x178   :  { %v9098_v39 = vld [vmem:[#allocation8 + $0x464] sm:$0xf0] }
 0x179   :  { %v7333_v41 = vld [vmem:[#allocation8 + $0x648] sm:$0xf]  ;;  %v7078_v47 = vor.u32 %v9098_v39, %v7077_v38  ;;  %4617 = vmatpush.bf16.msrb.mxu1 %v7878_v52  ;;  %v9062_v38 = vld [vmem:[#allocation8 + $0x34c] sm:$0xf] }
 0x17a   :  { %v9162_v63 = vld [vmem:[#allocation8 + $0x664] sm:$0xf0]  ;;  %v6951_v39 = vld [vmem:[#allocation8 + $0x368] sm:$0xf0] }
 0x17b   :  { %v7589_v42 = vld [vmem:[#allocation8 + $0x848] sm:$0xf]  ;;  %v7334_v49 = vor.u32 %v9162_v63, %v7333_v41  ;;  %4576 = vmatpush.bf16.msra.mxu2 %v7078_v47  ;;  %v6663_v47 = vld [vmem:[#allocation8 + $0x128] sm:$0xf0] }
 0x17c   :  { %v9226_v43 = vld [vmem:[#allocation8 + $0x864] sm:$0xf0] }
 0x17d   :  { %v7845_v44 = vld [vmem:[#allocation8 + $0xa48] sm:$0xf]  ;;  %v7590_v62 = vor.u32 %v9226_v43, %v7589_v42  ;;  %4590 = vmatpush.bf16.msra.mxu3 %v7334_v49  ;;  %v6698_v42 = vor.u32 %v8998_v36, %v6695_v37  ;;  %v6954_v43 = vor.u32 %v9062_v38, %v6951_v39  ;;  %v9054_v49 = vld [vmem:[#allocation8 + $0x30c] sm:$0xf] }
 0x17e   :  { %v9290_v45 = vld [vmem:[#allocation8 + $0xa64] sm:$0xf0] }
 0x17f   :  { %v7045_v46 = vld [vmem:[#allocation8 + $0x408] sm:$0xf]  ;;  %v7846_v0 = vor.u32 %v9290_v45, %v7845_v44  ;;  %4604 = vmatpush.bf16.msrb.mxu0 %v7590_v62 }
 0x180   :  { %v9090_v50 = vld [vmem:[#allocation8 + $0x424] sm:$0xf0] }
 0x181   :  { %v7301_v54 = vld [vmem:[#allocation8 + $0x608] sm:$0xf]  ;;  %v7046_v9 = vor.u32 %v9090_v50, %v7045_v46  ;;  %4618 = vmatpush.bf16.msrb.mxu1 %v7846_v0  ;;  %v8990_v46 = vld [vmem:[#allocation8 + $0x10c] sm:$0xf] }
 0x182   :  { %v9154_v57 = vld [vmem:[#allocation8 + $0x624] sm:$0xf0]  ;;  %v6919_v50 = vld [vmem:[#allocation8 + $0x328] sm:$0xf0] }
 0x183   :  { %v7557_v1 = vld [vmem:[#allocation8 + $0x808] sm:$0xf]  ;;  %v7302_v56 = vor.u32 %v9154_v57, %v7301_v54  ;;  %4577 = vmatpush.bf16.msra.mxu2 %v7046_v9 }
 0x184   :  { %v9218_v55 = vld [vmem:[#allocation8 + $0x824] sm:$0xf0] }
 0x185   :  { %v7813_v2 = vld [vmem:[#allocation8 + $0xa08] sm:$0xf]  ;;  %v7558_v48 = vor.u32 %v9218_v55, %v7557_v1  ;;  %4591 = vmatpush.bf16.msra.mxu3 %v7302_v56  ;;  %v6666_v1 = vor.u32 %v8990_v46, %v6663_v47  ;;  %v6922_v55 = vor.u32 %v9054_v49, %v6919_v50  ;;  %v9270_v46 = vld [vmem:[#allocation8 + $0x9cc] sm:$0xf] }
 0x186   :  { %v9282_v3 = vld [vmem:[#allocation8 + $0xa24] sm:$0xf0]  ;;  %4578 = vmatmul.bf16.vlgmr.msra.gmra.mxu2 %v9958_v58  ;;  %v7783_v50 = vld [vmem:[#allocation8 + $0x9e8] sm:$0xf0] }
 0x187   :  { %v8293_v4 = vld [vmem:[#allocation8 + $0xdc8] sm:$0xf]  ;;  %v7814_v13 = vor.u32 %v9282_v3, %v7813_v2  ;;  %4605 = vmatpush.bf16.msrb.mxu0 %v7558_v48 }
 0x188   :  { %v9402_v5 = vld [vmem:[#allocation8 + $0xde4] sm:$0xf0]  ;;  %4592 = vmatmul.bf16.vlgmr.msra.gmra.mxu3 %v9960_v61 }
 0x189   :  { %v8549_v6 = vld [vmem:[#allocation8 + $0xfc8] sm:$0xf]  ;;  %v8294_v14 = vor.u32 %v9402_v5, %v8293_v4  ;;  %4619 = vmatpush.bf16.msrb.mxu1 %v7814_v13  ;;  %v8982_v4 = vld [vmem:[#allocation8 + $0xcc] sm:$0xf] }
 0x18a   :  { %v9466_v7 = vld [vmem:[#allocation8 + $0xfe4] sm:$0xf0]  ;;  %4606 = vmatmul.bf16.vlgmr.msrb.gmra.mxu0 %v9966_v25  ;;  %v6631_v5 = vld [vmem:[#allocation8 + $0xe8] sm:$0xf0] }
 0x18b   :  { %v8550_v15 = vor.u32 %v9466_v7, %v8549_v6  ;;  %v8261_v16 = vld [vmem:[#allocation8 + $0xd88] sm:$0xf]  ;;  %4626 = vmatpush.bf16.msrb.mxu2 %v8294_v14  ;;  %4654 = vmatpush.bf16.msra.mxu0 %v6762_v18  ;;  %v9046_v6 = vld [vmem:[#allocation8 + $0x2cc] sm:$0xf]  ;;  %v6634_v11 = vor.u32 %v8982_v4, %v6631_v5  ;;  %v7786_v4 = vor.u32 %v9270_v46, %v7783_v50 }
 0x18c   :  { %v9394_v17 = vld [vmem:[#allocation8 + $0xda4] sm:$0xf0]  ;;  %4620 = vmatmul.bf16.vlgmr.msrb.gmra.mxu1 %v9968_v27  ;;  %v6887_v7 = vld [vmem:[#allocation8 + $0x2e8] sm:$0xf0] }
 0x18d   :  { %v8517_v20 = vld [vmem:[#allocation8 + $0xf88] sm:$0xf]  ;;  %4640 = vmatpush.bf16.msrb.mxu3 %v8550_v15  ;;  %v8262_v29 = vor.u32 %v9394_v17, %v8261_v16  ;;  %4668 = vmatpush.bf16.msra.mxu1 %v7018_v19  ;;  %v6890_v12 = vor.u32 %v9046_v6, %v6887_v7  ;;  %v8974_v14 = vld [vmem:[#allocation8 + $0x8c] sm:$0xf] }
 0x18e   :  { %v9458_v21 = vld [vmem:[#allocation8 + $0xfa4] sm:$0xf0]  ;;  %v6599_v15 = vld [vmem:[#allocation8 + $0xa8] sm:$0xf0] }
 0x18f   :  { %v8518_v31 = vor.u32 %v9458_v21, %v8517_v20  ;;  %v8229_v32 = vld [vmem:[#allocation8 + $0xd48] sm:$0xf]  ;;  %4627 = vmatpush.bf16.msrb.mxu2 %v8262_v29  ;;  %4655 = vmatpush.bf16.msra.mxu0 %v6730_v26  ;;  %v9038_v16 = vld [vmem:[#allocation8 + $0x28c] sm:$0xf]  ;;  %v6602_v22 = vor.u32 %v8974_v14, %v6599_v15 }
 0x190   :  { %v9386_v30 = vld [vmem:[#allocation8 + $0xd64] sm:$0xf0]  ;;  %v6855_v17 = vld [vmem:[#allocation8 + $0x2a8] sm:$0xf0] }
 0x191   :  { %v8485_v34 = vld [vmem:[#allocation8 + $0xf48] sm:$0xf]  ;;  %4641 = vmatpush.bf16.msrb.mxu3 %v8518_v31  ;;  %v8230_v40 = vor.u32 %v9386_v30, %v8229_v32  ;;  %4669 = vmatpush.bf16.msra.mxu1 %v6986_v33  ;;  %v6858_v23 = vor.u32 %v9038_v16, %v6855_v17  ;;  %v8966_v29 = vld [vmem:[#allocation8 + $0x4c] sm:$0xf] }
 0x192   :  { %v9450_v35 = vld [vmem:[#allocation8 + $0xf64] sm:$0xf0]  ;;  %v6567_v31 = vld [vmem:[#allocation8 + $0x68] sm:$0xf0] }
 0x193   :  { %v8486_v52 = vor.u32 %v9450_v35, %v8485_v34  ;;  %v8197_v41 = vld [vmem:[#allocation8 + $0xd08] sm:$0xf]  ;;  %4628 = vmatpush.bf16.msrb.mxu2 %v8230_v40  ;;  %4656 = vmatpush.bf16.msra.mxu0 %v6698_v42  ;;  %v9030_v32 = vld [vmem:[#allocation8 + $0x24c] sm:$0xf]  ;;  %v6570_v38 = vor.u32 %v8966_v29, %v6567_v31 }
 0x194   :  { %v9378_v63 = vld [vmem:[#allocation8 + $0xd24] sm:$0xf0]  ;;  %v6823_v30 = vld [vmem:[#allocation8 + $0x268] sm:$0xf0] }
 0x195   :  { %v8453_v44 = vld [vmem:[#allocation8 + $0xf08] sm:$0xf]  ;;  %4642 = vmatpush.bf16.msrb.mxu3 %v8486_v52  ;;  %v8198_v54 = vor.u32 %v9378_v63, %v8197_v41  ;;  %4670 = vmatpush.bf16.msra.mxu1 %v6954_v43  ;;  %v6826_v39 = vor.u32 %v9030_v32, %v6823_v30  ;;  %v8958_v40 = vld [vmem:[#allocation8 + $0xc] sm:$0xf] }
 0x196   :  { %v9442_v45 = vld [vmem:[#allocation8 + $0xf24] sm:$0xf0]  ;;  %v6535_v52 = vld [vmem:[#allocation8 + $0x28] sm:$0xf0] }
 0x197   :  { %v8454_v57 = vor.u32 %v9442_v45, %v8453_v44  ;;  %v8165_v62 = vld [vmem:[#allocation8 + $0xcc8] sm:$0xf]  ;;  %4629 = vmatpush.bf16.msrb.mxu2 %v8198_v54  ;;  %4657 = vmatpush.bf16.msra.mxu0 %v6666_v1  ;;  %v9022_v41 = vld [vmem:[#allocation8 + $0x20c] sm:$0xf] }
 0x198   :  { %v9370_v0 = vld [vmem:[#allocation8 + $0xce4] sm:$0xf0]  ;;  %v6791_v63 = vld [vmem:[#allocation8 + $0x228] sm:$0xf0] }
 0x199   :  { %v8421_v2 = vld [vmem:[#allocation8 + $0xec8] sm:$0xf]  ;;  %4643 = vmatpush.bf16.msrb.mxu3 %v8454_v57  ;;  %v8166_v8 = vor.u32 %v9370_v0, %v8165_v62  ;;  %4671 = vmatpush.bf16.msra.mxu1 %v6922_v55  ;;  %v9142_v42 = vld [vmem:[#allocation8 + $0x5cc] sm:$0xf]  ;;  %v6538_v62 = vor.u32 %v8958_v40, %v6535_v52  ;;  %v6794_v0 = vor.u32 %v9022_v41, %v6791_v63 }
 0x19a   :  { %v9434_v3 = vld [vmem:[#allocation8 + $0xee4] sm:$0xf0]  ;;  %v7271_v43 = vld [vmem:[#allocation8 + $0x5e8] sm:$0xf0] }
 0x19b   :  { %v8422_v9 = vor.u32 %v9434_v3, %v8421_v2  ;;  %v8133_v56 = vld [vmem:[#allocation8 + $0xc88] sm:$0xf]  ;;  %4630 = vmatpush.bf16.msrb.mxu2 %v8166_v8  ;;  %4658 = vmatpush.bf16.msra.mxu0 %v6634_v11  ;;  %v9206_v44 = vld [vmem:[#allocation8 + $0x7cc] sm:$0xf]  ;;  %v7274_v1 = vor.u32 %v9142_v42, %v7271_v43 }
 0x19c   :  { %v9362_v10 = vld [vmem:[#allocation8 + $0xca4] sm:$0xf0]  ;;  %v7527_v45 = vld [vmem:[#allocation8 + $0x7e8] sm:$0xf0] }
 0x19d   :  { %v8389_v48 = vld [vmem:[#allocation8 + $0xe88] sm:$0xf]  ;;  %4644 = vmatpush.bf16.msrb.mxu3 %v8422_v9  ;;  %v8134_v18 = vor.u32 %v9362_v10, %v8133_v56  ;;  %4672 = vmatpush.bf16.msra.mxu1 %v6890_v12  ;;  %v9334_v54 = vld [vmem:[#allocation8 + $0xbcc] sm:$0xf]  ;;  %v7530_v55 = vor.u32 %v9206_v44, %v7527_v45 }
 0x19e   :  { %v9426_v13 = vld [vmem:[#allocation8 + $0xea4] sm:$0xf0]  ;;  %v8039_v57 = vld [vmem:[#allocation8 + $0xbe8] sm:$0xf0] }
 0x19f   :  { %v8390_v19 = vor.u32 %v9426_v13, %v8389_v48  ;;  %v8101_v20 = vld [vmem:[#allocation8 + $0xc48] sm:$0xf]  ;;  %4631 = vmatpush.bf16.msrb.mxu2 %v8134_v18  ;;  %4659 = vmatpush.bf16.msra.mxu0 %v6602_v22  ;;  %v9134_v2 = vld [vmem:[#allocation8 + $0x58c] sm:$0xf]  ;;  %v8042_v5 = vor.u32 %v9334_v54, %v8039_v57 }
 0x1a0   :  { %v9354_v21 = vld [vmem:[#allocation8 + $0xc64] sm:$0xf0]  ;;  %v7239_v3 = vld [vmem:[#allocation8 + $0x5a8] sm:$0xf0] }
 0x1a1   :  { %v8357_v24 = vld [vmem:[#allocation8 + $0xe48] sm:$0xf]  ;;  %4645 = vmatpush.bf16.msrb.mxu3 %v8390_v19  ;;  %v8102_v33 = vor.u32 %v9354_v21, %v8101_v20  ;;  %4673 = vmatpush.bf16.msra.mxu1 %v6858_v23  ;;  %v9198_v6 = vld [vmem:[#allocation8 + $0x78c] sm:$0xf]  ;;  %v7242_v11 = vor.u32 %v9134_v2, %v7239_v3 }
 0x1a2   :  { %v9418_v28 = vld [vmem:[#allocation8 + $0xe64] sm:$0xf0]  ;;  %v7495_v7 = vld [vmem:[#allocation8 + $0x7a8] sm:$0xf0] }
 0x1a3   :  { %v8069_v26 = vld [vmem:[#allocation8 + $0xc08] sm:$0xf]  ;;  %v8358_v34 = vor.u32 %v9418_v28, %v8357_v24  ;;  %4632 = vmatpush.bf16.msrb.mxu2 %v8102_v33  ;;  %4660 = vmatpush.bf16.msra.mxu0 %v6570_v38  ;;  %v9262_v8 = vld [vmem:[#allocation8 + $0x98c] sm:$0xf]  ;;  %v7498_v12 = vor.u32 %v9198_v6, %v7495_v7 }
 0x1a4   :  { %v9346_v35 = vld [vmem:[#allocation8 + $0xc24] sm:$0xf0]  ;;  %v7751_v9 = vld [vmem:[#allocation8 + $0x9a8] sm:$0xf0] }
 0x1a5   :  { %v8325_v36 = vld [vmem:[#allocation8 + $0xe08] sm:$0xf]  ;;  %4646 = vmatpush.bf16.msrb.mxu3 %v8358_v34  ;;  %v8070_v47 = vor.u32 %v9346_v35, %v8069_v26  ;;  %4674 = vmatpush.bf16.msra.mxu1 %v6826_v39  ;;  %v9326_v56 = vld [vmem:[#allocation8 + $0xb8c] sm:$0xf]  ;;  %v7754_v14 = vor.u32 %v9262_v8, %v7751_v9 }
 0x1a6   :  { %v9410_v37 = vld [vmem:[#allocation8 + $0xe24] sm:$0xf0]  ;;  %v8007_v10 = vld [vmem:[#allocation8 + $0xba8] sm:$0xf0] }
 0x1a7   :  { %v8326_v49 = vor.u32 %v9410_v37, %v8325_v36  ;;  %4633 = vmatpush.bf16.msrb.mxu2 %v8070_v47  ;;  %4661 = vmatpush.bf16.msra.mxu0 %v6538_v62  ;;  %v9126_v48 = vld [vmem:[#allocation8 + $0x54c] sm:$0xf]  ;;  %v8010_v15 = vor.u32 %v9326_v56, %v8007_v10  ;;  %v9998_v36 = vpop.f32.mrf.mxu0  ;;  %v10000_v47 = vpop.f32.mrf.mxu1 }
 0x1a8   :  { %v7207_v13 = vld [vmem:[#allocation8 + $0x568] sm:$0xf0] }
 0x1a9   :  { %4647 = vmatpush.bf16.msrb.mxu3 %v8326_v49  ;;  %4675 = vmatpush.bf16.msra.mxu1 %v6794_v0  ;;  %v9190_v16 = vld [vmem:[#allocation8 + $0x74c] sm:$0xf]  ;;  %v7210_v22 = vor.u32 %v9126_v48, %v7207_v13 }
 0x1aa   :  { %v7463_v17 = vld [vmem:[#allocation8 + $0x768] sm:$0xf0]  ;;  %4634 = vmatmul.bf16.vlgmr.msrb.gmra.mxu2 %v9976_v51  ;;  %4662 = vmatmul.bf16.vlgmr.msra.gmra.mxu0 %v9938_v59 }
 0x1ab   :  { %4682 = vmatpush.bf16.msra.mxu2 %v7274_v1  ;;  %4710 = vmatpush.bf16.msrb.mxu0 %v7786_v4  ;;  %v9254_v18 = vld [vmem:[#allocation8 + $0x94c] sm:$0xf]  ;;  %v7466_v23 = vor.u32 %v9190_v16, %v7463_v17 }
 0x1ac   :  { %4648 = vmatmul.bf16.vlgmr.msrb.gmra.mxu3 %v9978_v53  ;;  %v7719_v19 = vld [vmem:[#allocation8 + $0x968] sm:$0xf0]  ;;  %4676 = vmatmul.bf16.vlgmr.msra.gmra.mxu1 %v9940_v60 }
 0x1ad   :  { %4696 = vmatpush.bf16.msra.mxu3 %v7530_v55  ;;  %4724 = vmatpush.bf16.msrb.mxu1 %v8042_v5  ;;  %v9318_v20 = vld [vmem:[#allocation8 + $0xb4c] sm:$0xf]  ;;  %v7722_v29 = vor.u32 %v9254_v18, %v7719_v19 }
 0x1ae   :  { %v7975_v21 = vld [vmem:[#allocation8 + $0xb68] sm:$0xf0] }
 0x1af   :  { %4683 = vmatpush.bf16.msra.mxu2 %v7242_v11  ;;  %v9118_v24 = vld [vmem:[#allocation8 + $0x50c] sm:$0xf]  ;;  %4711 = vmatpush.bf16.msrb.mxu0 %v7754_v14  ;;  %v7978_v31 = vor.u32 %v9318_v20, %v7975_v21  ;;  %v10002_v56 = vpop.f32.mrf.mxu0 }
 0x1b0   :  { %v7175_v28 = vld [vmem:[#allocation8 + $0x528] sm:$0xf0] }
 0x1b1   :  { %4697 = vmatpush.bf16.msra.mxu3 %v7498_v12  ;;  %4725 = vmatpush.bf16.msrb.mxu1 %v8010_v15  ;;  %v9182_v32 = vld [vmem:[#allocation8 + $0x70c] sm:$0xf]  ;;  %v7178_v37 = vor.u32 %v9118_v24, %v7175_v28 }
 0x1b2   :  { %v7431_v30 = vld [vmem:[#allocation8 + $0x728] sm:$0xf0] }
 0x1b3   :  { %v9246_v26 = vld [vmem:[#allocation8 + $0x90c] sm:$0xf]  ;;  %4684 = vmatpush.bf16.msra.mxu2 %v7210_v22  ;;  %v7434_v38 = vor.u32 %v9182_v32, %v7431_v30  ;;  %4712 = vmatpush.bf16.msrb.mxu0 %v7722_v29  ;;  %v10006_v30 = vpop.f32.mrf.mxu2 }
 0x1b4   :  { %v7687_v33 = vld [vmem:[#allocation8 + $0x928] sm:$0xf0] }
 0x1b5   :  { %v9310_v34 = vld [vmem:[#allocation8 + $0xb0c] sm:$0xf]  ;;  %4698 = vmatpush.bf16.msra.mxu3 %v7466_v23  ;;  %4726 = vmatpush.bf16.msrb.mxu1 %v7978_v31  ;;  %v7690_v52 = vor.u32 %v9246_v26, %v7687_v33  ;;  %v10004_v23 = vpop.f32.mrf.mxu1  ;;  %v10008_v26 = vpop.f32.mrf.mxu3 }
 0x1b6   :  { %v7943_v35 = vld [vmem:[#allocation8 + $0xb28] sm:$0xf0] }
 0x1b7   :  { %v9110_v39 = vld [vmem:[#allocation8 + $0x4cc] sm:$0xf]  ;;  %v7946_v41 = vor.u32 %v9310_v34, %v7943_v35  ;;  %4685 = vmatpush.bf16.msra.mxu2 %v7178_v37  ;;  %4713 = vmatpush.bf16.msrb.mxu0 %v7690_v52 }
 0x1b8   :  { %v7143_v40 = vld [vmem:[#allocation8 + $0x4e8] sm:$0xf0] }
 0x1b9   :  { %v9174_v63 = vld [vmem:[#allocation8 + $0x6cc] sm:$0xf]  ;;  %4699 = vmatpush.bf16.msra.mxu3 %v7434_v38  ;;  %v7146_v49 = vor.u32 %v9110_v39, %v7143_v40  ;;  %4727 = vmatpush.bf16.msrb.mxu1 %v7946_v41  ;;  %v6765_v39 = vld [vmem:[#allocation8 + $0x1d0] sm:$0xf] }
 0x1ba   :  { %v7399_v42 = vld [vmem:[#allocation8 + $0x6e8] sm:$0xf0]  ;;  %v9019_v41 = vld [vmem:[#allocation8 + $0x1ec] sm:$0xf0] }
 0x1bb   :  { %v9238_v43 = vld [vmem:[#allocation8 + $0x8cc] sm:$0xf]  ;;  %v7402_v50 = vor.u32 %v9174_v63, %v7399_v42  ;;  %4686 = vmatpush.bf16.msra.mxu2 %v7146_v49  ;;  %v7021_v63 = vld [vmem:[#allocation8 + $0x3d0] sm:$0xf] }
 0x1bc   :  { %v7655_v44 = vld [vmem:[#allocation8 + $0x8e8] sm:$0xf0]  ;;  %v9083_v42 = vld [vmem:[#allocation8 + $0x3ec] sm:$0xf0] }
 0x1bd   :  { %v9302_v45 = vld [vmem:[#allocation8 + $0xacc] sm:$0xf]  ;;  %v7658_v62 = vor.u32 %v9238_v43, %v7655_v44  ;;  %4700 = vmatpush.bf16.msra.mxu3 %v7402_v50  ;;  %v10010_v43 = vpop.f32.mrf.mxu0 }
 0x1be   :  { %v7911_v46 = vld [vmem:[#allocation8 + $0xae8] sm:$0xf0] }
 0x1bf   :  { %v9102_v54 = vld [vmem:[#allocation8 + $0x48c] sm:$0xf]  ;;  %v7914_v0 = vor.u32 %v9302_v45, %v7911_v46  ;;  %4714 = vmatpush.bf16.msrb.mxu0 %v7658_v62  ;;  %v7022_v62 = vor.u32 %v9083_v42, %v7021_v63 }
 0x1c0   :  { %v7111_v57 = vld [vmem:[#allocation8 + $0x4a8] sm:$0xf0] }
 0x1c1   :  { %v9166_v1 = vld [vmem:[#allocation8 + $0x68c] sm:$0xf]  ;;  %v7114_v6 = vor.u32 %v9102_v54, %v7111_v57  ;;  %4728 = vmatpush.bf16.msrb.mxu1 %v7914_v0  ;;  %v6766_v57 = vor.u32 %v9019_v41, %v6765_v39 }
 0x1c2   :  { %v7367_v55 = vld [vmem:[#allocation8 + $0x6a8] sm:$0xf0] }
 0x1c3   :  { %v9230_v2 = vld [vmem:[#allocation8 + $0x88c] sm:$0xf]  ;;  %v7370_v7 = vor.u32 %v9166_v1, %v7367_v55  ;;  %4687 = vmatpush.bf16.msra.mxu2 %v7114_v6  ;;  %v6733_v55 = vld [vmem:[#allocation8 + $0x190] sm:$0xf] }
 0x1c4   :  { %v7623_v3 = vld [vmem:[#allocation8 + $0x8a8] sm:$0xf0] }
 0x1c5   :  { %v9294_v4 = vld [vmem:[#allocation8 + $0xa8c] sm:$0xf]  ;;  %v7626_v10 = vor.u32 %v9230_v2, %v7623_v3  ;;  %4701 = vmatpush.bf16.msra.mxu3 %v7370_v7  ;;  %v9011_v2 = vld [vmem:[#allocation8 + $0x1ac] sm:$0xf0] }
 0x1c6   :  { %v7879_v5 = vld [vmem:[#allocation8 + $0xaa8] sm:$0xf0]  ;;  %v6989_v3 = vld [vmem:[#allocation8 + $0x390] sm:$0xf] }
 0x1c7   :  { %v9094_v8 = vld [vmem:[#allocation8 + $0x44c] sm:$0xf]  ;;  %v7882_v11 = vor.u32 %v9294_v4, %v7879_v5  ;;  %4715 = vmatpush.bf16.msrb.mxu0 %v7626_v10  ;;  %v9075_v4 = vld [vmem:[#allocation8 + $0x3ac] sm:$0xf0]  ;;  %v10012_v5 = vpop.f32.mrf.mxu1  ;;  %v6734_v10 = vor.u32 %v9011_v2, %v6733_v55 }
 0x1c8   :  { %v7079_v9 = vld [vmem:[#allocation8 + $0x468] sm:$0xf0] }
 0x1c9   :  { %v9158_v12 = vld [vmem:[#allocation8 + $0x64c] sm:$0xf]  ;;  %v7082_v18 = vor.u32 %v9094_v8, %v7079_v9  ;;  %4729 = vmatpush.bf16.msrb.mxu1 %v7882_v11  ;;  %v6990_v11 = vor.u32 %v9075_v4, %v6989_v3 }
 0x1ca   :  { %v7335_v48 = vld [vmem:[#allocation8 + $0x668] sm:$0xf0] }
 0x1cb   :  { %v9222_v13 = vld [vmem:[#allocation8 + $0x84c] sm:$0xf]  ;;  %v7338_v19 = vor.u32 %v9158_v12, %v7335_v48  ;;  %4688 = vmatpush.bf16.msra.mxu2 %v7082_v18  ;;  %v9067_v18 = vld [vmem:[#allocation8 + $0x36c] sm:$0xf0] }
 0x1cc   :  { %v7591_v14 = vld [vmem:[#allocation8 + $0x868] sm:$0xf0] }
 0x1cd   :  { %v9286_v15 = vld [vmem:[#allocation8 + $0xa4c] sm:$0xf]  ;;  %v7594_v24 = vor.u32 %v9222_v13, %v7591_v14  ;;  %4702 = vmatpush.bf16.msra.mxu3 %v7338_v19  ;;  %v6701_v13 = vld [vmem:[#allocation8 + $0x150] sm:$0xf]  ;;  %v10014_v14 = vpop.f32.mrf.mxu2 }
 0x1ce   :  { %v7847_v16 = vld [vmem:[#allocation8 + $0xa68] sm:$0xf0] }
 0x1cf   :  { %v9086_v17 = vld [vmem:[#allocation8 + $0x40c] sm:$0xf]  ;;  %v7850_v28 = vor.u32 %v9286_v15, %v7847_v16  ;;  %4716 = vmatpush.bf16.msrb.mxu0 %v7594_v24  ;;  %v10016_v15 = vpop.f32.mrf.mxu3  ;;  %v9003_v16 = vld [vmem:[#allocation8 + $0x16c] sm:$0xf0]  ;;  %v10022_v24 = vpop.f32.mrf.mxu0 }
 0x1d0   :  { %v7047_v20 = vld [vmem:[#allocation8 + $0x428] sm:$0xf0]  ;;  %v10024_v41 = vpop.f32.mrf.mxu1 }
 0x1d1   :  { %v9150_v21 = vld [vmem:[#allocation8 + $0x60c] sm:$0xf]  ;;  %v7050_v40 = vor.u32 %v9086_v17, %v7047_v20  ;;  %4730 = vmatpush.bf16.msrb.mxu1 %v7850_v28  ;;  %v6957_v17 = vld [vmem:[#allocation8 + $0x350] sm:$0xf]  ;;  %v6702_v28 = vor.u32 %v9003_v16, %v6701_v13 }
 0x1d2   :  { %v7303_v22 = vld [vmem:[#allocation8 + $0x628] sm:$0xf0] }
 0x1d3   :  { %v9214_v29 = vld [vmem:[#allocation8 + $0x80c] sm:$0xf]  ;;  %v7306_v52 = vor.u32 %v9150_v21, %v7303_v22  ;;  %4689 = vmatpush.bf16.msra.mxu2 %v7050_v40 }
 0x1d4   :  { %v7559_v31 = vld [vmem:[#allocation8 + $0x828] sm:$0xf0] }
 0x1d5   :  { %v9278_v32 = vld [vmem:[#allocation8 + $0xa0c] sm:$0xf]  ;;  %v7562_v44 = vor.u32 %v9214_v29, %v7559_v31  ;;  %4703 = vmatpush.bf16.msra.mxu3 %v7306_v52  ;;  %v6958_v29 = vor.u32 %v9067_v18, %v6957_v17 }
 0x1d6   :  { %v7815_v33 = vld [vmem:[#allocation8 + $0xa28] sm:$0xf0]  ;;  %4690 = vmatmul.bf16.vlgmr.msra.gmra.mxu2 %v9958_v58 }
 0x1d7   :  { %v9398_v34 = vld [vmem:[#allocation8 + $0xdcc] sm:$0xf]  ;;  %v7818_v45 = vor.u32 %v9278_v32, %v7815_v33  ;;  %4717 = vmatpush.bf16.msrb.mxu0 %v7562_v44  ;;  %v6669_v33 = vld [vmem:[#allocation8 + $0x110] sm:$0xf]  ;;  %v4439_v13 = vpop.f32.mrf.mxu0 }
 0x1d8   :  { %v8295_v35 = vld [vmem:[#allocation8 + $0xde8] sm:$0xf0]  ;;  %4704 = vmatmul.bf16.vlgmr.msra.gmra.mxu3 %v9960_v61 }
 0x1d9   :  { %v9462_v37 = vld [vmem:[#allocation8 + $0xfcc] sm:$0xf]  ;;  %v8298_v46 = vor.u32 %v9398_v34, %v8295_v35  ;;  %4731 = vmatpush.bf16.msrb.mxu1 %v7818_v45  ;;  %v8995_v34 = vld [vmem:[#allocation8 + $0x12c] sm:$0xf0] }
 0x1da   :  { %v8551_v38 = vld [vmem:[#allocation8 + $0xfe8] sm:$0xf0]  ;;  %4718 = vmatmul.bf16.vlgmr.msrb.gmra.mxu0 %v9966_v25  ;;  %v6925_v35 = vld [vmem:[#allocation8 + $0x310] sm:$0xf]  ;;  %v6670_v63 = vor.u32 %v8995_v34, %v6669_v33 }
 0x1db   :  { %v8554_v49 = vor.u32 %v9462_v37, %v8551_v38  ;;  %v9390_v50 = vld [vmem:[#allocation8 + $0xd8c] sm:$0xf]  ;;  %4738 = vmatpush.bf16.msrb.mxu2 %v8298_v46  ;;  %4766 = vmatpush.bf16.msra.mxu0 %v6766_v57  ;;  %v9059_v37 = vld [vmem:[#allocation8 + $0x32c] sm:$0xf0] }
 0x1dc   :  { %v8263_v54 = vld [vmem:[#allocation8 + $0xda8] sm:$0xf0]  ;;  %4732 = vmatmul.bf16.vlgmr.msrb.gmra.mxu1 %v9968_v27  ;;  %v6926_v42 = vor.u32 %v9059_v37, %v6925_v35  ;;  %v6637_v46 = vld [vmem:[#allocation8 + $0xd0] sm:$0xf] }
 0x1dd   :  { %v9454_v0 = vld [vmem:[#allocation8 + $0xf8c] sm:$0xf]  ;;  %4752 = vmatpush.bf16.msrb.mxu3 %v8554_v49  ;;  %v8266_v6 = vor.u32 %v9390_v50, %v8263_v54  ;;  %4780 = vmatpush.bf16.msra.mxu1 %v7022_v62  ;;  %v10026_v49 = vpop.f32.mrf.mxu2  ;;  %v10028_v50 = vpop.f32.mrf.mxu3  ;;  %v8987_v54 = vld [vmem:[#allocation8 + $0xec] sm:$0xf0] }
 0x1de   :  { %v8519_v1 = vld [vmem:[#allocation8 + $0xfa8] sm:$0xf0]  ;;  %v6893_v57 = vld [vmem:[#allocation8 + $0x2d0] sm:$0xf]  ;;  %v6638_v4 = vor.u32 %v8987_v54, %v6637_v46 }
 0x1df   :  { %v8522_v7 = vor.u32 %v9454_v0, %v8519_v1  ;;  %v9382_v8 = vld [vmem:[#allocation8 + $0xd4c] sm:$0xf]  ;;  %4739 = vmatpush.bf16.msrb.mxu2 %v8266_v6  ;;  %4767 = vmatpush.bf16.msra.mxu0 %v6734_v10  ;;  %v9051_v62 = vld [vmem:[#allocation8 + $0x2ec] sm:$0xf0]  ;;  %v10030_v0 = vld [vmem:[#allocation10] sm:$0xff] }
 0x1e0   :  { %v8231_v9 = vld [vmem:[#allocation8 + $0xd68] sm:$0xf0]  ;;  %v6894_v6 = vor.u32 %v9051_v62, %v6893_v57  ;;  %v8979_v10 = vld [vmem:[#allocation8 + $0xac] sm:$0xf0] }
 0x1e1   :  { %v9446_v12 = vld [vmem:[#allocation8 + $0xf4c] sm:$0xf]  ;;  %4753 = vmatpush.bf16.msrb.mxu3 %v8522_v7  ;;  %v8234_v19 = vor.u32 %v9382_v8, %v8231_v9  ;;  %4781 = vmatpush.bf16.msra.mxu1 %v6990_v11  ;;  %v6605_v9 = vld [vmem:[#allocation8 + $0x90] sm:$0xf] }
 0x1e2   :  { %v8487_v48 = vld [vmem:[#allocation8 + $0xf68] sm:$0xf0]  ;;  %v6861_v11 = vld [vmem:[#allocation8 + $0x290] sm:$0xf] }
 0x1e3   :  { %v8490_v20 = vor.u32 %v9446_v12, %v8487_v48  ;;  %v9374_v21 = vld [vmem:[#allocation8 + $0xd0c] sm:$0xf]  ;;  %4740 = vmatpush.bf16.msrb.mxu2 %v8234_v19  ;;  %4768 = vmatpush.bf16.msra.mxu0 %v6702_v28  ;;  %v9043_v12 = vld [vmem:[#allocation8 + $0x2ac] sm:$0xf0]  ;;  %v1702_v48 = vperm.slane %v10030_v0, 0 }
 0x1e4   :  { %v8199_v22 = vld [vmem:[#allocation8 + $0xd28] sm:$0xf0]  ;;  %v8971_v33 = vld [vmem:[#allocation8 + $0x6c] sm:$0xf0] }
 0x1e5   :  { %v9438_v31 = vld [vmem:[#allocation8 + $0xf0c] sm:$0xf]  ;;  %4754 = vmatpush.bf16.msrb.mxu3 %v8490_v20  ;;  %v8202_v38 = vor.u32 %v9374_v21, %v8199_v22  ;;  %4782 = vmatpush.bf16.msra.mxu1 %v6958_v29  ;;  %v6606_v20 = vor.u32 %v8979_v10, %v6605_v9  ;;  %v6862_v21 = vor.u32 %v9043_v12, %v6861_v11  ;;  %v6573_v29 = vld [vmem:[#allocation8 + $0x50] sm:$0xf] }
 0x1e6   :  { %v8455_v32 = vld [vmem:[#allocation8 + $0xf28] sm:$0xf0]  ;;  %v6829_v34 = vld [vmem:[#allocation8 + $0x250] sm:$0xf]  ;;  %v4328_v37 = vadd.f32 %v9998_v36, %v1702_v48  ;;  %v6574_v46 = vor.u32 %v8971_v33, %v6573_v29 }
 0x1e7   :  { %v8458_v39 = vor.u32 %v9438_v31, %v8455_v32  ;;  %v9366_v40 = vld [vmem:[#allocation8 + $0xccc] sm:$0xf]  ;;  %4741 = vmatpush.bf16.msrb.mxu2 %v8202_v38  ;;  %4769 = vmatpush.bf16.msra.mxu0 %v6670_v63  ;;  %v10033_v31 = vpop.f32.mrf.mxu2  ;;  %v10035_v32 = vpop.f32.mrf.mxu3  ;;  %v9035_v35 = vld [vmem:[#allocation8 + $0x26c] sm:$0xf0]  ;;  %v1703_v38 = vperm.slane %v10030_v0, 1 }
 0x1e8   :  { %v8167_v52 = vld [vmem:[#allocation8 + $0xce8] sm:$0xf0]  ;;  %v6830_v54 = vor.u32 %v9035_v35, %v6829_v34  ;;  %v6541_v57 = vld [vmem:[#allocation8 + $0x10] sm:$0xf] }
 0x1e9   :  { %v9430_v44 = vld [vmem:[#allocation8 + $0xecc] sm:$0xf]  ;;  %4755 = vmatpush.bf16.msrb.mxu3 %v8458_v39  ;;  %v8170_v1 = vor.u32 %v9366_v40, %v8167_v52  ;;  %4783 = vmatpush.bf16.msra.mxu1 %v6926_v42  ;;  %v4453_v40 = vpop.f32.mrf.mxu1  ;;  %v8963_v62 = vld [vmem:[#allocation8 + $0x2c] sm:$0xf0] }
 0x1ea   :  { %v8423_v45 = vld [vmem:[#allocation8 + $0xee8] sm:$0xf0]  ;;  %v7277_v36 = vld [vmem:[#allocation8 + $0x5d0] sm:$0xf] }
 0x1eb   :  { %v8426_v55 = vor.u32 %v9430_v44, %v8423_v45  ;;  %v9358_v2 = vld [vmem:[#allocation8 + $0xc8c] sm:$0xf]  ;;  %4742 = vmatpush.bf16.msrb.mxu2 %v8170_v1  ;;  %4770 = vmatpush.bf16.msra.mxu0 %v6638_v4  ;;  %v6797_v1 = vld [vmem:[#allocation8 + $0x210] sm:$0xf] }
 0x1ec   :  { %v8135_v3 = vld [vmem:[#allocation8 + $0xca8] sm:$0xf0]  ;;  %v7533_v4 = vld [vmem:[#allocation8 + $0x7d0] sm:$0xf] }
 0x1ed   :  { %v9422_v7 = vld [vmem:[#allocation8 + $0xe8c] sm:$0xf]  ;;  %4756 = vmatpush.bf16.msrb.mxu3 %v8426_v55  ;;  %v8138_v16 = vor.u32 %v9358_v2, %v8135_v3  ;;  %4784 = vmatpush.bf16.msra.mxu1 %v6894_v6  ;;  %v9027_v55 = vld [vmem:[#allocation8 + $0x22c] sm:$0xf0]  ;;  %v4342_v3 = vadd.f32 %v10000_v47, %v4328_v37 }
 0x1ee   :  { %v8391_v8 = vld [vmem:[#allocation8 + $0xea8] sm:$0xf0]  ;;  %v9147_v2 = vld [vmem:[#allocation8 + $0x5ec] sm:$0xf0]  ;;  %v6798_v47 = vor.u32 %v9027_v55, %v6797_v1 }
 0x1ef   :  { %v8394_v17 = vor.u32 %v9422_v7, %v8391_v8  ;;  %v9350_v18 = vld [vmem:[#allocation8 + $0xc4c] sm:$0xf]  ;;  %4743 = vmatpush.bf16.msrb.mxu2 %v8138_v16  ;;  %4771 = vmatpush.bf16.msra.mxu0 %v6606_v20  ;;  %v9211_v6 = vld [vmem:[#allocation8 + $0x7ec] sm:$0xf0]  ;;  %v4330_v8 = vadd.f32 %v10002_v56, %v1702_v48  ;;  %v4356_v20 = vadd.f32 %v10006_v30, %v4342_v3  ;;  %v4467_v56 = vpop.f32.mrf.mxu2  ;;  %v4481_v48 = vpop.f32.mrf.mxu3 }
 0x1f0   :  { %v8103_v19 = vld [vmem:[#allocation8 + $0xc68] sm:$0xf0]  ;;  %v7789_v7 = vld [vmem:[#allocation8 + $0x9d0] sm:$0xf] }
 0x1f1   :  { %v9414_v22 = vld [vmem:[#allocation8 + $0xe4c] sm:$0xf]  ;;  %4757 = vmatpush.bf16.msrb.mxu3 %v8394_v17  ;;  %v8106_v52 = vor.u32 %v9350_v18, %v8103_v19  ;;  %4785 = vmatpush.bf16.msra.mxu1 %v6862_v21  ;;  %v9275_v11 = vld [vmem:[#allocation8 + $0x9ec] sm:$0xf0]  ;;  %v4440_v17 = vadd.f32 %v4439_v13, %v1703_v38  ;;  %v4441_v18 = vpop.f32.mrf.mxu0  ;;  %v6542_v19 = vor.u32 %v8963_v62, %v6541_v57 }
 0x1f2   :  { %v8359_v28 = vld [vmem:[#allocation8 + $0xe68] sm:$0xf0]  ;;  %v8045_v12 = vld [vmem:[#allocation8 + $0xbd0] sm:$0xf]  ;;  %v7278_v21 = vor.u32 %v9147_v2, %v7277_v36  ;;  %v7790_v33 = vor.u32 %v9275_v11, %v7789_v7  ;;  %v4370_v30 = vadd.f32 %v10008_v26, %v4356_v20 }
 0x1f3   :  { %v9342_v39 = vld [vmem:[#allocation8 + $0xc0c] sm:$0xf]  ;;  %v8362_v63 = vor.u32 %v9414_v22, %v8359_v28  ;;  %4744 = vmatpush.bf16.msrb.mxu2 %v8106_v52  ;;  %v9339_v16 = vld [vmem:[#allocation8 + $0xbec] sm:$0xf0]  ;;  %4772 = vmatpush.bf16.msra.mxu0 %v6574_v46  ;;  %v7534_v22 = vor.u32 %v9211_v6, %v7533_v4 }
 0x1f4   :  { %v8071_v42 = vld [vmem:[#allocation8 + $0xc28] sm:$0xf0]  ;;  %v7245_v28 = vld [vmem:[#allocation8 + $0x590] sm:$0xf]  ;;  %v8046_v34 = vor.u32 %v9339_v16, %v8045_v12  ;;  %v4384_v7 = vadd.f32 %v10010_v43, %v4370_v30 }
 0x1f5   :  { %v9406_v44 = vld [vmem:[#allocation8 + $0xe0c] sm:$0xf]  ;;  %4758 = vmatpush.bf16.msrb.mxu3 %v8362_v63  ;;  %v8074_v9 = vor.u32 %v9342_v39, %v8071_v42  ;;  %4786 = vmatpush.bf16.msra.mxu1 %v6830_v54  ;;  %v9139_v29 = vld [vmem:[#allocation8 + $0x5ac] sm:$0xf0]  ;;  %v4344_v42 = vadd.f32 %v10004_v23, %v4330_v8  ;;  %v4442_v8 = vadd.f32 %v4441_v18, %v1703_v38 }
 0x1f6   :  { %v8327_v45 = vld [vmem:[#allocation8 + $0xe28] sm:$0xf0]  ;;  %v7501_v35 = vld [vmem:[#allocation8 + $0x790] sm:$0xf]  ;;  %v7246_v46 = vor.u32 %v9139_v29, %v7245_v28  ;;  %v4398_v28 = vadd.f32 %v10012_v5, %v4384_v7 }
 0x1f7   :  { %v8330_v10 = vor.u32 %v9406_v44, %v8327_v45  ;;  %v9203_v37 = vld [vmem:[#allocation8 + $0x7ac] sm:$0xf0]  ;;  %4745 = vmatpush.bf16.msrb.mxu2 %v8074_v9  ;;  %v4454_v44 = vadd.f32 %v4453_v40, %v4440_v17  ;;  %4773 = vmatpush.bf16.msra.mxu0 %v6542_v19  ;;  %v4455_v45 = vpop.f32.mrf.mxu1  ;;  %v4358_v6 = vadd.f32 %v10014_v14, %v4344_v42  ;;  %v4469_v11 = vpop.f32.mrf.mxu2 }
 0x1f8   :  { %v7757_v39 = vld [vmem:[#allocation8 + $0x990] sm:$0xf]  ;;  %v7502_v54 = vor.u32 %v9203_v37, %v7501_v35  ;;  %v4483_v12 = vpop.f32.mrf.mxu3  ;;  %v4456_v29 = vadd.f32 %v4455_v45, %v4442_v8 }
 0x1f9   :  { %4759 = vmatpush.bf16.msrb.mxu3 %v8330_v10  ;;  %v9267_v13 = vld [vmem:[#allocation8 + $0x9ac] sm:$0xf0]  ;;  %4787 = vmatpush.bf16.msra.mxu1 %v6798_v47  ;;  %v4468_v1 = vadd.f32 %v4467_v56, %v4454_v44  ;;  %v4495_v20 = vpop.f32.mrf.mxu0  ;;  %v4372_v56 = vadd.f32 %v10016_v15, %v4358_v6 }
 0x1fa   :  { %v8013_v52 = vld [vmem:[#allocation8 + $0xb90] sm:$0xf]  ;;  %v7758_v55 = vor.u32 %v9267_v13, %v7757_v39  ;;  %4746 = vmatmul.bf16.vlgmr.msrb.gmra.mxu2 %v9976_v51  ;;  %4774 = vmatmul.bf16.vlgmr.msra.gmra.mxu0 %v9938_v59 }
 0x1fb   :  { %v9331_v63 = vld [vmem:[#allocation8 + $0xbac] sm:$0xf0]  ;;  %4794 = vmatpush.bf16.msra.mxu2 %v7278_v21  ;;  %4822 = vmatpush.bf16.msrb.mxu0 %v7790_v33  ;;  %v4482_v47 = vadd.f32 %v4481_v48, %v4468_v1  ;;  %v4386_v45 = vadd.f32 %v10022_v24, %v4372_v56 }
 0x1fc   :  { %v7213_v57 = vld [vmem:[#allocation8 + $0x550] sm:$0xf]  ;;  %v8014_v36 = vor.u32 %v9331_v63, %v8013_v52  ;;  %4760 = vmatmul.bf16.vlgmr.msrb.gmra.mxu3 %v9978_v53  ;;  %4788 = vmatmul.bf16.vlgmr.msra.gmra.mxu1 %v9940_v60  ;;  %v4470_v52 = vadd.f32 %v4469_v11, %v4456_v29 }
 0x1fd   :  { %4808 = vmatpush.bf16.msra.mxu3 %v7534_v22  ;;  %v9131_v62 = vld [vmem:[#allocation8 + $0x56c] sm:$0xf0]  ;;  %4836 = vmatpush.bf16.msrb.mxu1 %v8046_v34  ;;  %v4496_v13 = vadd.f32 %v4495_v20, %v4482_v47 }
 0x1fe   :  { %v7469_v2 = vld [vmem:[#allocation8 + $0x750] sm:$0xf]  ;;  %v7214_v9 = vor.u32 %v9131_v62, %v7213_v57 }
 0x1ff   :  { %v9195_v3 = vld [vmem:[#allocation8 + $0x76c] sm:$0xf0]  ;;  %4795 = vmatpush.bf16.msra.mxu2 %v7246_v46  ;;  %4823 = vmatpush.bf16.msrb.mxu0 %v7758_v55  ;;  %v4509_v15 = vpop.f32.mrf.mxu1  ;;  %v4523_v7 = vpop.f32.mrf.mxu2 }
 0x200   :  { %v7725_v23 = vld [vmem:[#allocation8 + $0x950] sm:$0xf]  ;;  %v7470_v10 = vor.u32 %v9195_v3, %v7469_v2  ;;  %v4484_v3 = vadd.f32 %v4483_v12, %v4470_v52  ;;  %v4537_v24 = vpop.f32.mrf.mxu3 }
 0x201   :  { %v9259_v26 = vld [vmem:[#allocation8 + $0x96c] sm:$0xf0]  ;;  %4809 = vmatpush.bf16.msra.mxu3 %v7502_v54  ;;  %4837 = vmatpush.bf16.msrb.mxu1 %v8014_v36  ;;  %v4412_v54 = vadd.f32 %v10026_v49, %v4398_v28 }
 0x202   :  { %v7981_v40 = vld [vmem:[#allocation8 + $0xb50] sm:$0xf]  ;;  %v7726_v43 = vor.u32 %v9259_v26, %v7725_v23  ;;  %v4510_v26 = vadd.f32 %v4509_v15, %v4496_v13 }
 0x203   :  { %v9323_v4 = vld [vmem:[#allocation8 + $0xb6c] sm:$0xf0]  ;;  %4796 = vmatpush.bf16.msra.mxu2 %v7214_v9  ;;  %v4400_v9 = vadd.f32 %v10024_v41, %v4386_v45 }
 0x204   :  { %v7181_v16 = vld [vmem:[#allocation8 + $0x510] sm:$0xf]  ;;  %v7982_v14 = vor.u32 %v9323_v4, %v7981_v40  ;;  %4824 = vmatpush.bf16.msrb.mxu0 %v7726_v43  ;;  %v4524_v11 = vadd.f32 %v4523_v7, %v4510_v26  ;;  %v6767_v26 = vld [vmem:[#allocation8 + $0x1f0] sm:$0xf0] }
 0x205   :  { %v9123_v17 = vld [vmem:[#allocation8 + $0x52c] sm:$0xf0]  ;;  %4810 = vmatpush.bf16.msra.mxu3 %v7470_v10  ;;  %v4426_v10 = vadd.f32 %v10028_v50, %v4412_v54  ;;  %v4414_v28 = vadd.f32 %v10033_v31, %v4400_v9 }
 0x206   :  { %v7437_v19 = vld [vmem:[#allocation8 + $0x710] sm:$0xf]  ;;  %v7182_v33 = vor.u32 %v9123_v17, %v7181_v16  ;;  %4838 = vmatpush.bf16.msrb.mxu1 %v7982_v14  ;;  %v4497_v16 = vpop.f32.mrf.mxu0 }
 0x207   :  { %v9187_v0 = vld [vmem:[#allocation8 + $0x72c] sm:$0xf0]  ;;  %v5214_v56 = vmax.f32 %v4426_v10, 0.0 }
 0x208   :  { %v7693_v38 = vld [vmem:[#allocation8 + $0x910] sm:$0xf]  ;;  %v7438_v34 = vor.u32 %v9187_v0, %v7437_v19  ;;  %4797 = vmatpush.bf16.msra.mxu2 %v7182_v33  ;;  %v4498_v0 = vadd.f32 %v4497_v16, %v4484_v3  ;;  %v9007_v16 = vld [vmem:[#allocation8 + $0x194] sm:$0xf] }
 0x209   :  { %v9251_v18 = vld [vmem:[#allocation8 + $0x92c] sm:$0xf0] }
 0x20a   :  { %v7949_v21 = vld [vmem:[#allocation8 + $0xb10] sm:$0xf]  ;;  %v7694_v48 = vor.u32 %v9251_v18, %v7693_v38  ;;  %4811 = vmatpush.bf16.msra.mxu3 %v7438_v34  ;;  %v4538_v38 = vadd.f32 %v4537_v24, %v4524_v11 }
 0x20b   :  { %v9315_v22 = vld [vmem:[#allocation8 + $0xb2c] sm:$0xf0] }
 0x20c   :  { %v7149_v35 = vld [vmem:[#allocation8 + $0x4d0] sm:$0xf]  ;;  %v7950_v63 = vor.u32 %v9315_v22, %v7949_v21  ;;  %4825 = vmatpush.bf16.msrb.mxu0 %v7694_v48  ;;  %v5215_v29 = vmax.f32 %v4538_v38, 0.0  ;;  %v4511_v48 = vpop.f32.mrf.mxu1 }
 0x20d   :  { %v9115_v37 = vld [vmem:[#allocation8 + $0x4ec] sm:$0xf0] }
 0x20e   :  { %v7405_v39 = vld [vmem:[#allocation8 + $0x6d0] sm:$0xf]  ;;  %v7150_v57 = vor.u32 %v9115_v37, %v7149_v35  ;;  %4839 = vmatpush.bf16.msrb.mxu1 %v7950_v63 }
 0x20f   :  { %v9179_v42 = vld [vmem:[#allocation8 + $0x6ec] sm:$0xf0] }
 0x210   :  { %v7661_v44 = vld [vmem:[#allocation8 + $0x8d0] sm:$0xf]  ;;  %v7406_v62 = vor.u32 %v9179_v42, %v7405_v39  ;;  %4798 = vmatpush.bf16.msra.mxu2 %v7150_v57  ;;  %v10061_v42 = vpack.c.bf16 %v5215_v29, %v5214_v56 }
 0x211   :  { %v9243_v30 = vld [vmem:[#allocation8 + $0x8ec] sm:$0xf0] }
 0x212   :  { %v7917_v46 = vld [vmem:[#allocation8 + $0xad0] sm:$0xf]  ;;  %v7662_v1 = vor.u32 %v9243_v30, %v7661_v44  ;;  %4812 = vmatpush.bf16.msra.mxu3 %v7406_v62  ;;  %v4512_v30 = vadd.f32 %v4511_v48, %v4498_v0  ;;  %v4428_v62 = vadd.f32 %v10035_v32, %v4414_v28  ;;  %5238 = vst [vmem:[#allocation15] sm:$0xff] %v10061_v42  ;;  %v6991_v0 = vld [vmem:[#allocation8 + $0x3b0] sm:$0xf0]  ;;  %v5386_v28 = vunpack.c.l.b16 %v10061_v42 }
 0x213   :  { %v9307_v5 = vld [vmem:[#allocation8 + $0xaec] sm:$0xf0]  ;;  %v5387_v29 = vunpack.c.h.b16 %v10061_v42 }
 0x214   :  { %v7117_v55 = vld [vmem:[#allocation8 + $0x490] sm:$0xf]  ;;  %v7918_v23 = vor.u32 %v9307_v5, %v7917_v46  ;;  %4826 = vmatpush.bf16.msrb.mxu0 %v7662_v1  ;;  %v4525_v5 = vpop.f32.mrf.mxu2 }
 0x215   :  { %v9107_v36 = vld [vmem:[#allocation8 + $0x4ac] sm:$0xf0]  ;;  %v4526_v1 = vadd.f32 %v4525_v5, %v4512_v30 }
 0x216   :  { %v7373_v2 = vld [vmem:[#allocation8 + $0x690] sm:$0xf]  ;;  %v7118_v12 = vor.u32 %v9107_v36, %v7117_v55  ;;  %4840 = vmatpush.bf16.msrb.mxu1 %v7918_v23  ;;  %v9015_v36 = vld [vmem:[#allocation8 + $0x1d4] sm:$0xf] }
 0x217   :  { %v9171_v40 = vld [vmem:[#allocation8 + $0x6ac] sm:$0xf0] }
 0x218   :  { %v7629_v4 = vld [vmem:[#allocation8 + $0x890] sm:$0xf]  ;;  %v7374_v17 = vor.u32 %v9171_v40, %v7373_v2  ;;  %4799 = vmatpush.bf16.msra.mxu2 %v7118_v12  ;;  %v4539_v2 = vpop.f32.mrf.mxu3  ;;  %v9079_v40 = vld [vmem:[#allocation8 + $0x3d4] sm:$0xf] }
 0x219   :  { %v9235_v6 = vld [vmem:[#allocation8 + $0x8ac] sm:$0xf0]  ;;  %v6735_v12 = vld [vmem:[#allocation8 + $0x1b0] sm:$0xf0] }
 0x21a   :  { %v7885_v8 = vld [vmem:[#allocation8 + $0xa90] sm:$0xf]  ;;  %v7630_v19 = vor.u32 %v9235_v6, %v7629_v4  ;;  %4813 = vmatpush.bf16.msra.mxu3 %v7374_v17  ;;  %v7023_v4 = vld [vmem:[#allocation8 + $0x3f0] sm:$0xf0]  ;;  %v4540_v6 = vadd.f32 %v4539_v2, %v4526_v1  ;;  %v5222_v17 = vmax.f32 %v4428_v62, 0.0 }
 0x21b   :  { %v9299_v49 = vld [vmem:[#allocation8 + $0xaac] sm:$0xf0]  ;;  %v9055_v62 = vld [vmem:[#allocation8 + $0x314] sm:$0xf] }
 0x21c   :  { %v7085_v47 = vld [vmem:[#allocation8 + $0x450] sm:$0xf]  ;;  %v7886_v18 = vor.u32 %v9299_v49, %v7885_v8  ;;  %4827 = vmatpush.bf16.msrb.mxu0 %v7630_v19  ;;  %v5223_v19 = vmax.f32 %v4540_v6, 0.0  ;;  %v6927_v1 = vld [vmem:[#allocation8 + $0x330] sm:$0xf0] }
 0x21d   :  { %v9099_v43 = vld [vmem:[#allocation8 + $0x46c] sm:$0xf0]  ;;  %v8983_v6 = vld [vmem:[#allocation8 + $0xd4] sm:$0xf] }
 0x21e   :  { %v7341_v14 = vld [vmem:[#allocation8 + $0x650] sm:$0xf]  ;;  %v7086_v35 = vor.u32 %v9099_v43, %v7085_v47  ;;  %4841 = vmatpush.bf16.msrb.mxu1 %v7886_v18  ;;  %v6770_v47 = vor.u32 %v9015_v36, %v6767_v26  ;;  %v7026_v43 = vor.u32 %v9079_v40, %v7023_v4  ;;  %v5234_v38 = vpack.c.bf16 %v5223_v19, %v5222_v17  ;;  %v8975_v19 = vld [vmem:[#allocation8 + $0x94] sm:$0xf] }
 0x21f   :  { %v9163_v20 = vld [vmem:[#allocation8 + $0x66c] sm:$0xf0]  ;;  %v6930_v26 = vor.u32 %v9055_v62, %v6927_v1  ;;  %v9271_v62 = vld [vmem:[#allocation8 + $0x9d4] sm:$0xf] }
 0x220   :  { %v7597_v21 = vld [vmem:[#allocation8 + $0x850] sm:$0xf]  ;;  %v7342_v37 = vor.u32 %v9163_v20, %v7341_v14  ;;  %4800 = vmatpush.bf16.msra.mxu2 %v7086_v35  ;;  %v9071_v14 = vld [vmem:[#allocation8 + $0x394] sm:$0xf]  ;;  %5242 = vst [vmem:[#allocation15 + $0x20] sm:$0xff] %v5234_v38 }
 0x221   :  { %v9227_v41 = vld [vmem:[#allocation8 + $0x86c] sm:$0xf0]  ;;  %v8999_v35 = vld [vmem:[#allocation8 + $0x154] sm:$0xf] }
 0x222   :  { %v7853_v22 = vld [vmem:[#allocation8 + $0xa50] sm:$0xf]  ;;  %v7598_v39 = vor.u32 %v9227_v41, %v7597_v21  ;;  %4814 = vmatpush.bf16.msra.mxu3 %v7342_v37  ;;  %v6738_v21 = vor.u32 %v9007_v16, %v6735_v12  ;;  %v6994_v41 = vor.u32 %v9071_v14, %v6991_v0  ;;  %v6703_v37 = vld [vmem:[#allocation8 + $0x170] sm:$0xf0] }
 0x223   :  { %v9291_v50 = vld [vmem:[#allocation8 + $0xa6c] sm:$0xf0]  ;;  %v6863_v14 = vld [vmem:[#allocation8 + $0x2b0] sm:$0xf0] }
 0x224   :  { %v7053_v33 = vld [vmem:[#allocation8 + $0x410] sm:$0xf]  ;;  %v7854_v44 = vor.u32 %v9291_v50, %v7853_v22  ;;  %4828 = vmatpush.bf16.msrb.mxu0 %v7598_v39  ;;  %v9063_v39 = vld [vmem:[#allocation8 + $0x354] sm:$0xf] }
 0x225   :  { %v9091_v34 = vld [vmem:[#allocation8 + $0x42c] sm:$0xf0] }
 0x226   :  { %v7309_v13 = vld [vmem:[#allocation8 + $0x610] sm:$0xf]  ;;  %v7054_v3 = vor.u32 %v9091_v34, %v7053_v33  ;;  %4842 = vmatpush.bf16.msrb.mxu1 %v7854_v44  ;;  %v5394_v33 = vunpack.c.l.b16 %v5234_v38  ;;  %v5395_v34 = vunpack.c.h.b16 %v5234_v38 }
 0x227   :  { %v9155_v52 = vld [vmem:[#allocation8 + $0x62c] sm:$0xf0] }
 0x228   :  { %v7565_v63 = vld [vmem:[#allocation8 + $0x810] sm:$0xf]  ;;  %v7310_v23 = vor.u32 %v9155_v52, %v7309_v13  ;;  %4801 = vmatpush.bf16.msra.mxu2 %v7054_v3  ;;  %v6959_v13 = vld [vmem:[#allocation8 + $0x370] sm:$0xf0]  ;;  %v10069_v52 = vpack.c.b16 %v5394_v33, %v5386_v28 }
 0x229   :  { %v9219_v15 = vld [vmem:[#allocation8 + $0x82c] sm:$0xf0]  ;;  %v6575_v28 = vld [vmem:[#allocation8 + $0x70] sm:$0xf0] }
 0x22a   :  { %v7821_v31 = vld [vmem:[#allocation8 + $0xa10] sm:$0xf]  ;;  %v7566_v7 = vor.u32 %v9219_v15, %v7565_v63  ;;  %4815 = vmatpush.bf16.msra.mxu3 %v7310_v23  ;;  %v10071_v63 = vpack.c.b16 %v5395_v34, %v5387_v29  ;;  %v9031_v29 = vld [vmem:[#allocation8 + $0x254] sm:$0xf] }
 0x22b   :  { %v9283_v46 = vld [vmem:[#allocation8 + $0xa2c] sm:$0xf0]  ;;  %4802 = vmatmul.bf16.vlgmr.msra.gmra.mxu2 %v9958_v58  ;;  %v6831_v33 = vld [vmem:[#allocation8 + $0x270] sm:$0xf0] }
 0x22c   :  { %v8301_v45 = vld [vmem:[#allocation8 + $0xdd0] sm:$0xf]  ;;  %v7822_v24 = vor.u32 %v9283_v46, %v7821_v31  ;;  %4829 = vmatpush.bf16.msrb.mxu0 %v7566_v7  ;;  %v6706_v31 = vor.u32 %v8999_v35, %v6703_v37  ;;  %v6962_v46 = vor.u32 %v9063_v39, %v6959_v13  ;;  %v6639_v7 = vld [vmem:[#allocation8 + $0xf0] sm:$0xf0] }
 0x22d   :  { %v9403_v54 = vld [vmem:[#allocation8 + $0xdec] sm:$0xf0]  ;;  %4816 = vmatmul.bf16.vlgmr.msra.gmra.mxu3 %v9960_v61 }
 0x22e   :  { %v8557_v57 = vld [vmem:[#allocation8 + $0xfd0] sm:$0xf]  ;;  %v8302_v9 = vor.u32 %v9403_v54, %v8301_v45  ;;  %4843 = vmatpush.bf16.msrb.mxu1 %v7822_v24  ;;  %v8991_v54 = vld [vmem:[#allocation8 + $0x114] sm:$0xf] }
 0x22f   :  { %v9467_v55 = vld [vmem:[#allocation8 + $0xfec] sm:$0xf0]  ;;  %4830 = vmatmul.bf16.vlgmr.msrb.gmra.mxu0 %v9966_v25  ;;  %v9047_v24 = vld [vmem:[#allocation8 + $0x2d4] sm:$0xf] }
 0x230   :  { %v8269_v8 = vld [vmem:[#allocation8 + $0xd90] sm:$0xf]  ;;  %v8558_v10 = vor.u32 %v9467_v55, %v8557_v57  ;;  %4850 = vmatpush.bf16.msrb.mxu2 %v8302_v9  ;;  %4878 = vmatpush.bf16.msra.mxu0 %v6770_v47  ;;  %v6671_v57 = vld [vmem:[#allocation8 + $0x130] sm:$0xf0] }
 0x231   :  { %v9395_v32 = vld [vmem:[#allocation8 + $0xdac] sm:$0xf0]  ;;  %4844 = vmatmul.bf16.vlgmr.msrb.gmra.mxu1 %v9968_v27  ;;  %v6674_v23 = vor.u32 %v8991_v54, %v6671_v57  ;;  %v6607_v47 = vld [vmem:[#allocation8 + $0xb0] sm:$0xf0] }
 0x232   :  { %v8525_v49 = vld [vmem:[#allocation8 + $0xf90] sm:$0xf]  ;;  %v8270_v18 = vor.u32 %v9395_v32, %v8269_v8  ;;  %4864 = vmatpush.bf16.msrb.mxu3 %v8558_v10  ;;  %4892 = vmatpush.bf16.msra.mxu1 %v7026_v43  ;;  %v6895_v8 = vld [vmem:[#allocation8 + $0x2f0] sm:$0xf0] }
 0x233   :  { %v9459_v11 = vld [vmem:[#allocation8 + $0xfac] sm:$0xf0]  ;;  %v6898_v16 = vor.u32 %v9047_v24, %v6895_v8  ;;  %v9039_v43 = vld [vmem:[#allocation8 + $0x294] sm:$0xf] }
 0x234   :  { %v8526_v20 = vor.u32 %v9459_v11, %v8525_v49  ;;  %v8237_v22 = vld [vmem:[#allocation8 + $0xd50] sm:$0xf]  ;;  %4851 = vmatpush.bf16.msrb.mxu2 %v8270_v18  ;;  %4879 = vmatpush.bf16.msra.mxu0 %v6738_v21  ;;  %v6642_v11 = vor.u32 %v8983_v6, %v6639_v7  ;;  %v6610_v21 = vor.u32 %v8975_v19, %v6607_v47  ;;  %v9207_v54 = vld [vmem:[#allocation8 + $0x7d4] sm:$0xf] }
 0x235   :  { %v9387_v50 = vld [vmem:[#allocation8 + $0xd6c] sm:$0xf0]  ;;  %v7535_v57 = vld [vmem:[#allocation8 + $0x7f0] sm:$0xf0] }
 0x236   :  { %v8493_v56 = vld [vmem:[#allocation8 + $0xf50] sm:$0xf]  ;;  %4865 = vmatpush.bf16.msrb.mxu3 %v8526_v20  ;;  %v8238_v42 = vor.u32 %v9387_v50, %v8237_v22  ;;  %4893 = vmatpush.bf16.msra.mxu1 %v6994_v41  ;;  %v6866_v41 = vor.u32 %v9039_v43, %v6863_v14  ;;  %v9135_v6 = vld [vmem:[#allocation8 + $0x594] sm:$0xf] }
 0x237   :  { %v9451_v48 = vld [vmem:[#allocation8 + $0xf6c] sm:$0xf0]  ;;  %v7247_v7 = vld [vmem:[#allocation8 + $0x5b0] sm:$0xf0] }
 0x238   :  { %v8494_v44 = vor.u32 %v9451_v48, %v8493_v56  ;;  %v8205_v30 = vld [vmem:[#allocation8 + $0xd10] sm:$0xf]  ;;  %4852 = vmatpush.bf16.msrb.mxu2 %v8238_v42  ;;  %4880 = vmatpush.bf16.msra.mxu0 %v6706_v31  ;;  %v8967_v56 = vld [vmem:[#allocation8 + $0x54] sm:$0xf] }
 0x239   :  { %v9379_v15 = vld [vmem:[#allocation8 + $0xd2c] sm:$0xf0]  ;;  %v6578_v42 = vor.u32 %v8967_v56, %v6575_v28  ;;  %v9023_v31 = vld [vmem:[#allocation8 + $0x214] sm:$0xf] }
 0x23a   :  { %v8461_v5 = vld [vmem:[#allocation8 + $0xf10] sm:$0xf]  ;;  %4866 = vmatpush.bf16.msrb.mxu3 %v8494_v44  ;;  %v8206_v55 = vor.u32 %v9379_v15, %v8205_v30  ;;  %4894 = vmatpush.bf16.msra.mxu1 %v6962_v46  ;;  %v6834_v44 = vor.u32 %v9031_v29, %v6831_v33  ;;  %v8959_v30 = vld [vmem:[#allocation8 + $0x14] sm:$0xf] }
 0x23b   :  { %v9443_v45 = vld [vmem:[#allocation8 + $0xf2c] sm:$0xf0]  ;;  %v6543_v15 = vld [vmem:[#allocation8 + $0x30] sm:$0xf0] }
 0x23c   :  { %v8462_v36 = vor.u32 %v9443_v45, %v8461_v5  ;;  %v8173_v2 = vld [vmem:[#allocation8 + $0xcd0] sm:$0xf]  ;;  %4853 = vmatpush.bf16.msrb.mxu2 %v8206_v55  ;;  %4881 = vmatpush.bf16.msra.mxu0 %v6674_v23  ;;  %v6799_v46 = vld [vmem:[#allocation8 + $0x230] sm:$0xf0]  ;;  %v6546_v23 = vor.u32 %v8959_v30, %v6543_v15 }
 0x23d   :  { %v9371_v3 = vld [vmem:[#allocation8 + $0xcec] sm:$0xf0]  ;;  %v9143_v5 = vld [vmem:[#allocation8 + $0x5d4] sm:$0xf] }
 0x23e   :  { %v8429_v40 = vld [vmem:[#allocation8 + $0xed0] sm:$0xf]  ;;  %4867 = vmatpush.bf16.msrb.mxu3 %v8462_v36  ;;  %v8174_v32 = vor.u32 %v9371_v3, %v8173_v2  ;;  %4895 = vmatpush.bf16.msra.mxu1 %v6930_v26  ;;  %v7279_v45 = vld [vmem:[#allocation8 + $0x5f0] sm:$0xf0]  ;;  %v6802_v26 = vor.u32 %v9023_v31, %v6799_v46 }
 0x23f   :  { %v9435_v4 = vld [vmem:[#allocation8 + $0xeec] sm:$0xf0]  ;;  %v7791_v36 = vld [vmem:[#allocation8 + $0x9f0] sm:$0xf0] }
 0x240   :  { %v8430_v49 = vor.u32 %v9435_v4, %v8429_v40  ;;  %v8141_v9 = vld [vmem:[#allocation8 + $0xc90] sm:$0xf]  ;;  %4854 = vmatpush.bf16.msrb.mxu2 %v8174_v32  ;;  %4882 = vmatpush.bf16.msra.mxu0 %v6642_v11  ;;  %v9335_v2 = vld [vmem:[#allocation8 + $0xbd4] sm:$0xf]  ;;  %v7282_v40 = vor.u32 %v9143_v5, %v7279_v45  ;;  %v7538_v4 = vor.u32 %v9207_v54, %v7535_v57  ;;  %v10079_v57 = vpop.f32.mrf.mxu0 }
 0x241   :  { %v9363_v10 = vld [vmem:[#allocation8 + $0xcac] sm:$0xf0]  ;;  %v8047_v3 = vld [vmem:[#allocation8 + $0xbf0] sm:$0xf0]  ;;  %v7794_v24 = vor.u32 %v9271_v62, %v7791_v36 }
 0x242   :  { %v8397_v12 = vld [vmem:[#allocation8 + $0xe90] sm:$0xf]  ;;  %4868 = vmatpush.bf16.msrb.mxu3 %v8430_v49  ;;  %v8142_v0 = vor.u32 %v9363_v10, %v8141_v9  ;;  %4896 = vmatpush.bf16.msra.mxu1 %v6898_v16  ;;  %v8050_v8 = vor.u32 %v9335_v2, %v8047_v3  ;;  %v9199_v32 = vld [vmem:[#allocation8 + $0x794] sm:$0xf] }
 0x243   :  { %v9427_v17 = vld [vmem:[#allocation8 + $0xeac] sm:$0xf0]  ;;  %v7503_v49 = vld [vmem:[#allocation8 + $0x7b0] sm:$0xf0] }
 0x244   :  { %v8398_v38 = vor.u32 %v9427_v17, %v8397_v12  ;;  %v8109_v18 = vld [vmem:[#allocation8 + $0xc50] sm:$0xf]  ;;  %4855 = vmatpush.bf16.msrb.mxu2 %v8142_v0  ;;  %4883 = vmatpush.bf16.msra.mxu0 %v6610_v21  ;;  %v9263_v9 = vld [vmem:[#allocation8 + $0x994] sm:$0xf]  ;;  %v7250_v12 = vor.u32 %v9135_v6, %v7247_v7  ;;  %v7506_v17 = vor.u32 %v9199_v32, %v7503_v49  ;;  %v10081_v49 = vpop.f32.mrf.mxu1 }
 0x245   :  { %v9355_v20 = vld [vmem:[#allocation8 + $0xc6c] sm:$0xf0]  ;;  %v7759_v10 = vld [vmem:[#allocation8 + $0x9b0] sm:$0xf0] }
 0x246   :  { %v8365_v22 = vld [vmem:[#allocation8 + $0xe50] sm:$0xf]  ;;  %4869 = vmatpush.bf16.msrb.mxu3 %v8398_v38  ;;  %v8110_v48 = vor.u32 %v9355_v20, %v8109_v18  ;;  %4897 = vmatpush.bf16.msra.mxu1 %v6866_v41  ;;  %v9327_v11 = vld [vmem:[#allocation8 + $0xb94] sm:$0xf]  ;;  %v7762_v43 = vor.u32 %v9263_v9, %v7759_v10 }
 0x247   :  { %v9419_v50 = vld [vmem:[#allocation8 + $0xe6c] sm:$0xf0]  ;;  %v8015_v16 = vld [vmem:[#allocation8 + $0xbb0] sm:$0xf0] }
 0x248   :  { %v8077_v34 = vld [vmem:[#allocation8 + $0xc10] sm:$0xf]  ;;  %v8366_v35 = vor.u32 %v9419_v50, %v8365_v22  ;;  %4856 = vmatpush.bf16.msrb.mxu2 %v8110_v48  ;;  %4884 = vmatpush.bf16.msra.mxu0 %v6578_v42  ;;  %v9127_v19 = vld [vmem:[#allocation8 + $0x554] sm:$0xf]  ;;  %v8018_v14 = vor.u32 %v9327_v11, %v8015_v16 }
 0x249   :  { %v9347_v37 = vld [vmem:[#allocation8 + $0xc2c] sm:$0xf0]  ;;  %v7215_v47 = vld [vmem:[#allocation8 + $0x570] sm:$0xf0] }
 0x24a   :  { %v8333_v39 = vld [vmem:[#allocation8 + $0xe10] sm:$0xf]  ;;  %4870 = vmatpush.bf16.msrb.mxu3 %v8366_v35  ;;  %v8078_v1 = vor.u32 %v9347_v37, %v8077_v34  ;;  %4898 = vmatpush.bf16.msra.mxu1 %v6834_v44  ;;  %v9191_v0 = vld [vmem:[#allocation8 + $0x754] sm:$0xf]  ;;  %v7218_v22 = vor.u32 %v9127_v19, %v7215_v47 }
 0x24b   :  { %v9411_v13 = vld [vmem:[#allocation8 + $0xe2c] sm:$0xf0]  ;;  %v7471_v38 = vld [vmem:[#allocation8 + $0x770] sm:$0xf0] }
 0x24c   :  { %v8334_v55 = vor.u32 %v9411_v13, %v8333_v39  ;;  %4857 = vmatpush.bf16.msrb.mxu2 %v8078_v1  ;;  %4885 = vmatpush.bf16.msra.mxu0 %v6546_v23  ;;  %v9255_v18 = vld [vmem:[#allocation8 + $0x954] sm:$0xf]  ;;  %v7474_v50 = vor.u32 %v9191_v0, %v7471_v38 }
 0x24d   :  { %v7727_v20 = vld [vmem:[#allocation8 + $0x970] sm:$0xf0] }
 0x24e   :  { %4871 = vmatpush.bf16.msrb.mxu3 %v8334_v55  ;;  %4899 = vmatpush.bf16.msra.mxu1 %v6802_v26  ;;  %v9319_v21 = vld [vmem:[#allocation8 + $0xb54] sm:$0xf]  ;;  %v7730_v29 = vor.u32 %v9255_v18, %v7727_v20  ;;  %v10083_v18 = vpop.f32.mrf.mxu2  ;;  %v10085_v20 = vpop.f32.mrf.mxu3 }
 0x24f   :  { %4858 = vmatmul.bf16.vlgmr.msrb.gmra.mxu2 %v9976_v51  ;;  %v7983_v41 = vld [vmem:[#allocation8 + $0xb70] sm:$0xf0]  ;;  %4886 = vmatmul.bf16.vlgmr.msra.gmra.mxu0 %v9938_v59 }
 0x250   :  { %4906 = vmatpush.bf16.msra.mxu2 %v7282_v40  ;;  %4934 = vmatpush.bf16.msrb.mxu0 %v7794_v24  ;;  %v9119_v56 = vld [vmem:[#allocation8 + $0x514] sm:$0xf]  ;;  %v7986_v33 = vor.u32 %v9319_v21, %v7983_v41  ;;  %v10087_v41 = vpop.f32.mrf.mxu0 }
 0x251   :  { %4872 = vmatmul.bf16.vlgmr.msrb.gmra.mxu3 %v9978_v53  ;;  %4900 = vmatmul.bf16.vlgmr.msra.gmra.mxu1 %v9940_v60  ;;  %v7183_v28 = vld [vmem:[#allocation8 + $0x530] sm:$0xf0] }
 0x252   :  { %4920 = vmatpush.bf16.msra.mxu3 %v7538_v4  ;;  %4948 = vmatpush.bf16.msrb.mxu1 %v8050_v8  ;;  %v9183_v34 = vld [vmem:[#allocation8 + $0x714] sm:$0xf]  ;;  %v7186_v42 = vor.u32 %v9119_v56, %v7183_v28 }
 0x253   :  { %v7439_v48 = vld [vmem:[#allocation8 + $0x730] sm:$0xf0] }
 0x254   :  { %4907 = vmatpush.bf16.msra.mxu2 %v7250_v12  ;;  %4935 = vmatpush.bf16.msrb.mxu0 %v7762_v43  ;;  %v9247_v35 = vld [vmem:[#allocation8 + $0x914] sm:$0xf]  ;;  %v7442_v44 = vor.u32 %v9183_v34, %v7439_v48 }
 0x255   :  { %v7695_v37 = vld [vmem:[#allocation8 + $0x930] sm:$0xf0] }
 0x256   :  { %4921 = vmatpush.bf16.msra.mxu3 %v7506_v17  ;;  %4949 = vmatpush.bf16.msrb.mxu1 %v8018_v14  ;;  %v9311_v39 = vld [vmem:[#allocation8 + $0xb14] sm:$0xf]  ;;  %v7698_v31 = vor.u32 %v9247_v35, %v7695_v37 }
 0x257   :  { %v7951_v13 = vld [vmem:[#allocation8 + $0xb30] sm:$0xf0] }
 0x258   :  { %4908 = vmatpush.bf16.msra.mxu2 %v7218_v22  ;;  %v9111_v30 = vld [vmem:[#allocation8 + $0x4d4] sm:$0xf]  ;;  %4936 = vmatpush.bf16.msrb.mxu0 %v7730_v29  ;;  %v7954_v46 = vor.u32 %v9311_v39, %v7951_v13 }
 0x259   :  { %v7151_v15 = vld [vmem:[#allocation8 + $0x4f0] sm:$0xf0] }
 0x25a   :  { %4922 = vmatpush.bf16.msra.mxu3 %v7474_v50  ;;  %4950 = vmatpush.bf16.msrb.mxu1 %v7986_v33  ;;  %v9175_v5 = vld [vmem:[#allocation8 + $0x6d4] sm:$0xf]  ;;  %v7154_v36 = vor.u32 %v9111_v30, %v7151_v15  ;;  %v6773_v15 = vld [vmem:[#allocation8 + $0x1d8] sm:$0xf] }
 0x25b   :  { %v7407_v45 = vld [vmem:[#allocation8 + $0x6f0] sm:$0xf0] }
 0x25c   :  { %v9239_v54 = vld [vmem:[#allocation8 + $0x8d4] sm:$0xf]  ;;  %4909 = vmatpush.bf16.msra.mxu2 %v7186_v42  ;;  %v7410_v2 = vor.u32 %v9175_v5, %v7407_v45  ;;  %4937 = vmatpush.bf16.msrb.mxu0 %v7698_v31  ;;  %v9020_v5 = vld [vmem:[#allocation8 + $0x1f4] sm:$0xf0] }
 0x25d   :  { %v7663_v62 = vld [vmem:[#allocation8 + $0x8f0] sm:$0xf0]  ;;  %v7029_v45 = vld [vmem:[#allocation8 + $0x3d8] sm:$0xf] }
 0x25e   :  { %v9303_v1 = vld [vmem:[#allocation8 + $0xad4] sm:$0xf]  ;;  %4923 = vmatpush.bf16.msra.mxu3 %v7442_v44  ;;  %4951 = vmatpush.bf16.msrb.mxu1 %v7954_v46  ;;  %v7666_v26 = vor.u32 %v9239_v54, %v7663_v62  ;;  %v9084_v54 = vld [vmem:[#allocation8 + $0x3f4] sm:$0xf0]  ;;  %v10089_v62 = vpop.f32.mrf.mxu1 }
 0x25f   :  { %v7919_v55 = vld [vmem:[#allocation8 + $0xaf0] sm:$0xf0] }
 0x260   :  { %v9103_v3 = vld [vmem:[#allocation8 + $0x494] sm:$0xf]  ;;  %v7922_v40 = vor.u32 %v9303_v1, %v7919_v55  ;;  %4910 = vmatpush.bf16.msra.mxu2 %v7154_v36  ;;  %4938 = vmatpush.bf16.msrb.mxu0 %v7666_v26  ;;  %v6774_v26 = vor.u32 %v9020_v5, %v6773_v15 }
 0x261   :  { %v7119_v23 = vld [vmem:[#allocation8 + $0x4b0] sm:$0xf0] }
 0x262   :  { %v9167_v4 = vld [vmem:[#allocation8 + $0x694] sm:$0xf]  ;;  %4924 = vmatpush.bf16.msra.mxu3 %v7410_v2  ;;  %v7122_v9 = vor.u32 %v9103_v3, %v7119_v23  ;;  %4952 = vmatpush.bf16.msrb.mxu1 %v7922_v40  ;;  %v7030_v40 = vor.u32 %v9084_v54, %v7029_v45 }
 0x263   :  { %v7375_v6 = vld [vmem:[#allocation8 + $0x6b0] sm:$0xf0] }
 0x264   :  { %v9231_v7 = vld [vmem:[#allocation8 + $0x894] sm:$0xf]  ;;  %v7378_v10 = vor.u32 %v9167_v4, %v7375_v6  ;;  %4911 = vmatpush.bf16.msra.mxu2 %v7122_v9  ;;  %v9076_v9 = vld [vmem:[#allocation8 + $0x3b4] sm:$0xf0] }
 0x265   :  { %v7631_v24 = vld [vmem:[#allocation8 + $0x8b0] sm:$0xf0] }
 0x266   :  { %v9295_v8 = vld [vmem:[#allocation8 + $0xa94] sm:$0xf]  ;;  %v7634_v12 = vor.u32 %v9231_v7, %v7631_v24  ;;  %4925 = vmatpush.bf16.msra.mxu3 %v7378_v10  ;;  %v6741_v7 = vld [vmem:[#allocation8 + $0x198] sm:$0xf]  ;;  %v10091_v24 = vpop.f32.mrf.mxu0  ;;  %v10093_v10 = vpop.f32.mrf.mxu2 }
 0x267   :  { %v7887_v32 = vld [vmem:[#allocation8 + $0xab0] sm:$0xf0] }
 0x268   :  { %v9095_v11 = vld [vmem:[#allocation8 + $0x454] sm:$0xf]  ;;  %v7890_v17 = vor.u32 %v9295_v8, %v7887_v32  ;;  %4939 = vmatpush.bf16.msrb.mxu0 %v7634_v12  ;;  %v9012_v8 = vld [vmem:[#allocation8 + $0x1b4] sm:$0xf0] }
 0x269   :  { %v7087_v16 = vld [vmem:[#allocation8 + $0x470] sm:$0xf0]  ;;  %v6997_v32 = vld [vmem:[#allocation8 + $0x398] sm:$0xf] }
 0x26a   :  { %v9159_v19 = vld [vmem:[#allocation8 + $0x654] sm:$0xf]  ;;  %v7090_v22 = vor.u32 %v9095_v11, %v7087_v16  ;;  %4953 = vmatpush.bf16.msrb.mxu1 %v7890_v17  ;;  %v10095_v11 = vpop.f32.mrf.mxu3 }
 0x26b   :  { %v7343_v47 = vld [vmem:[#allocation8 + $0x670] sm:$0xf0] }
 0x26c   :  { %v9223_v43 = vld [vmem:[#allocation8 + $0x854] sm:$0xf]  ;;  %v7346_v50 = vor.u32 %v9159_v19, %v7343_v47  ;;  %4912 = vmatpush.bf16.msra.mxu2 %v7090_v22  ;;  %v6742_v47 = vor.u32 %v9012_v8, %v6741_v7  ;;  %v6965_v22 = vld [vmem:[#allocation8 + $0x358] sm:$0xf] }
 0x26d   :  { %v7599_v14 = vld [vmem:[#allocation8 + $0x870] sm:$0xf0] }
 0x26e   :  { %v9287_v0 = vld [vmem:[#allocation8 + $0xa54] sm:$0xf]  ;;  %v7602_v33 = vor.u32 %v9223_v43, %v7599_v14  ;;  %4926 = vmatpush.bf16.msra.mxu3 %v7346_v50  ;;  %v6998_v43 = vor.u32 %v9076_v9, %v6997_v32  ;;  %v9068_v50 = vld [vmem:[#allocation8 + $0x374] sm:$0xf0]  ;;  %v10103_v15 = vpop.f32.mrf.mxu2 }
 0x26f   :  { %v7855_v38 = vld [vmem:[#allocation8 + $0xa70] sm:$0xf0] }
 0x270   :  { %v9087_v21 = vld [vmem:[#allocation8 + $0x414] sm:$0xf]  ;;  %v7858_v34 = vor.u32 %v9287_v0, %v7855_v38  ;;  %4940 = vmatpush.bf16.msrb.mxu0 %v7602_v33  ;;  %v6709_v38 = vld [vmem:[#allocation8 + $0x158] sm:$0xf] }
 0x271   :  { %v7055_v56 = vld [vmem:[#allocation8 + $0x430] sm:$0xf0] }
 0x272   :  { %v9151_v28 = vld [vmem:[#allocation8 + $0x614] sm:$0xf]  ;;  %v7058_v31 = vor.u32 %v9087_v21, %v7055_v56  ;;  %4954 = vmatpush.bf16.msrb.mxu1 %v7858_v34  ;;  %v9004_v21 = vld [vmem:[#allocation8 + $0x174] sm:$0xf0]  ;;  %v10099_v56 = vpop.f32.mrf.mxu1 }
 0x273   :  { %v7311_v29 = vld [vmem:[#allocation8 + $0x630] sm:$0xf0] }
 0x274   :  { %v9215_v48 = vld [vmem:[#allocation8 + $0x814] sm:$0xf]  ;;  %v7314_v46 = vor.u32 %v9151_v28, %v7311_v29  ;;  %4913 = vmatpush.bf16.msra.mxu2 %v7058_v31  ;;  %v10105_v31 = vpop.f32.mrf.mxu3 }
 0x275   :  { %v7567_v35 = vld [vmem:[#allocation8 + $0x830] sm:$0xf0] }
 0x276   :  { %v9279_v37 = vld [vmem:[#allocation8 + $0xa14] sm:$0xf]  ;;  %v7570_v1 = vor.u32 %v9215_v48, %v7567_v35  ;;  %4927 = vmatpush.bf16.msra.mxu3 %v7314_v46  ;;  %v6710_v48 = vor.u32 %v9004_v21, %v6709_v38  ;;  %v6966_v35 = vor.u32 %v9068_v50, %v6965_v22  ;;  %v10107_v46 = vpop.f32.mrf.mxu0  ;;  %v10111_v38 = vld [vmem:[#allocation10] sm:$0xff] }
 0x277   :  { %v7823_v39 = vld [vmem:[#allocation8 + $0xa30] sm:$0xf0]  ;;  %4914 = vmatmul.bf16.vlgmr.msra.gmra.mxu2 %v9958_v58  ;;  %v1704_v21 = vperm.slane %v10111_v38, 2 }
 0x278   :  { %v9399_v13 = vld [vmem:[#allocation8 + $0xdd4] sm:$0xf]  ;;  %v7826_v55 = vor.u32 %v9279_v37, %v7823_v39  ;;  %4941 = vmatpush.bf16.msrb.mxu0 %v7570_v1 }
 0x279   :  { %v8303_v42 = vld [vmem:[#allocation8 + $0xdf0] sm:$0xf0]  ;;  %4928 = vmatmul.bf16.vlgmr.msra.gmra.mxu3 %v9960_v61 }
 0x27a   :  { %v9463_v44 = vld [vmem:[#allocation8 + $0xfd4] sm:$0xf]  ;;  %v8306_v36 = vor.u32 %v9399_v13, %v8303_v42  ;;  %4955 = vmatpush.bf16.msrb.mxu1 %v7826_v55  ;;  %v6677_v13 = vld [vmem:[#allocation8 + $0x118] sm:$0xf]  ;;  %v10109_v9 = vpop.f32.mrf.mxu1 }
 0x27b   :  { %v8559_v30 = vld [vmem:[#allocation8 + $0xff0] sm:$0xf0]  ;;  %4942 = vmatmul.bf16.vlgmr.msrb.gmra.mxu0 %v9966_v25  ;;  %v8996_v42 = vld [vmem:[#allocation8 + $0x134] sm:$0xf0] }
 0x27c   :  { %v8562_v2 = vor.u32 %v9463_v44, %v8559_v30  ;;  %v9391_v3 = vld [vmem:[#allocation8 + $0xd94] sm:$0xf]  ;;  %4962 = vmatpush.bf16.msrb.mxu2 %v8306_v36  ;;  %4990 = vmatpush.bf16.msra.mxu0 %v6774_v26  ;;  %v6933_v44 = vld [vmem:[#allocation8 + $0x318] sm:$0xf]  ;;  %v6678_v55 = vor.u32 %v8996_v42, %v6677_v13 }
 0x27d   :  { %v8271_v23 = vld [vmem:[#allocation8 + $0xdb0] sm:$0xf0]  ;;  %4956 = vmatmul.bf16.vlgmr.msrb.gmra.mxu1 %v9968_v27  ;;  %v9060_v30 = vld [vmem:[#allocation8 + $0x334] sm:$0xf0] }
 0x27e   :  { %v9455_v4 = vld [vmem:[#allocation8 + $0xf94] sm:$0xf]  ;;  %4976 = vmatpush.bf16.msrb.mxu3 %v8562_v2  ;;  %v8274_v16 = vor.u32 %v9391_v3, %v8271_v23  ;;  %5004 = vmatpush.bf16.msra.mxu1 %v7030_v40  ;;  %v6934_v36 = vor.u32 %v9060_v30, %v6933_v44  ;;  %v6645_v23 = vld [vmem:[#allocation8 + $0xd8] sm:$0xf]  ;;  %v4663_v22 = vpop.f32.mrf.mxu0 }
 0x27f   :  { %v8527_v6 = vld [vmem:[#allocation8 + $0xfb0] sm:$0xf0]  ;;  %v8988_v26 = vld [vmem:[#allocation8 + $0xf4] sm:$0xf0] }
 0x280   :  { %v8530_v12 = vor.u32 %v9455_v4, %v8527_v6  ;;  %v9383_v17 = vld [vmem:[#allocation8 + $0xd54] sm:$0xf]  ;;  %4963 = vmatpush.bf16.msrb.mxu2 %v8274_v16  ;;  %4991 = vmatpush.bf16.msra.mxu0 %v6742_v47  ;;  %v6901_v40 = vld [vmem:[#allocation8 + $0x2d8] sm:$0xf]  ;;  %v6646_v16 = vor.u32 %v8988_v26, %v6645_v23 }
 0x281   :  { %v8239_v19 = vld [vmem:[#allocation8 + $0xd70] sm:$0xf0]  ;;  %v9052_v4 = vld [vmem:[#allocation8 + $0x2f4] sm:$0xf0] }
 0x282   :  { %v9447_v14 = vld [vmem:[#allocation8 + $0xf54] sm:$0xf]  ;;  %4977 = vmatpush.bf16.msrb.mxu3 %v8530_v12  ;;  %v8242_v28 = vor.u32 %v9383_v17, %v8239_v19  ;;  %5005 = vmatpush.bf16.msra.mxu1 %v6998_v43  ;;  %v6902_v12 = vor.u32 %v9052_v4, %v6901_v40  ;;  %v6613_v47 = vld [vmem:[#allocation8 + $0x98] sm:$0xf]  ;;  %v4677_v26 = vpop.f32.mrf.mxu1 }
 0x283   :  { %v8495_v0 = vld [vmem:[#allocation8 + $0xf70] sm:$0xf0]  ;;  %v8980_v43 = vld [vmem:[#allocation8 + $0xb4] sm:$0xf0] }
 0x284   :  { %v8498_v29 = vor.u32 %v9447_v14, %v8495_v0  ;;  %v9375_v33 = vld [vmem:[#allocation8 + $0xd14] sm:$0xf]  ;;  %4964 = vmatpush.bf16.msrb.mxu2 %v8242_v28  ;;  %4992 = vmatpush.bf16.msra.mxu0 %v6710_v48  ;;  %v6869_v14 = vld [vmem:[#allocation8 + $0x298] sm:$0xf]  ;;  %v10116_v48 = vpop.f32.mrf.mxu3 }
 0x285   :  { %v8207_v34 = vld [vmem:[#allocation8 + $0xd30] sm:$0xf0]  ;;  %v9044_v0 = vld [vmem:[#allocation8 + $0x2b4] sm:$0xf0] }
 0x286   :  { %v9439_v37 = vld [vmem:[#allocation8 + $0xf14] sm:$0xf]  ;;  %4978 = vmatpush.bf16.msrb.mxu3 %v8498_v29  ;;  %v8210_v5 = vor.u32 %v9375_v33, %v8207_v34  ;;  %5006 = vmatpush.bf16.msra.mxu1 %v6966_v35  ;;  %v10114_v34 = vpop.f32.mrf.mxu2  ;;  %v6614_v35 = vor.u32 %v8980_v43, %v6613_v47  ;;  %v6581_v42 = vld [vmem:[#allocation8 + $0x58] sm:$0xf] }
 0x287   :  { %v8463_v39 = vld [vmem:[#allocation8 + $0xf30] sm:$0xf0]  ;;  %v8972_v44 = vld [vmem:[#allocation8 + $0x74] sm:$0xf0] }
 0x288   :  { %v8466_v45 = vor.u32 %v9439_v37, %v8463_v39  ;;  %v9367_v54 = vld [vmem:[#allocation8 + $0xcd4] sm:$0xf]  ;;  %4965 = vmatpush.bf16.msrb.mxu2 %v8210_v5  ;;  %4993 = vmatpush.bf16.msra.mxu0 %v6678_v55  ;;  %v6870_v37 = vor.u32 %v9044_v0, %v6869_v14  ;;  %v6837_v30 = vld [vmem:[#allocation8 + $0x258] sm:$0xf]  ;;  %v6582_v40 = vor.u32 %v8972_v44, %v6581_v42 }
 0x289   :  { %v8175_v1 = vld [vmem:[#allocation8 + $0xcf0] sm:$0xf0]  ;;  %v9036_v5 = vld [vmem:[#allocation8 + $0x274] sm:$0xf0] }
 0x28a   :  { %v9431_v2 = vld [vmem:[#allocation8 + $0xed4] sm:$0xf]  ;;  %4979 = vmatpush.bf16.msrb.mxu3 %v8466_v45  ;;  %v8178_v6 = vor.u32 %v9367_v54, %v8175_v1  ;;  %5007 = vmatpush.bf16.msra.mxu1 %v6934_v36  ;;  %v4552_v45 = vadd.f32 %v10079_v57, %v1704_v21  ;;  %v1705_v54 = vperm.slane %v10111_v38, 3  ;;  %v6838_v4 = vor.u32 %v9036_v5, %v6837_v30  ;;  %v7285_v57 = vld [vmem:[#allocation8 + $0x5d8] sm:$0xf] }
 0x28b   :  { %v8431_v3 = vld [vmem:[#allocation8 + $0xef0] sm:$0xf0]  ;;  %v7797_v47 = vld [vmem:[#allocation8 + $0x9d8] sm:$0xf]  ;;  %v4554_v5 = vadd.f32 %v10087_v41, %v1704_v21 }
 0x28c   :  { %v8434_v7 = vor.u32 %v9431_v2, %v8431_v3  ;;  %v9359_v8 = vld [vmem:[#allocation8 + $0xc94] sm:$0xf]  ;;  %4966 = vmatpush.bf16.msrb.mxu2 %v8178_v6  ;;  %4994 = vmatpush.bf16.msra.mxu0 %v6646_v16  ;;  %v6549_v6 = vld [vmem:[#allocation8 + $0x18] sm:$0xf]  ;;  %v4664_v43 = vadd.f32 %v4663_v22, %v1705_v54 }
 0x28d   :  { %v8143_v32 = vld [vmem:[#allocation8 + $0xcb0] sm:$0xf0]  ;;  %v9148_v16 = vld [vmem:[#allocation8 + $0x5f4] sm:$0xf0] }
 0x28e   :  { %v9423_v17 = vld [vmem:[#allocation8 + $0xe94] sm:$0xf]  ;;  %4980 = vmatpush.bf16.msrb.mxu3 %v8434_v7  ;;  %v8146_v50 = vor.u32 %v9359_v8, %v8143_v32  ;;  %5008 = vmatpush.bf16.msra.mxu1 %v6902_v12  ;;  %v8964_v7 = vld [vmem:[#allocation8 + $0x34] sm:$0xf0]  ;;  %v4566_v12 = vadd.f32 %v10081_v49, %v4552_v45  ;;  %v7286_v42 = vor.u32 %v9148_v16, %v7285_v57  ;;  %v4679_v57 = vpop.f32.mrf.mxu1 }
 0x28f   :  { %v8399_v19 = vld [vmem:[#allocation8 + $0xeb0] sm:$0xf0]  ;;  %v6805_v8 = vld [vmem:[#allocation8 + $0x218] sm:$0xf]  ;;  %v6550_v49 = vor.u32 %v8964_v7, %v6549_v6 }
 0x290   :  { %v8402_v28 = vor.u32 %v9423_v17, %v8399_v19  ;;  %v9351_v29 = vld [vmem:[#allocation8 + $0xc54] sm:$0xf]  ;;  %4967 = vmatpush.bf16.msrb.mxu2 %v8146_v50  ;;  %4995 = vmatpush.bf16.msra.mxu0 %v6614_v35  ;;  %v9028_v32 = vld [vmem:[#allocation8 + $0x234] sm:$0xf0]  ;;  %v4691_v35 = vpop.f32.mrf.mxu2 }
 0x291   :  { %v8111_v33 = vld [vmem:[#allocation8 + $0xc70] sm:$0xf0]  ;;  %v7541_v17 = vld [vmem:[#allocation8 + $0x7d8] sm:$0xf] }
 0x292   :  { %v9415_v39 = vld [vmem:[#allocation8 + $0xe54] sm:$0xf]  ;;  %4981 = vmatpush.bf16.msrb.mxu3 %v8402_v28  ;;  %v8114_v55 = vor.u32 %v9351_v29, %v8111_v33  ;;  %5009 = vmatpush.bf16.msra.mxu1 %v6870_v37  ;;  %v9212_v19 = vld [vmem:[#allocation8 + $0x7f4] sm:$0xf0]  ;;  %v4580_v33 = vadd.f32 %v10083_v18, %v4566_v12  ;;  %v4705_v37 = vpop.f32.mrf.mxu3 }
 0x293   :  { %v8367_v13 = vld [vmem:[#allocation8 + $0xe70] sm:$0xf0]  ;;  %v9276_v50 = vld [vmem:[#allocation8 + $0x9f4] sm:$0xf0]  ;;  %v7542_v44 = vor.u32 %v9212_v19, %v7541_v17 }
 0x294   :  { %v9343_v1 = vld [vmem:[#allocation8 + $0xc14] sm:$0xf]  ;;  %v8370_v36 = vor.u32 %v9415_v39, %v8367_v13  ;;  %4968 = vmatpush.bf16.msrb.mxu2 %v8114_v55  ;;  %v8053_v28 = vld [vmem:[#allocation8 + $0xbd8] sm:$0xf]  ;;  %4996 = vmatpush.bf16.msra.mxu0 %v6582_v40  ;;  %v6806_v39 = vor.u32 %v9028_v32, %v6805_v8  ;;  %v4665_v13 = vpop.f32.mrf.mxu0  ;;  %v7798_v45 = vor.u32 %v9276_v50, %v7797_v47 }
 0x295   :  { %v8079_v2 = vld [vmem:[#allocation8 + $0xc30] sm:$0xf0]  ;;  %v9340_v29 = vld [vmem:[#allocation8 + $0xbf4] sm:$0xf0]  ;;  %v4568_v32 = vadd.f32 %v10089_v62, %v4554_v5 }
 0x296   :  { %v9407_v3 = vld [vmem:[#allocation8 + $0xe14] sm:$0xf]  ;;  %4982 = vmatpush.bf16.msrb.mxu3 %v8370_v36  ;;  %v8082_v14 = vor.u32 %v9343_v1, %v8079_v2  ;;  %5010 = vmatpush.bf16.msra.mxu1 %v6838_v4  ;;  %v7253_v30 = vld [vmem:[#allocation8 + $0x598] sm:$0xf]  ;;  %v8054_v1 = vor.u32 %v9340_v29, %v8053_v28  ;;  %v4678_v2 = vadd.f32 %v4677_v26, %v4664_v43 }
 0x297   :  { %v8335_v23 = vld [vmem:[#allocation8 + $0xe30] sm:$0xf0]  ;;  %v9140_v22 = vld [vmem:[#allocation8 + $0x5b4] sm:$0xf0]  ;;  %v4594_v4 = vadd.f32 %v10085_v20, %v4580_v33  ;;  %v4666_v20 = vadd.f32 %v4665_v13, %v1705_v54 }
 0x298   :  { %v8338_v0 = vor.u32 %v9407_v3, %v8335_v23  ;;  %v7509_v55 = vld [vmem:[#allocation8 + $0x798] sm:$0xf]  ;;  %4969 = vmatpush.bf16.msrb.mxu2 %v8082_v14  ;;  %4997 = vmatpush.bf16.msra.mxu0 %v6550_v49  ;;  %v4692_v6 = vadd.f32 %v4691_v35, %v4678_v2  ;;  %v7254_v7 = vor.u32 %v9140_v22, %v7253_v30  ;;  %v4693_v35 = vpop.f32.mrf.mxu2 }
 0x299   :  { %v9204_v36 = vld [vmem:[#allocation8 + $0x7b4] sm:$0xf0]  ;;  %v4608_v62 = vadd.f32 %v10091_v24, %v4594_v4 }
 0x29a   :  { %v7765_v18 = vld [vmem:[#allocation8 + $0x998] sm:$0xf]  ;;  %4983 = vmatpush.bf16.msrb.mxu3 %v8338_v0  ;;  %5011 = vmatpush.bf16.msra.mxu1 %v6806_v39  ;;  %v7510_v41 = vor.u32 %v9204_v36, %v7509_v55  ;;  %v4582_v0 = vadd.f32 %v10093_v10, %v4568_v32  ;;  %v4706_v28 = vadd.f32 %v4705_v37, %v4692_v6  ;;  %v4707_v49 = vpop.f32.mrf.mxu3 }
 0x29b   :  { %v9268_v3 = vld [vmem:[#allocation8 + $0x9b4] sm:$0xf0]  ;;  %4970 = vmatmul.bf16.vlgmr.msrb.gmra.mxu2 %v9976_v51  ;;  %4998 = vmatmul.bf16.vlgmr.msra.gmra.mxu0 %v9938_v59 }
 0x29c   :  { %v8021_v23 = vld [vmem:[#allocation8 + $0xb98] sm:$0xf]  ;;  %5018 = vmatpush.bf16.msra.mxu2 %v7286_v42  ;;  %5046 = vmatpush.bf16.msrb.mxu0 %v7798_v45  ;;  %v7766_v26 = vor.u32 %v9268_v3, %v7765_v18  ;;  %v4719_v50 = vpop.f32.mrf.mxu0  ;;  %v4596_v37 = vadd.f32 %v10095_v11, %v4582_v0  ;;  %v4622_v45 = vadd.f32 %v10099_v56, %v4608_v62 }
 0x29d   :  { %v9332_v40 = vld [vmem:[#allocation8 + $0xbb4] sm:$0xf0]  ;;  %4984 = vmatmul.bf16.vlgmr.msrb.gmra.mxu3 %v9978_v53  ;;  %5012 = vmatmul.bf16.vlgmr.msra.gmra.mxu1 %v9940_v60  ;;  %v4720_v55 = vadd.f32 %v4719_v50, %v4706_v28 }
 0x29e   :  { %5032 = vmatpush.bf16.msra.mxu3 %v7542_v44  ;;  %v7221_v21 = vld [vmem:[#allocation8 + $0x558] sm:$0xf]  ;;  %5060 = vmatpush.bf16.msrb.mxu1 %v8054_v1  ;;  %v8022_v16 = vor.u32 %v9332_v40, %v8021_v23  ;;  %v4680_v44 = vadd.f32 %v4679_v57, %v4666_v20  ;;  %v4733_v23 = vpop.f32.mrf.mxu1  ;;  %v4636_v11 = vadd.f32 %v10103_v15, %v4622_v45 }
 0x29f   :  { %v9132_v8 = vld [vmem:[#allocation8 + $0x574] sm:$0xf0]  ;;  %v4610_v32 = vadd.f32 %v10107_v46, %v4596_v37 }
 0x2a0   :  { %v7477_v12 = vld [vmem:[#allocation8 + $0x758] sm:$0xf]  ;;  %5019 = vmatpush.bf16.msra.mxu2 %v7254_v7  ;;  %v7222_v38 = vor.u32 %v9132_v8, %v7221_v21  ;;  %5047 = vmatpush.bf16.msrb.mxu0 %v7766_v26  ;;  %v4694_v36 = vadd.f32 %v4693_v35, %v4680_v44  ;;  %v4650_v50 = vadd.f32 %v10105_v31, %v4636_v11 }
 0x2a1   :  { %v9196_v17 = vld [vmem:[#allocation8 + $0x774] sm:$0xf0] }
 0x2a2   :  { %v7733_v19 = vld [vmem:[#allocation8 + $0x958] sm:$0xf]  ;;  %5033 = vmatpush.bf16.msra.mxu3 %v7510_v41  ;;  %v7478_v54 = vor.u32 %v9196_v17, %v7477_v12  ;;  %5061 = vmatpush.bf16.msrb.mxu1 %v8022_v16  ;;  %v4708_v26 = vadd.f32 %v4707_v49, %v4694_v36  ;;  %v4734_v12 = vadd.f32 %v4733_v23, %v4720_v55  ;;  %v5216_v37 = vmax.f32 %v4650_v50, 0.0  ;;  %v7031_v50 = vld [vmem:[#allocation8 + $0x3f8] sm:$0xf0] }
 0x2a3   :  { %v9260_v47 = vld [vmem:[#allocation8 + $0x974] sm:$0xf0] }
 0x2a4   :  { %v7989_v43 = vld [vmem:[#allocation8 + $0xb58] sm:$0xf]  ;;  %v7734_v39 = vor.u32 %v9260_v47, %v7733_v19  ;;  %5020 = vmatpush.bf16.msra.mxu2 %v7222_v38 }
 0x2a5   :  { %v9324_v14 = vld [vmem:[#allocation8 + $0xb74] sm:$0xf0] }
 0x2a6   :  { %v7189_v29 = vld [vmem:[#allocation8 + $0x518] sm:$0xf]  ;;  %v7990_v24 = vor.u32 %v9324_v14, %v7989_v43  ;;  %5034 = vmatpush.bf16.msra.mxu3 %v7478_v54  ;;  %5048 = vmatpush.bf16.msrb.mxu0 %v7734_v39  ;;  %v4747_v43 = vpop.f32.mrf.mxu2  ;;  %v4761_v14 = vpop.f32.mrf.mxu3 }
 0x2a7   :  { %v9124_v33 = vld [vmem:[#allocation8 + $0x534] sm:$0xf0]  ;;  %v4748_v46 = vadd.f32 %v4747_v43, %v4734_v12  ;;  %v4735_v36 = vpop.f32.mrf.mxu1 }
 0x2a8   :  { %v7445_v13 = vld [vmem:[#allocation8 + $0x718] sm:$0xf]  ;;  %v7190_v1 = vor.u32 %v9124_v33, %v7189_v29  ;;  %5062 = vmatpush.bf16.msrb.mxu1 %v7990_v24  ;;  %v4624_v29 = vadd.f32 %v10109_v9, %v4610_v32  ;;  %v4721_v33 = vpop.f32.mrf.mxu0 }
 0x2a9   :  { %v9188_v10 = vld [vmem:[#allocation8 + $0x734] sm:$0xf0]  ;;  %v4722_v49 = vadd.f32 %v4721_v33, %v4708_v26  ;;  %v4762_v39 = vadd.f32 %v4761_v14, %v4748_v46 }
 0x2aa   :  { %v7701_v42 = vld [vmem:[#allocation8 + $0x918] sm:$0xf]  ;;  %v7446_v18 = vor.u32 %v9188_v10, %v7445_v13  ;;  %5021 = vmatpush.bf16.msra.mxu2 %v7190_v1  ;;  %v4638_v9 = vadd.f32 %v10114_v34, %v4624_v29 }
 0x2ab   :  { %v9252_v30 = vld [vmem:[#allocation8 + $0x934] sm:$0xf0]  ;;  %v5217_v45 = vmax.f32 %v4762_v39, 0.0 }
 0x2ac   :  { %v7957_v22 = vld [vmem:[#allocation8 + $0xb18] sm:$0xf]  ;;  %v7702_v40 = vor.u32 %v9252_v30, %v7701_v42  ;;  %5035 = vmatpush.bf16.msra.mxu3 %v7446_v18 }
 0x2ad   :  { %v9316_v5 = vld [vmem:[#allocation8 + $0xb34] sm:$0xf0]  ;;  %v10146_v23 = vpack.c.bf16 %v5217_v45, %v5216_v37 }
 0x2ae   :  { %v7157_v2 = vld [vmem:[#allocation8 + $0x4d8] sm:$0xf]  ;;  %v7958_v4 = vor.u32 %v9316_v5, %v7957_v22  ;;  %5049 = vmatpush.bf16.msrb.mxu0 %v7702_v40 }
 0x2af   :  { %v9116_v3 = vld [vmem:[#allocation8 + $0x4f4] sm:$0xf0]  ;;  %5239 = vst [vmem:[#allocation15 + $0x8] sm:$0xff] %v10146_v23  ;;  %v5388_v37 = vunpack.c.l.b16 %v10146_v23 }
 0x2b0   :  { %v7413_v6 = vld [vmem:[#allocation8 + $0x6d8] sm:$0xf]  ;;  %v7158_v57 = vor.u32 %v9116_v3, %v7157_v2  ;;  %5063 = vmatpush.bf16.msrb.mxu1 %v7958_v4  ;;  %v4736_v4 = vadd.f32 %v4735_v36, %v4722_v49 }
 0x2b1   :  { %v9180_v7 = vld [vmem:[#allocation8 + $0x6f4] sm:$0xf0] }
 0x2b2   :  { %v7669_v41 = vld [vmem:[#allocation8 + $0x8d8] sm:$0xf]  ;;  %v7414_v16 = vor.u32 %v9180_v7, %v7413_v6  ;;  %5022 = vmatpush.bf16.msra.mxu2 %v7158_v57  ;;  %v4652_v57 = vadd.f32 %v10116_v48, %v4638_v9  ;;  %v5389_v9 = vunpack.c.h.b16 %v10146_v23  ;;  %v6711_v23 = vld [vmem:[#allocation8 + $0x178] sm:$0xf0] }
 0x2b3   :  { %v9244_v21 = vld [vmem:[#allocation8 + $0x8f4] sm:$0xf0] }
 0x2b4   :  { %v7925_v56 = vld [vmem:[#allocation8 + $0xad8] sm:$0xf]  ;;  %v7670_v20 = vor.u32 %v9244_v21, %v7669_v41  ;;  %5036 = vmatpush.bf16.msra.mxu3 %v7414_v16  ;;  %v4749_v21 = vpop.f32.mrf.mxu2 }
 0x2b5   :  { %v9308_v8 = vld [vmem:[#allocation8 + $0xaf4] sm:$0xf0]  ;;  %v4750_v26 = vadd.f32 %v4749_v21, %v4736_v4  ;;  %v9000_v4 = vld [vmem:[#allocation8 + $0x15c] sm:$0xf] }
 0x2b6   :  { %v7125_v17 = vld [vmem:[#allocation8 + $0x498] sm:$0xf]  ;;  %v7926_v47 = vor.u32 %v9308_v8, %v7925_v56  ;;  %5050 = vmatpush.bf16.msrb.mxu0 %v7670_v20 }
 0x2b7   :  { %v9108_v19 = vld [vmem:[#allocation8 + $0x4b4] sm:$0xf0] }
 0x2b8   :  { %v7381_v15 = vld [vmem:[#allocation8 + $0x698] sm:$0xf]  ;;  %v7126_v35 = vor.u32 %v9108_v19, %v7125_v17  ;;  %5064 = vmatpush.bf16.msrb.mxu1 %v7926_v47  ;;  %v4763_v17 = vpop.f32.mrf.mxu3  ;;  %v9016_v47 = vld [vmem:[#allocation8 + $0x1dc] sm:$0xf] }
 0x2b9   :  { %v9172_v62 = vld [vmem:[#allocation8 + $0x6b4] sm:$0xf0]  ;;  %v4764_v43 = vadd.f32 %v4763_v17, %v4750_v26  ;;  %v6679_v17 = vld [vmem:[#allocation8 + $0x138] sm:$0xf0] }
 0x2ba   :  { %v7637_v0 = vld [vmem:[#allocation8 + $0x898] sm:$0xf]  ;;  %v7382_v24 = vor.u32 %v9172_v62, %v7381_v15  ;;  %5023 = vmatpush.bf16.msra.mxu2 %v7126_v35  ;;  %v6775_v62 = vld [vmem:[#allocation8 + $0x1f8] sm:$0xf0] }
 0x2bb   :  { %v9236_v28 = vld [vmem:[#allocation8 + $0x8b4] sm:$0xf0]  ;;  %v5225_v29 = vmax.f32 %v4764_v43, 0.0 }
 0x2bc   :  { %v7893_v38 = vld [vmem:[#allocation8 + $0xa98] sm:$0xf]  ;;  %v7638_v44 = vor.u32 %v9236_v28, %v7637_v0  ;;  %5037 = vmatpush.bf16.msra.mxu3 %v7382_v24  ;;  %v9080_v0 = vld [vmem:[#allocation8 + $0x3dc] sm:$0xf]  ;;  %v6778_v24 = vor.u32 %v9016_v47, %v6775_v62 }
 0x2bd   :  { %v9300_v54 = vld [vmem:[#allocation8 + $0xab4] sm:$0xf0] }
 0x2be   :  { %v7093_v13 = vld [vmem:[#allocation8 + $0x458] sm:$0xf]  ;;  %v7894_v31 = vor.u32 %v9300_v54, %v7893_v38  ;;  %5051 = vmatpush.bf16.msrb.mxu0 %v7638_v44  ;;  %v5224_v54 = vmax.f32 %v4652_v57, 0.0  ;;  %v6743_v44 = vld [vmem:[#allocation8 + $0x1b8] sm:$0xf0] }
 0x2bf   :  { %v9100_v10 = vld [vmem:[#allocation8 + $0x474] sm:$0xf0] }
 0x2c0   :  { %v7349_v42 = vld [vmem:[#allocation8 + $0x658] sm:$0xf]  ;;  %v7094_v18 = vor.u32 %v9100_v10, %v7093_v13  ;;  %5065 = vmatpush.bf16.msrb.mxu1 %v7894_v31  ;;  %v7034_v13 = vor.u32 %v9080_v0, %v7031_v50  ;;  %v9008_v10 = vld [vmem:[#allocation8 + $0x19c] sm:$0xf] }
 0x2c1   :  { %v9164_v30 = vld [vmem:[#allocation8 + $0x674] sm:$0xf0]  ;;  %v9072_v31 = vld [vmem:[#allocation8 + $0x39c] sm:$0xf] }
 0x2c2   :  { %v7605_v22 = vld [vmem:[#allocation8 + $0x858] sm:$0xf]  ;;  %v7350_v40 = vor.u32 %v9164_v30, %v7349_v42  ;;  %5024 = vmatpush.bf16.msra.mxu2 %v7094_v18  ;;  %v5235_v42 = vpack.c.bf16 %v5225_v29, %v5224_v54  ;;  %v6999_v30 = vld [vmem:[#allocation8 + $0x3b8] sm:$0xf0]  ;;  %v6746_v18 = vor.u32 %v9008_v10, %v6743_v44 }
 0x2c3   :  { %v9228_v5 = vld [vmem:[#allocation8 + $0x874] sm:$0xf0]  ;;  %v6903_v54 = vld [vmem:[#allocation8 + $0x2f8] sm:$0xf0] }
 0x2c4   :  { %v7861_v1 = vld [vmem:[#allocation8 + $0xa58] sm:$0xf]  ;;  %v7606_v11 = vor.u32 %v9228_v5, %v7605_v22  ;;  %5038 = vmatpush.bf16.msra.mxu3 %v7350_v40  ;;  %5243 = vst [vmem:[#allocation15 + $0x28] sm:$0xff] %v5235_v42  ;;  %v5396_v45 = vunpack.c.l.b16 %v5235_v42  ;;  %v6615_v44 = vld [vmem:[#allocation8 + $0xb8] sm:$0xf0] }
 0x2c5   :  { %v9292_v55 = vld [vmem:[#allocation8 + $0xa74] sm:$0xf0] }
 0x2c6   :  { %v7061_v2 = vld [vmem:[#allocation8 + $0x418] sm:$0xf]  ;;  %v7862_v34 = vor.u32 %v9292_v55, %v7861_v1  ;;  %5052 = vmatpush.bf16.msrb.mxu0 %v7606_v11  ;;  %v5397_v1 = vunpack.c.h.b16 %v5235_v42  ;;  %v6967_v11 = vld [vmem:[#allocation8 + $0x378] sm:$0xf0] }
 0x2c7   :  { %v9092_v3 = vld [vmem:[#allocation8 + $0x434] sm:$0xf0]  ;;  %v8976_v42 = vld [vmem:[#allocation8 + $0x9c] sm:$0xf] }
 0x2c8   :  { %v7317_v6 = vld [vmem:[#allocation8 + $0x618] sm:$0xf]  ;;  %v7062_v14 = vor.u32 %v9092_v3, %v7061_v2  ;;  %5066 = vmatpush.bf16.msrb.mxu1 %v7862_v34  ;;  %v7002_v2 = vor.u32 %v9072_v31, %v6999_v30  ;;  %v9040_v31 = vld [vmem:[#allocation8 + $0x29c] sm:$0xf] }
 0x2c9   :  { %v9156_v7 = vld [vmem:[#allocation8 + $0x634] sm:$0xf0]  ;;  %v6871_v30 = vld [vmem:[#allocation8 + $0x2b8] sm:$0xf0] }
 0x2ca   :  { %v7573_v41 = vld [vmem:[#allocation8 + $0x818] sm:$0xf]  ;;  %v7318_v15 = vor.u32 %v9156_v7, %v7317_v6  ;;  %5025 = vmatpush.bf16.msra.mxu2 %v7062_v14  ;;  %v10152_v6 = vpack.c.b16 %v5396_v45, %v5388_v37  ;;  %v10154_v7 = vpack.c.b16 %v5397_v1, %v5389_v9  ;;  %v6618_v45 = vor.u32 %v8976_v42, %v6615_v44 }
 0x2cb   :  { %v9220_v56 = vld [vmem:[#allocation8 + $0x834] sm:$0xf0]  ;;  %v6874_v1 = vor.u32 %v9040_v31, %v6871_v30  ;;  %v9128_v31 = vld [vmem:[#allocation8 + $0x55c] sm:$0xf] }
 0x2cc   :  { %v7829_v8 = vld [vmem:[#allocation8 + $0xa18] sm:$0xf]  ;;  %v7574_v48 = vor.u32 %v9220_v56, %v7573_v41  ;;  %5039 = vmatpush.bf16.msra.mxu3 %v7318_v15  ;;  %v9064_v41 = vld [vmem:[#allocation8 + $0x35c] sm:$0xf] }
 0x2cd   :  { %v9284_v32 = vld [vmem:[#allocation8 + $0xa34] sm:$0xf0]  ;;  %5026 = vmatmul.bf16.vlgmr.msra.gmra.mxu2 %v9958_v58  ;;  %v6970_v57 = vor.u32 %v9064_v41, %v6967_v11  ;;  %v7223_v30 = vld [vmem:[#allocation8 + $0x578] sm:$0xf0] }
 0x2ce   :  { %v8309_v16 = vld [vmem:[#allocation8 + $0xdd8] sm:$0xf]  ;;  %v7830_v46 = vor.u32 %v9284_v32, %v7829_v8  ;;  %5053 = vmatpush.bf16.msrb.mxu0 %v7574_v48  ;;  %v6714_v32 = vor.u32 %v9000_v4, %v6711_v23 }
 0x2cf   :  { %v9404_v12 = vld [vmem:[#allocation8 + $0xdf4] sm:$0xf0]  ;;  %5040 = vmatmul.bf16.vlgmr.msra.gmra.mxu3 %v9960_v61 }
 0x2d0   :  { %v8565_v19 = vld [vmem:[#allocation8 + $0xfd8] sm:$0xf]  ;;  %v8310_v33 = vor.u32 %v9404_v12, %v8309_v16  ;;  %5067 = vmatpush.bf16.msrb.mxu1 %v7830_v46  ;;  %v8992_v12 = vld [vmem:[#allocation8 + $0x11c] sm:$0xf] }
 0x2d1   :  { %v9468_v20 = vld [vmem:[#allocation8 + $0xff4] sm:$0xf0]  ;;  %5054 = vmatmul.bf16.vlgmr.msrb.gmra.mxu0 %v9966_v25  ;;  %v6682_v62 = vor.u32 %v8992_v12, %v6679_v17  ;;  %v8984_v46 = vld [vmem:[#allocation8 + $0xdc] sm:$0xf] }
 0x2d2   :  { %v8277_v28 = vld [vmem:[#allocation8 + $0xd98] sm:$0xf]  ;;  %v8566_v35 = vor.u32 %v9468_v20, %v8565_v19  ;;  %5074 = vmatpush.bf16.msrb.mxu2 %v8310_v33  ;;  %5102 = vmatpush.bf16.msra.mxu0 %v6778_v24  ;;  %v9056_v19 = vld [vmem:[#allocation8 + $0x31c] sm:$0xf] }
 0x2d3   :  { %v9396_v38 = vld [vmem:[#allocation8 + $0xdb4] sm:$0xf0]  ;;  %5068 = vmatmul.bf16.vlgmr.msrb.gmra.mxu1 %v9968_v27  ;;  %v6935_v20 = vld [vmem:[#allocation8 + $0x338] sm:$0xf0] }
 0x2d4   :  { %v8533_v49 = vld [vmem:[#allocation8 + $0xf98] sm:$0xf]  ;;  %v8278_v22 = vor.u32 %v9396_v38, %v8277_v28  ;;  %5088 = vmatpush.bf16.msrb.mxu3 %v8566_v35  ;;  %5116 = vmatpush.bf16.msra.mxu1 %v7034_v13  ;;  %v6938_v0 = vor.u32 %v9056_v19, %v6935_v20  ;;  %v6647_v28 = vld [vmem:[#allocation8 + $0xf8] sm:$0xf0] }
 0x2d5   :  { %v9460_v39 = vld [vmem:[#allocation8 + $0xfb4] sm:$0xf0]  ;;  %v9048_v38 = vld [vmem:[#allocation8 + $0x2dc] sm:$0xf] }
 0x2d6   :  { %v8534_v5 = vor.u32 %v9460_v39, %v8533_v49  ;;  %v8245_v55 = vld [vmem:[#allocation8 + $0xd58] sm:$0xf]  ;;  %5075 = vmatpush.bf16.msrb.mxu2 %v8278_v22  ;;  %5103 = vmatpush.bf16.msra.mxu0 %v6746_v18  ;;  %v6650_v39 = vor.u32 %v8984_v46, %v6647_v28  ;;  %v6906_v24 = vor.u32 %v9048_v38, %v6903_v54  ;;  %v8968_v18 = vld [vmem:[#allocation8 + $0x5c] sm:$0xf] }
 0x2d7   :  { %v9388_v36 = vld [vmem:[#allocation8 + $0xd74] sm:$0xf0]  ;;  %v9144_v12 = vld [vmem:[#allocation8 + $0x5dc] sm:$0xf] }
 0x2d8   :  { %v8501_v3 = vld [vmem:[#allocation8 + $0xf58] sm:$0xf]  ;;  %5089 = vmatpush.bf16.msrb.mxu3 %v8534_v5  ;;  %v8246_v34 = vor.u32 %v9388_v36, %v8245_v55  ;;  %5117 = vmatpush.bf16.msra.mxu1 %v7002_v2  ;;  %v6583_v2 = vld [vmem:[#allocation8 + $0x78] sm:$0xf0] }
 0x2d9   :  { %v9452_v40 = vld [vmem:[#allocation8 + $0xf74] sm:$0xf0]  ;;  %v7287_v17 = vld [vmem:[#allocation8 + $0x5f8] sm:$0xf0] }
 0x2da   :  { %v8502_v21 = vor.u32 %v9452_v40, %v8501_v3  ;;  %v8213_v56 = vld [vmem:[#allocation8 + $0xd18] sm:$0xf]  ;;  %5076 = vmatpush.bf16.msrb.mxu2 %v8246_v34  ;;  %5104 = vmatpush.bf16.msra.mxu0 %v6714_v32  ;;  %v9032_v3 = vld [vmem:[#allocation8 + $0x25c] sm:$0xf]  ;;  %v7290_v46 = vor.u32 %v9144_v12, %v7287_v17 }
 0x2db   :  { %v9380_v8 = vld [vmem:[#allocation8 + $0xd34] sm:$0xf0]  ;;  %v6839_v40 = vld [vmem:[#allocation8 + $0x278] sm:$0xf0] }
 0x2dc   :  { %v8469_v26 = vld [vmem:[#allocation8 + $0xf18] sm:$0xf]  ;;  %5090 = vmatpush.bf16.msrb.mxu3 %v8502_v21  ;;  %v8214_v47 = vor.u32 %v9380_v8, %v8213_v56  ;;  %5118 = vmatpush.bf16.msra.mxu1 %v6970_v57  ;;  %v6586_v56 = vor.u32 %v8968_v18, %v6583_v2  ;;  %v6842_v8 = vor.u32 %v9032_v3, %v6839_v40  ;;  %v8960_v32 = vld [vmem:[#allocation8 + $0x1c] sm:$0xf] }
 0x2dd   :  { %v9444_v16 = vld [vmem:[#allocation8 + $0xf34] sm:$0xf0]  ;;  %v6551_v57 = vld [vmem:[#allocation8 + $0x38] sm:$0xf0]  ;;  %v7226_v18 = vor.u32 %v9128_v31, %v7223_v30 }
 0x2de   :  { %v8470_v43 = vor.u32 %v9444_v16, %v8469_v26  ;;  %v8181_v14 = vld [vmem:[#allocation8 + $0xcd8] sm:$0xf]  ;;  %5077 = vmatpush.bf16.msrb.mxu2 %v8214_v47  ;;  %5105 = vmatpush.bf16.msra.mxu0 %v6682_v62  ;;  %v9024_v26 = vld [vmem:[#allocation8 + $0x21c] sm:$0xf] }
 0x2df   :  { %v9372_v15 = vld [vmem:[#allocation8 + $0xcf4] sm:$0xf0]  ;;  %v6807_v16 = vld [vmem:[#allocation8 + $0x238] sm:$0xf0] }
 0x2e0   :  { %v8437_v50 = vld [vmem:[#allocation8 + $0xed8] sm:$0xf]  ;;  %5091 = vmatpush.bf16.msrb.mxu3 %v8470_v43  ;;  %v8182_v29 = vor.u32 %v9372_v15, %v8181_v14  ;;  %5119 = vmatpush.bf16.msra.mxu1 %v6938_v0  ;;  %v9208_v19 = vld [vmem:[#allocation8 + $0x7dc] sm:$0xf] }
 0x2e1   :  { %v9436_v48 = vld [vmem:[#allocation8 + $0xef4] sm:$0xf0]  ;;  %v7543_v20 = vld [vmem:[#allocation8 + $0x7f8] sm:$0xf0] }
 0x2e2   :  { %v8438_v33 = vor.u32 %v9436_v48, %v8437_v50  ;;  %v8149_v35 = vld [vmem:[#allocation8 + $0xc98] sm:$0xf]  ;;  %5078 = vmatpush.bf16.msrb.mxu2 %v8182_v29  ;;  %5106 = vmatpush.bf16.msra.mxu0 %v6650_v39  ;;  %v9272_v47 = vld [vmem:[#allocation8 + $0x9dc] sm:$0xf]  ;;  %v6554_v50 = vor.u32 %v8960_v32, %v6551_v57  ;;  %v6810_v48 = vor.u32 %v9024_v26, %v6807_v16 }
 0x2e3   :  { %v9364_v49 = vld [vmem:[#allocation8 + $0xcb4] sm:$0xf0]  ;;  %v7799_v15 = vld [vmem:[#allocation8 + $0x9f8] sm:$0xf0]  ;;  %v7546_v28 = vor.u32 %v9208_v19, %v7543_v20  ;;  %v10164_v20 = vpop.f32.mrf.mxu0 }
 0x2e4   :  { %v8405_v13 = vld [vmem:[#allocation8 + $0xe98] sm:$0xf]  ;;  %5092 = vmatpush.bf16.msrb.mxu3 %v8438_v33  ;;  %v8150_v22 = vor.u32 %v9364_v49, %v8149_v35  ;;  %5120 = vmatpush.bf16.msra.mxu1 %v6906_v24  ;;  %v9336_v62 = vld [vmem:[#allocation8 + $0xbdc] sm:$0xf]  ;;  %v7802_v29 = vor.u32 %v9272_v47, %v7799_v15 }
 0x2e5   :  { %v9428_v10 = vld [vmem:[#allocation8 + $0xeb4] sm:$0xf0]  ;;  %v8055_v0 = vld [vmem:[#allocation8 + $0xbf8] sm:$0xf0] }
 0x2e6   :  { %v8406_v5 = vor.u32 %v9428_v10, %v8405_v13  ;;  %v8117_v37 = vld [vmem:[#allocation8 + $0xc58] sm:$0xf]  ;;  %5079 = vmatpush.bf16.msrb.mxu2 %v8150_v22  ;;  %5107 = vmatpush.bf16.msra.mxu0 %v6618_v45  ;;  %v9136_v38 = vld [vmem:[#allocation8 + $0x59c] sm:$0xf]  ;;  %v8058_v33 = vor.u32 %v9336_v62, %v8055_v0 }
 0x2e7   :  { %v9356_v9 = vld [vmem:[#allocation8 + $0xc74] sm:$0xf0]  ;;  %v7255_v54 = vld [vmem:[#allocation8 + $0x5b8] sm:$0xf0] }
 0x2e8   :  { %v8373_v55 = vld [vmem:[#allocation8 + $0xe58] sm:$0xf]  ;;  %5093 = vmatpush.bf16.msrb.mxu3 %v8406_v5  ;;  %v8118_v23 = vor.u32 %v9356_v9, %v8117_v37  ;;  %5121 = vmatpush.bf16.msra.mxu1 %v6874_v1  ;;  %v9200_v35 = vld [vmem:[#allocation8 + $0x79c] sm:$0xf]  ;;  %v7258_v42 = vor.u32 %v9136_v38, %v7255_v54 }
 0x2e9   :  { %v9420_v36 = vld [vmem:[#allocation8 + $0xe74] sm:$0xf0]  ;;  %v7511_v49 = vld [vmem:[#allocation8 + $0x7b8] sm:$0xf0] }
 0x2ea   :  { %v8085_v4 = vld [vmem:[#allocation8 + $0xc18] sm:$0xf]  ;;  %v8374_v41 = vor.u32 %v9420_v36, %v8373_v55  ;;  %5080 = vmatpush.bf16.msrb.mxu2 %v8118_v23  ;;  %5108 = vmatpush.bf16.msra.mxu0 %v6586_v56  ;;  %v9264_v39 = vld [vmem:[#allocation8 + $0x99c] sm:$0xf]  ;;  %v7514_v44 = vor.u32 %v9200_v35, %v7511_v49  ;;  %v10166_v49 = vpop.f32.mrf.mxu1 }
 0x2eb   :  { %v9348_v11 = vld [vmem:[#allocation8 + $0xc34] sm:$0xf0]  ;;  %v7767_v24 = vld [vmem:[#allocation8 + $0x9b8] sm:$0xf0] }
 0x2ec   :  { %v8341_v34 = vld [vmem:[#allocation8 + $0xe18] sm:$0xf]  ;;  %5094 = vmatpush.bf16.msrb.mxu3 %v8374_v41  ;;  %v8086_v43 = vor.u32 %v9348_v11, %v8085_v4  ;;  %5122 = vmatpush.bf16.msra.mxu1 %v6842_v8  ;;  %v9328_v13 = vld [vmem:[#allocation8 + $0xb9c] sm:$0xf]  ;;  %v7770_v22 = vor.u32 %v9264_v39, %v7767_v24 }
 0x2ed   :  { %v9412_v21 = vld [vmem:[#allocation8 + $0xe34] sm:$0xf0]  ;;  %v8023_v10 = vld [vmem:[#allocation8 + $0xbb8] sm:$0xf0] }
 0x2ee   :  { %v8342_v14 = vor.u32 %v9412_v21, %v8341_v34  ;;  %5081 = vmatpush.bf16.msrb.mxu2 %v8086_v43  ;;  %5109 = vmatpush.bf16.msra.mxu0 %v6554_v50  ;;  %v8026_v5 = vor.u32 %v9328_v13, %v8023_v10  ;;  %v9192_v37 = vld [vmem:[#allocation8 + $0x75c] sm:$0xf] }
 0x2ef   :  { %v7479_v9 = vld [vmem:[#allocation8 + $0x778] sm:$0xf0] }
 0x2f0   :  { %5095 = vmatpush.bf16.msrb.mxu3 %v8342_v14  ;;  %5123 = vmatpush.bf16.msra.mxu1 %v6810_v48  ;;  %v9256_v45 = vld [vmem:[#allocation8 + $0x95c] sm:$0xf]  ;;  %v7482_v2 = vor.u32 %v9192_v37, %v7479_v9 }
 0x2f1   :  { %5082 = vmatmul.bf16.vlgmr.msrb.gmra.mxu2 %v9976_v51  ;;  %v7735_v1 = vld [vmem:[#allocation8 + $0x978] sm:$0xf0]  ;;  %5110 = vmatmul.bf16.vlgmr.msra.gmra.mxu0 %v9938_v59 }
 0x2f2   :  { %5130 = vmatpush.bf16.msra.mxu2 %v7290_v46  ;;  %5158 = vmatpush.bf16.msrb.mxu0 %v7802_v29  ;;  %v9320_v55 = vld [vmem:[#allocation8 + $0xb5c] sm:$0xf]  ;;  %v7738_v4 = vor.u32 %v9256_v45, %v7735_v1  ;;  %v10168_v45 = vpop.f32.mrf.mxu2  ;;  %v10170_v1 = vpop.f32.mrf.mxu3 }
 0x2f3   :  { %5096 = vmatmul.bf16.vlgmr.msrb.gmra.mxu3 %v9978_v53  ;;  %v7991_v36 = vld [vmem:[#allocation8 + $0xb78] sm:$0xf0]  ;;  %5124 = vmatmul.bf16.vlgmr.msra.gmra.mxu1 %v9940_v60 }
 0x2f4   :  { %5144 = vmatpush.bf16.msra.mxu3 %v7546_v28  ;;  %5172 = vmatpush.bf16.msrb.mxu1 %v8058_v33  ;;  %v9120_v3 = vld [vmem:[#allocation8 + $0x51c] sm:$0xf]  ;;  %v7994_v23 = vor.u32 %v9320_v55, %v7991_v36  ;;  %v10172_v55 = vpop.f32.mrf.mxu0 }
 0x2f5   :  { %v7191_v40 = vld [vmem:[#allocation8 + $0x538] sm:$0xf0] }
 0x2f6   :  { %5131 = vmatpush.bf16.msra.mxu2 %v7258_v42  ;;  %5159 = vmatpush.bf16.msrb.mxu0 %v7770_v22  ;;  %v9184_v41 = vld [vmem:[#allocation8 + $0x71c] sm:$0xf]  ;;  %v7194_v59 = vor.u32 %v9120_v3, %v7191_v40 }
 0x2f7   :  { %v7447_v11 = vld [vmem:[#allocation8 + $0x738] sm:$0xf0] }
 0x2f8   :  { %5145 = vmatpush.bf16.msra.mxu3 %v7514_v44  ;;  %5173 = vmatpush.bf16.msrb.mxu1 %v8026_v5  ;;  %v9248_v34 = vld [vmem:[#allocation8 + $0x91c] sm:$0xf]  ;;  %v7450_v60 = vor.u32 %v9184_v41, %v7447_v11 }
 0x2f9   :  { %v7703_v21 = vld [vmem:[#allocation8 + $0x938] sm:$0xf0] }
 0x2fa   :  { %v9312_v56 = vld [vmem:[#allocation8 + $0xb1c] sm:$0xf]  ;;  %5132 = vmatpush.bf16.msra.mxu2 %v7226_v18  ;;  %5160 = vmatpush.bf16.msrb.mxu0 %v7738_v4  ;;  %v7706_v26 = vor.u32 %v9248_v34, %v7703_v21 }
 0x2fb   :  { %v7959_v8 = vld [vmem:[#allocation8 + $0xb38] sm:$0xf0] }
 0x2fc   :  { %5146 = vmatpush.bf16.msra.mxu3 %v7482_v2  ;;  %v9112_v32 = vld [vmem:[#allocation8 + $0x4dc] sm:$0xf]  ;;  %5174 = vmatpush.bf16.msrb.mxu1 %v7994_v23  ;;  %v7962_v16 = vor.u32 %v9312_v56, %v7959_v8 }
 0x2fd   :  { %v7159_v57 = vld [vmem:[#allocation8 + $0x4f8] sm:$0xf0] }
 0x2fe   :  { %v9176_v12 = vld [vmem:[#allocation8 + $0x6dc] sm:$0xf]  ;;  %5133 = vmatpush.bf16.msra.mxu2 %v7194_v59  ;;  %v7162_v15 = vor.u32 %v9112_v32, %v7159_v57  ;;  %5161 = vmatpush.bf16.msrb.mxu0 %v7706_v26 }
 0x2ff   :  { %v7415_v17 = vld [vmem:[#allocation8 + $0x6f8] sm:$0xf0] }
 0x300   :  { %v9240_v19 = vld [vmem:[#allocation8 + $0x8dc] sm:$0xf]  ;;  %5147 = vmatpush.bf16.msra.mxu3 %v7450_v60  ;;  %v7418_v62 = vor.u32 %v9176_v12, %v7415_v17  ;;  %5175 = vmatpush.bf16.msrb.mxu1 %v7962_v16  ;;  %v10174_v16 = vpop.f32.mrf.mxu1 }
 0x301   :  { %v7671_v47 = vld [vmem:[#allocation8 + $0x8f8] sm:$0xf0] }
 0x302   :  { %v9304_v43 = vld [vmem:[#allocation8 + $0xadc] sm:$0xf]  ;;  %v7674_v48 = vor.u32 %v9240_v19, %v7671_v47  ;;  %5134 = vmatpush.bf16.msra.mxu2 %v7162_v15 }
 0x303   :  { %v7927_v14 = vld [vmem:[#allocation8 + $0xaf8] sm:$0xf0] }
 0x304   :  { %v9104_v0 = vld [vmem:[#allocation8 + $0x49c] sm:$0xf]  ;;  %v7930_v46 = vor.u32 %v9304_v43, %v7927_v14  ;;  %5148 = vmatpush.bf16.msra.mxu3 %v7418_v62  ;;  %5162 = vmatpush.bf16.msrb.mxu0 %v7674_v48  ;;  %v9476_v43 = vld [vmem:[#allocation11 + $0x38] sm:$0xff]  ;;  %v10176_v48 = vpop.f32.mrf.mxu0 }
 0x305   :  { %v7127_v50 = vld [vmem:[#allocation8 + $0x4b8] sm:$0xf0]  ;;  %v9484_v14 = vld [vmem:[#allocation11 + $0x78] sm:$0xff] }
 0x306   :  { %v9168_v28 = vld [vmem:[#allocation8 + $0x69c] sm:$0xf]  ;;  %v7130_v39 = vor.u32 %v9104_v0, %v7127_v50  ;;  %5176 = vmatpush.bf16.msrb.mxu1 %v7930_v46  ;;  %v10178_v46 = vpop.f32.mrf.mxu2 }
 0x307   :  { %v7383_v38 = vld [vmem:[#allocation8 + $0x6b8] sm:$0xf0] }
 0x308   :  { %v9232_v54 = vld [vmem:[#allocation8 + $0x89c] sm:$0xf]  ;;  %v7386_v24 = vor.u32 %v9168_v28, %v7383_v38  ;;  %5135 = vmatpush.bf16.msra.mxu2 %v7130_v39  ;;  %v10180_v28 = vpop.f32.mrf.mxu3 }
 0x309   :  { %v7639_v29 = vld [vmem:[#allocation8 + $0x8b8] sm:$0xf0] }
 0x30a   :  { %v9296_v33 = vld [vmem:[#allocation8 + $0xa9c] sm:$0xf]  ;;  %v7642_v42 = vor.u32 %v9232_v54, %v7639_v29  ;;  %5149 = vmatpush.bf16.msra.mxu3 %v7386_v24 }
 0x30b   :  { %v7895_v35 = vld [vmem:[#allocation8 + $0xab8] sm:$0xf0] }
 0x30c   :  { %v9096_v13 = vld [vmem:[#allocation8 + $0x45c] sm:$0xf]  ;;  %v7898_v44 = vor.u32 %v9296_v33, %v7895_v35  ;;  %5163 = vmatpush.bf16.msrb.mxu0 %v7642_v42 }
 0x30d   :  { %v7095_v10 = vld [vmem:[#allocation8 + $0x478] sm:$0xf0] }
 0x30e   :  { %v9160_v31 = vld [vmem:[#allocation8 + $0x65c] sm:$0xf]  ;;  %v7098_v36 = vor.u32 %v9096_v13, %v7095_v10  ;;  %5177 = vmatpush.bf16.msrb.mxu1 %v7898_v44  ;;  %v10184_v10 = vpop.f32.mrf.mxu1 }
 0x30f   :  { %v7351_v30 = vld [vmem:[#allocation8 + $0x678] sm:$0xf0] }
 0x310   :  { %v9224_v22 = vld [vmem:[#allocation8 + $0x85c] sm:$0xf]  ;;  %v7354_v18 = vor.u32 %v9160_v31, %v7351_v30  ;;  %5136 = vmatpush.bf16.msra.mxu2 %v7098_v36  ;;  %v9474_v31 = vld [vmem:[#allocation11 + $0x28] sm:$0xff]  ;;  %v10192_v36 = vpop.f32.mrf.mxu0 }
 0x311   :  { %v7607_v5 = vld [vmem:[#allocation8 + $0x878] sm:$0xf0]  ;;  %v9482_v30 = vld [vmem:[#allocation11 + $0x68] sm:$0xff] }
 0x312   :  { %v9288_v37 = vld [vmem:[#allocation8 + $0xa5c] sm:$0xf]  ;;  %v7610_v4 = vor.u32 %v9224_v22, %v7607_v5  ;;  %5150 = vmatpush.bf16.msra.mxu3 %v7354_v18  ;;  %v9473_v18 = vld [vmem:[#allocation11 + $0x20] sm:$0xff] }
 0x313   :  { %v7863_v9 = vld [vmem:[#allocation8 + $0xa78] sm:$0xf0] }
 0x314   :  { %v9088_v2 = vld [vmem:[#allocation8 + $0x41c] sm:$0xf]  ;;  %v7866_v23 = vor.u32 %v9288_v37, %v7863_v9  ;;  %5164 = vmatpush.bf16.msrb.mxu0 %v7610_v4  ;;  %v10188_v9 = vpop.f32.mrf.mxu2 }
 0x315   :  { %v7063_v3 = vld [vmem:[#allocation8 + $0x438] sm:$0xf0] }
 0x316   :  { %v9152_v40 = vld [vmem:[#allocation8 + $0x61c] sm:$0xf]  ;;  %v7066_v57 = vor.u32 %v9088_v2, %v7063_v3  ;;  %5178 = vmatpush.bf16.msrb.mxu1 %v7866_v23  ;;  %v9481_v2 = vld [vmem:[#allocation11 + $0x60] sm:$0xff] }
 0x317   :  { %v7319_v41 = vld [vmem:[#allocation8 + $0x638] sm:$0xf0] }
 0x318   :  { %v9216_v11 = vld [vmem:[#allocation8 + $0x81c] sm:$0xf]  ;;  %v7322_v26 = vor.u32 %v9152_v40, %v7319_v41  ;;  %5137 = vmatpush.bf16.msra.mxu2 %v7066_v57  ;;  %v10196_v57 = vld [vmem:[#allocation10] sm:$0xff] }
 0x319   :  { %v7575_v34 = vld [vmem:[#allocation8 + $0x838] sm:$0xf0] }
 0x31a   :  { %v9280_v21 = vld [vmem:[#allocation8 + $0xa1c] sm:$0xf]  ;;  %v7578_v12 = vor.u32 %v9216_v11, %v7575_v34  ;;  %5151 = vmatpush.bf16.msra.mxu3 %v7322_v26  ;;  %v9472_v34 = vld [vmem:[#allocation11 + $0x18] sm:$0xff]  ;;  %v1706_v26 = vperm.slane %v10196_v57, 4 }
 0x31b   :  { %v7831_v56 = vld [vmem:[#allocation8 + $0xa38] sm:$0xf0]  ;;  %5138 = vmatmul.bf16.vlgmr.msra.gmra.mxu2 %v9958_v58 }
 0x31c   :  { %v9400_v8 = vld [vmem:[#allocation8 + $0xddc] sm:$0xf]  ;;  %v7834_v17 = vor.u32 %v9280_v21, %v7831_v56  ;;  %5165 = vmatpush.bf16.msrb.mxu0 %v7578_v12  ;;  %v9480_v21 = vld [vmem:[#allocation11 + $0x58] sm:$0xff]  ;;  %v4887_v12 = vpop.f32.mrf.mxu0 }
 0x31d   :  { %v8311_v59 = vld [vmem:[#allocation8 + $0xdf8] sm:$0xf0]  ;;  %5152 = vmatmul.bf16.vlgmr.msra.gmra.mxu3 %v9960_v61  ;;  %v10190_v61 = vpop.f32.mrf.mxu3 }
 0x31e   :  { %v9464_v60 = vld [vmem:[#allocation8 + $0xfdc] sm:$0xf]  ;;  %v8314_v19 = vor.u32 %v9400_v8, %v8311_v59  ;;  %5179 = vmatpush.bf16.msrb.mxu1 %v7834_v17  ;;  %v10194_v8 = vpop.f32.mrf.mxu1 }
 0x31f   :  { %v8567_v32 = vld [vmem:[#allocation8 + $0xff8] sm:$0xf0]  ;;  %5166 = vmatmul.bf16.vlgmr.msrb.gmra.mxu0 %v9966_v25 }
 0x320   :  { %v8570_v47 = vor.u32 %v9464_v60, %v8567_v32  ;;  %v9392_v15 = vld [vmem:[#allocation8 + $0xd9c] sm:$0xf]  ;;  %5186 = vmatpush.bf16.msrb.mxu2 %v8314_v19  ;;  %5802 = vmatpush.bf16.msra.mxu0 %v9476_v43 }
 0x321   :  { %v8279_v62 = vld [vmem:[#allocation8 + $0xdb8] sm:$0xf0]  ;;  %5180 = vmatmul.bf16.vlgmr.msrb.gmra.mxu1 %v9968_v27 }
 0x322   :  { %v9456_v0 = vld [vmem:[#allocation8 + $0xf9c] sm:$0xf]  ;;  %5200 = vmatpush.bf16.msrb.mxu3 %v8570_v47  ;;  %v8282_v38 = vor.u32 %v9392_v15, %v8279_v62  ;;  %5816 = vmatpush.bf16.msra.mxu1 %v9484_v14  ;;  %v10199_v15 = vpop.f32.mrf.mxu2 }
 0x323   :  { %v8535_v50 = vld [vmem:[#allocation8 + $0xfb8] sm:$0xf0] }
 0x324   :  { %v8538_v54 = vor.u32 %v9456_v0, %v8535_v50  ;;  %v9475_v29 = vld [vmem:[#allocation11 + $0x30] sm:$0xff]  ;;  %5187 = vmatpush.bf16.msrb.mxu2 %v8282_v38 }
 0x325   :  { %v9483_v33 = vld [vmem:[#allocation11 + $0x70] sm:$0xff]  ;;  %5803 = vmatpush.bf16.msra.mxu0 %v9475_v29  ;;  %v10201_v62 = vpop.f32.mrf.mxu3  ;;  %v1707_v29 = vperm.slane %v10196_v57, 5 }
 0x326   :  { %v9384_v35 = vld [vmem:[#allocation8 + $0xd5c] sm:$0xf]  ;;  %5201 = vmatpush.bf16.msrb.mxu3 %v8538_v54  ;;  %5817 = vmatpush.bf16.msra.mxu1 %v9483_v33  ;;  %v4776_v54 = vadd.f32 %v10164_v20, %v1706_v26 }
 0x327   :  { %v8247_v39 = vld [vmem:[#allocation8 + $0xd78] sm:$0xf0] }
 0x328   :  { %v9448_v24 = vld [vmem:[#allocation8 + $0xf5c] sm:$0xf]  ;;  %v8250_v42 = vor.u32 %v9384_v35, %v8247_v39  ;;  %v9470_v39 = vld [vmem:[#allocation11 + $0x8] sm:$0xff] }
 0x329   :  { %v8503_v13 = vld [vmem:[#allocation8 + $0xf78] sm:$0xf0]  ;;  %5804 = vmatpush.bf16.msra.mxu0 %v9474_v31 }
 0x32a   :  { %v8506_v44 = vor.u32 %v9448_v24, %v8503_v13  ;;  %v9376_v22 = vld [vmem:[#allocation8 + $0xd1c] sm:$0xf]  ;;  %5188 = vmatpush.bf16.msrb.mxu2 %v8250_v42  ;;  %5818 = vmatpush.bf16.msra.mxu1 %v9482_v30  ;;  %v9478_v24 = vld [vmem:[#allocation11 + $0x48] sm:$0xff]  ;;  %v4901_v42 = vpop.f32.mrf.mxu1 }
 0x32b   :  { %v8215_v5 = vld [vmem:[#allocation8 + $0xd38] sm:$0xf0] }
 0x32c   :  { %v9440_v37 = vld [vmem:[#allocation8 + $0xf1c] sm:$0xf]  ;;  %5202 = vmatpush.bf16.msrb.mxu3 %v8506_v44  ;;  %v8218_v25 = vor.u32 %v9376_v22, %v8215_v5  ;;  %v4790_v22 = vadd.f32 %v10166_v49, %v4776_v54  ;;  %v4888_v5 = vadd.f32 %v4887_v12, %v1707_v29 }
 0x32d   :  { %v8471_v58 = vld [vmem:[#allocation8 + $0xf38] sm:$0xf0]  ;;  %5805 = vmatpush.bf16.msra.mxu0 %v9473_v18  ;;  %v9469_v18 = vld [vmem:[#allocation11] sm:$0xff] }
 0x32e   :  { %v8474_v27 = vor.u32 %v9440_v37, %v8471_v58  ;;  %v9368_v3 = vld [vmem:[#allocation8 + $0xcdc] sm:$0xf]  ;;  %5189 = vmatpush.bf16.msrb.mxu2 %v8218_v25  ;;  %5819 = vmatpush.bf16.msra.mxu1 %v9481_v2  ;;  %v4804_v58 = vadd.f32 %v10168_v45, %v4790_v22  ;;  %v4915_v25 = vpop.f32.mrf.mxu2  ;;  %v9477_v2 = vld [vmem:[#allocation11 + $0x40] sm:$0xff]  ;;  %v9516_v45 = vld [vmem:[#allocation11 + $0x178] sm:$0xff] }
 0x32f   :  { %v8183_v40 = vld [vmem:[#allocation8 + $0xcf8] sm:$0xf0] }
 0x330   :  { %v9432_v4 = vld [vmem:[#allocation8 + $0xedc] sm:$0xf]  ;;  %5203 = vmatpush.bf16.msrb.mxu3 %v8474_v27  ;;  %v8186_v41 = vor.u32 %v9368_v3, %v8183_v40  ;;  %v4929_v27 = vpop.f32.mrf.mxu3  ;;  %v4889_v3 = vpop.f32.mrf.mxu0  ;;  %v9492_v40 = vld [vmem:[#allocation11 + $0xb8] sm:$0xff]  ;;  %v4818_v49 = vadd.f32 %v10170_v1, %v4804_v58 }
 0x331   :  { %v8439_v23 = vld [vmem:[#allocation8 + $0xef8] sm:$0xf0]  ;;  %5806 = vmatpush.bf16.msra.mxu0 %v9472_v34 }
 0x332   :  { %v8442_v11 = vor.u32 %v9432_v4, %v8439_v23  ;;  %v9360_v56 = vld [vmem:[#allocation8 + $0xc9c] sm:$0xf]  ;;  %5190 = vmatpush.bf16.msrb.mxu2 %v8186_v41  ;;  %5820 = vmatpush.bf16.msra.mxu1 %v9480_v21  ;;  %v9500_v4 = vld [vmem:[#allocation11 + $0xf8] sm:$0xff]  ;;  %v4778_v23 = vadd.f32 %v10172_v55, %v1706_v26  ;;  %v4902_v41 = vadd.f32 %v4901_v42, %v4888_v5 }
 0x333   :  { %v8151_v59 = vld [vmem:[#allocation8 + $0xcb8] sm:$0xf0]  ;;  %v4832_v1 = vadd.f32 %v10176_v48, %v4818_v49  ;;  %v9514_v48 = vld [vmem:[#allocation11 + $0x168] sm:$0xff]  ;;  %v9512_v5 = vld [vmem:[#allocation11 + $0x158] sm:$0xff] }
 0x334   :  { %v9424_v60 = vld [vmem:[#allocation8 + $0xe9c] sm:$0xf]  ;;  %5204 = vmatpush.bf16.msrb.mxu3 %v8442_v11  ;;  %v8154_v17 = vor.u32 %v9360_v56, %v8151_v59  ;;  %v9508_v11 = vld [vmem:[#allocation11 + $0x138] sm:$0xff]  ;;  %v4916_v34 = vadd.f32 %v4915_v25, %v4902_v41  ;;  %v4903_v59 = vpop.f32.mrf.mxu1  ;;  %v4792_v55 = vadd.f32 %v10174_v16, %v4778_v23  ;;  %v9486_v23 = vld [vmem:[#allocation11 + $0x88] sm:$0xff] }
 0x335   :  { %v8407_v32 = vld [vmem:[#allocation8 + $0xeb8] sm:$0xf0] }
 0x336   :  { %v8410_v19 = vor.u32 %v9424_v60, %v8407_v32  ;;  %v9471_v47 = vld [vmem:[#allocation11 + $0x10] sm:$0xff]  ;;  %5191 = vmatpush.bf16.msrb.mxu2 %v8154_v17  ;;  %v4890_v60 = vadd.f32 %v4889_v3, %v1707_v29  ;;  %v4806_v12 = vadd.f32 %v10178_v46, %v4792_v55  ;;  %v4917_v16 = vpop.f32.mrf.mxu2  ;;  %v9489_v46 = vld [vmem:[#allocation11 + $0xa0] sm:$0xff] }
 0x337   :  { %v9479_v43 = vld [vmem:[#allocation11 + $0x50] sm:$0xff]  ;;  %5807 = vmatpush.bf16.msra.mxu0 %v9471_v47  ;;  %v9493_v55 = vld [vmem:[#allocation11 + $0xc0] sm:$0xff] }
 0x338   :  { %v9352_v14 = vld [vmem:[#allocation8 + $0xc5c] sm:$0xf]  ;;  %5205 = vmatpush.bf16.msrb.mxu3 %v8410_v19  ;;  %5821 = vmatpush.bf16.msra.mxu1 %v9479_v43  ;;  %v4943_v17 = vpop.f32.mrf.mxu0  ;;  %v4930_v19 = vadd.f32 %v4929_v27, %v4916_v34  ;;  %v4931_v47 = vpop.f32.mrf.mxu3  ;;  %v4904_v43 = vadd.f32 %v4903_v59, %v4890_v60  ;;  %v9485_v59 = vld [vmem:[#allocation11 + $0x80] sm:$0xff] }
 0x339   :  { %v8119_v0 = vld [vmem:[#allocation8 + $0xc78] sm:$0xf0] }
 0x33a   :  { %v9416_v50 = vld [vmem:[#allocation8 + $0xe5c] sm:$0xf]  ;;  %v8122_v33 = vor.u32 %v9352_v14, %v8119_v0  ;;  %v4820_v14 = vadd.f32 %v10180_v28, %v4806_v12  ;;  %v4944_v0 = vadd.f32 %v4943_v17, %v4930_v19  ;;  %v9496_v28 = vld [vmem:[#allocation11 + $0xd8] sm:$0xff] }
 0x33b   :  { %v8375_v38 = vld [vmem:[#allocation8 + $0xe78] sm:$0xf0]  ;;  %5808 = vmatpush.bf16.msra.mxu0 %v9470_v39 }
 0x33c   :  { %v8378_v35 = vor.u32 %v9416_v50, %v8375_v38  ;;  %v9344_v13 = vld [vmem:[#allocation8 + $0xc1c] sm:$0xf]  ;;  %5192 = vmatpush.bf16.msrb.mxu2 %v8122_v33  ;;  %5822 = vmatpush.bf16.msra.mxu1 %v9478_v24  ;;  %v4918_v50 = vadd.f32 %v4917_v16, %v4904_v43  ;;  %v9497_v38 = vld [vmem:[#allocation11 + $0xe0] sm:$0xff]  ;;  %v4957_v54 = vpop.f32.mrf.mxu1  ;;  %v9488_v24 = vld [vmem:[#allocation11 + $0x98] sm:$0xff] }
 0x33d   :  { %v8087_v44 = vld [vmem:[#allocation8 + $0xc38] sm:$0xf0]  ;;  %v9505_v33 = vld [vmem:[#allocation11 + $0x120] sm:$0xff] }
 0x33e   :  { %v9408_v31 = vld [vmem:[#allocation8 + $0xe1c] sm:$0xf]  ;;  %5206 = vmatpush.bf16.msrb.mxu3 %v8378_v35  ;;  %v8090_v20 = vor.u32 %v9344_v13, %v8087_v44  ;;  %v9513_v35 = vld [vmem:[#allocation11 + $0x160] sm:$0xff]  ;;  %v4932_v39 = vadd.f32 %v4931_v47, %v4918_v50  ;;  %v4958_v13 = vadd.f32 %v4957_v54, %v4944_v0  ;;  %v4971_v42 = vpop.f32.mrf.mxu2  ;;  %v9524_v0 = vld [vmem:[#allocation11 + $0x1b8] sm:$0xff] }
 0x33f   :  { %v8343_v30 = vld [vmem:[#allocation8 + $0xe38] sm:$0xf0]  ;;  %5809 = vmatpush.bf16.msra.mxu0 %v9469_v18  ;;  %v9532_v50 = vld [vmem:[#allocation11 + $0x1f8] sm:$0xff] }
 0x340   :  { %v8346_v37 = vor.u32 %v9408_v31, %v8343_v30  ;;  %5193 = vmatpush.bf16.msrb.mxu2 %v8090_v20  ;;  %5823 = vmatpush.bf16.msra.mxu1 %v9477_v2  ;;  %v9491_v21 = vld [vmem:[#allocation11 + $0xb0] sm:$0xff]  ;;  %v4985_v44 = vpop.f32.mrf.mxu3  ;;  %v4972_v30 = vadd.f32 %v4971_v42, %v4958_v13  ;;  %v4945_v22 = vpop.f32.mrf.mxu0  ;;  %v9529_v13 = vld [vmem:[#allocation11 + $0x1e0] sm:$0xff] }
 0x341   :  { %v9499_v56 = vld [vmem:[#allocation11 + $0xf0] sm:$0xff] }
 0x342   :  { %5207 = vmatpush.bf16.msrb.mxu3 %v8346_v37  ;;  %5810 = vmatmul.bf16.vlgmr.msra.gmra.mxu0 %v10069_v52  ;;  %v9507_v32 = vld [vmem:[#allocation11 + $0x130] sm:$0xff]  ;;  %v4846_v52 = vadd.f32 %v10184_v10, %v4832_v1  ;;  %v4834_v10 = vadd.f32 %v10192_v36, %v4820_v14  ;;  %v4946_v37 = vadd.f32 %v4945_v22, %v4932_v39  ;;  %v9522_v39 = vld [vmem:[#allocation11 + $0x1a8] sm:$0xff]  ;;  %v9528_v22 = vld [vmem:[#allocation11 + $0x1d8] sm:$0xff] }
 0x343   :  { %5194 = vmatmul.bf16.vlgmr.msrb.gmra.mxu2 %v9976_v51  ;;  %5824 = vmatmul.bf16.vlgmr.msra.gmra.mxu1 %v10071_v63  ;;  %v9515_v26 = vld [vmem:[#allocation11 + $0x170] sm:$0xff]  ;;  %v9490_v51 = vld [vmem:[#allocation11 + $0xa8] sm:$0xff]  ;;  %v4986_v36 = vadd.f32 %v4985_v44, %v4972_v30  ;;  %v1708_v44 = vperm.slane %v10196_v57, 6  ;;  %v9520_v30 = vld [vmem:[#allocation11 + $0x198] sm:$0xff] }
 0x344   :  { %5830 = vmatpush.bf16.msra.mxu2 %v9492_v40  ;;  %5858 = vmatpush.bf16.msrb.mxu0 %v9508_v11  ;;  %v9506_v63 = vld [vmem:[#allocation11 + $0x128] sm:$0xff]  ;;  %v4860_v29 = vadd.f32 %v10188_v9, %v4846_v52  ;;  %v9504_v9 = vld [vmem:[#allocation11 + $0x118] sm:$0xff]  ;;  %v4848_v20 = vadd.f32 %v10194_v8, %v4834_v10  ;;  %v9487_v58 = vld [vmem:[#allocation11 + $0x90] sm:$0xff]  ;;  %v4959_v3 = vpop.f32.mrf.mxu1 }
 0x345   :  { %5208 = vmatmul.bf16.vlgmr.msrb.gmra.mxu3 %v9978_v53  ;;  %5872 = vmatpush.bf16.msrb.mxu1 %v9516_v45  ;;  %v9498_v53 = vld [vmem:[#allocation11 + $0xe8] sm:$0xff]  ;;  %v9495_v25 = vld [vmem:[#allocation11 + $0xd0] sm:$0xff]  ;;  %v5219_v2 = vmax.f32 %v4986_v36, 0.0  ;;  %v4960_v41 = vadd.f32 %v4959_v3, %v4946_v37  ;;  %v1709_v37 = vperm.slane %v10196_v57, 7 }
 0x346   :  { %5844 = vmatpush.bf16.msra.mxu3 %v9500_v4  ;;  %v4874_v31 = vadd.f32 %v10190_v61, %v4860_v29  ;;  %v4862_v18 = vadd.f32 %v10199_v15, %v4848_v20  ;;  %v9503_v61 = vld [vmem:[#allocation11 + $0x110] sm:$0xff]  ;;  %v9494_v8 = vld [vmem:[#allocation11 + $0xc8] sm:$0xff]  ;;  %v4973_v49 = vpop.f32.mrf.mxu2 }
 0x347   :  { %v9511_v40 = vld [vmem:[#allocation11 + $0x150] sm:$0xff]  ;;  %v4974_v45 = vadd.f32 %v4973_v49, %v4960_v41  ;;  %v9502_v15 = vld [vmem:[#allocation11 + $0x108] sm:$0xff]  ;;  %v9517_v49 = vld [vmem:[#allocation11 + $0x180] sm:$0xff] }
 0x348   :  { %5831 = vmatpush.bf16.msra.mxu2 %v9491_v21  ;;  %5859 = vmatpush.bf16.msrb.mxu0 %v9507_v32  ;;  %v5218_v27 = vmax.f32 %v4874_v31, 0.0  ;;  %v4876_v11 = vadd.f32 %v10201_v62, %v4862_v18  ;;  %v4987_v34 = vpop.f32.mrf.mxu3  ;;  %v9510_v21 = vld [vmem:[#allocation11 + $0x148] sm:$0xff]  ;;  %v9501_v62 = vld [vmem:[#allocation11 + $0x100] sm:$0xff]  ;;  %v4999_v47 = vpop.f32.mrf.mxu0  ;;  %v9523_v54 = vld [vmem:[#allocation11 + $0x1b0] sm:$0xff] }
 0x349   :  { %5873 = vmatpush.bf16.msrb.mxu1 %v9515_v26  ;;  %v9509_v26 = vld [vmem:[#allocation11 + $0x140] sm:$0xff]  ;;  %v9531_v29 = vld [vmem:[#allocation11 + $0x1f0] sm:$0xff]  ;;  %v5000_v20 = vadd.f32 %v4999_v47, %v1708_v44  ;;  %v9526_v3 = vld [vmem:[#allocation11 + $0x1c8] sm:$0xff] }
 0x34a   :  { %5845 = vmatpush.bf16.msra.mxu3 %v9499_v56  ;;  %v5232_v4 = vpack.c.bf16 %v5219_v2, %v5218_v27  ;;  %v4988_v56 = vadd.f32 %v4987_v34, %v4974_v45  ;;  %v5226_v60 = vmax.f32 %v4876_v11, 0.0  ;;  %v9519_v36 = vld [vmem:[#allocation11 + $0x190] sm:$0xff]  ;;  %v9518_v2 = vld [vmem:[#allocation11 + $0x188] sm:$0xff]  ;;  %v9525_v11 = vld [vmem:[#allocation11 + $0x1c0] sm:$0xff] }
 0x34c   :  { %5832 = vmatpush.bf16.msra.mxu2 %v9490_v51  ;;  %5860 = vmatpush.bf16.msrb.mxu0 %v9506_v63  ;;  %5240 = vst [vmem:[#allocation15 + $0x10] sm:$0xff] %v5232_v4  ;;  %v5227_v1 = vmax.f32 %v4988_v56, 0.0  ;;  %v5390_v12 = vunpack.c.l.b16 %v5232_v4  ;;  %v5391_v17 = vunpack.c.h.b16 %v5232_v4  ;;  %v5013_v43 = vpop.f32.mrf.mxu1 }
 0x34d   :  { %5874 = vmatpush.bf16.msrb.mxu1 %v9514_v48  ;;  %v5014_v27 = vadd.f32 %v5013_v43, %v5000_v20 }
 0x34e   :  { %5846 = vmatpush.bf16.msra.mxu3 %v9498_v53  ;;  %v5236_v32 = vpack.c.bf16 %v5227_v1, %v5226_v60 }
 0x350   :  { %5833 = vmatpush.bf16.msra.mxu2 %v9489_v46  ;;  %5861 = vmatpush.bf16.msrb.mxu0 %v9505_v33  ;;  %5244 = vst [vmem:[#allocation15 + $0x30] sm:$0xff] %v5236_v32  ;;  %v5398_v19 = vunpack.c.l.b16 %v5236_v32  ;;  %v5399_v51 = vunpack.c.h.b16 %v5236_v32  ;;  %v5027_v52 = vpop.f32.mrf.mxu2  ;;  %v5001_v48 = vpop.f32.mrf.mxu0 }
 0x351   :  { %5875 = vmatpush.bf16.msrb.mxu1 %v9513_v35  ;;  %v5028_v4 = vadd.f32 %v5027_v52, %v5014_v27 }
 0x352   :  { %5847 = vmatpush.bf16.msra.mxu3 %v9497_v38  ;;  %v5406_v53 = vpack.c.b16 %v5398_v19, %v5390_v12  ;;  %v5407_v16 = vpack.c.b16 %v5399_v51, %v5391_v17  ;;  %v5041_v63 = vpop.f32.mrf.mxu3 }
 0x353   :  { %v5042_v57 = vadd.f32 %v5041_v63, %v5028_v4 }
 0x354   :  { %5834 = vmatpush.bf16.msra.mxu2 %v9488_v24  ;;  %5862 = vmatpush.bf16.msrb.mxu0 %v9504_v9  ;;  %v5015_v14 = vpop.f32.mrf.mxu1  ;;  %v9530_v24 = vld [vmem:[#allocation11 + $0x1e8] sm:$0xff] }
 0x355   :  { %5876 = vmatpush.bf16.msrb.mxu1 %v9512_v5 }
 0x356   :  { %5848 = vmatpush.bf16.msra.mxu3 %v9496_v28  ;;  %v9521_v28 = vld [vmem:[#allocation11 + $0x1a0] sm:$0xff] }
 0x358   :  { %5835 = vmatpush.bf16.msra.mxu2 %v9487_v58  ;;  %5863 = vmatpush.bf16.msrb.mxu0 %v9503_v61  ;;  %v5055_v46 = vpop.f32.mrf.mxu0  ;;  %v9527_v58 = vld [vmem:[#allocation11 + $0x1d0] sm:$0xff] }
 0x359   :  { %5877 = vmatpush.bf16.msrb.mxu1 %v9511_v40  ;;  %v5056_v56 = vadd.f32 %v5055_v46, %v5042_v57 }
 0x35a   :  { %5849 = vmatpush.bf16.msra.mxu3 %v9495_v25  ;;  %v5043_v38 = vpop.f32.mrf.mxu3 }
 0x35c   :  { %5836 = vmatpush.bf16.msra.mxu2 %v9486_v23  ;;  %5864 = vmatpush.bf16.msrb.mxu0 %v9502_v15 }
 0x35d   :  { %5878 = vmatpush.bf16.msrb.mxu1 %v9510_v21 }
 0x35e   :  { %5850 = vmatpush.bf16.msra.mxu3 %v9494_v8  ;;  %v5002_v8 = vadd.f32 %v5001_v48, %v1708_v44 }
 0x360   :  { %5837 = vmatpush.bf16.msra.mxu2 %v9485_v59  ;;  %5865 = vmatpush.bf16.msrb.mxu0 %v9501_v62  ;;  %v5057_v10 = vpop.f32.mrf.mxu0  ;;  %v5016_v15 = vadd.f32 %v5015_v14, %v5002_v8 }
 0x361   :  { %5879 = vmatpush.bf16.msrb.mxu1 %v9509_v26 }
 0x362   :  { %5851 = vmatpush.bf16.msra.mxu3 %v9493_v55 }
 0x363   :  { %5838 = vmatmul.bf16.vlgmr.msra.gmra.mxu2 %v10152_v6  ;;  %5866 = vmatmul.bf16.vlgmr.msrb.gmra.mxu0 %v5406_v53  ;;  %v5029_v6 = vpop.f32.mrf.mxu2 }
 0x364   :  { %5880 = vmatmul.bf16.vlgmr.msrb.gmra.mxu1 %v5407_v16  ;;  %5886 = vmatpush.bf16.msrb.mxu2 %v9524_v0  ;;  %v5030_v59 = vadd.f32 %v5029_v6, %v5016_v15 }
 0x365   :  { %5852 = vmatmul.bf16.vlgmr.msra.gmra.mxu3 %v10154_v7  ;;  %v5069_v7 = vpop.f32.mrf.mxu1 }
 0x366   :  { %5900 = vmatpush.bf16.msrb.mxu3 %v9532_v50  ;;  %v5044_v26 = vadd.f32 %v5043_v38, %v5030_v59  ;;  %v5070_v12 = vadd.f32 %v5069_v7, %v5056_v56 }
 0x368   :  { %5887 = vmatpush.bf16.msrb.mxu2 %v9523_v54  ;;  %v5058_v16 = vadd.f32 %v5057_v10, %v5044_v26 }
 0x36a   :  { %5901 = vmatpush.bf16.msrb.mxu3 %v9531_v29 }
 0x36c   :  { %5888 = vmatpush.bf16.msrb.mxu2 %v9522_v39 }
 0x36d   :  { %v5071_v42 = vpop.f32.mrf.mxu1 }
 0x36e   :  { %5902 = vmatpush.bf16.msrb.mxu3 %v9530_v24  ;;  %v5111_v31 = vpop.f32.mrf.mxu0  ;;  %v5072_v50 = vadd.f32 %v5071_v42, %v5058_v16 }
 0x36f   :  { %v5112_v18 = vadd.f32 %v5111_v31, %v1709_v37 }
 0x370   :  { %5889 = vmatpush.bf16.msrb.mxu2 %v9521_v28 }
 0x372   :  { %5903 = vmatpush.bf16.msrb.mxu3 %v9529_v13 }
 0x374   :  { %v5083_v33 = vpop.f32.mrf.mxu2  ;;  %5890 = vmatpush.bf16.msrb.mxu2 %v9520_v30 }
 0x375   :  { %v5125_v25 = vpop.f32.mrf.mxu1  ;;  %v5084_v53 = vadd.f32 %v5083_v33, %v5070_v12 }
 0x376   :  { %v10226_v35 = vpop.f32.mrf.mxu3  ;;  %5904 = vmatpush.bf16.msrb.mxu3 %v9528_v22  ;;  %v5113_v23 = vpop.f32.mrf.mxu0  ;;  %v5126_v41 = vadd.f32 %v5125_v25, %v5112_v18  ;;  %v9549_v25 = vld [vmem:[#allocation13] ss:$0 sm:$0xff] }
 0x377   :  { %v5114_v21 = vadd.f32 %v5113_v23, %v1709_v37  ;;  %v5098_v48 = vadd.f32 %v10226_v35, %v5084_v53 }
 0x378   :  { %5891 = vmatpush.bf16.msrb.mxu2 %v9519_v36 }
 0x379   :  { %v5220_v54 = vmax.f32 %v5098_v48, 0.0 }
 0x37a   :  { %5905 = vmatpush.bf16.msrb.mxu3 %v9527_v58 }
 0x37c   :  { %v5085_v9 = vpop.f32.mrf.mxu2  ;;  %5892 = vmatpush.bf16.msrb.mxu2 %v9518_v2 }
 0x37d   :  { %v5127_v34 = vpop.f32.mrf.mxu1  ;;  %v5086_v29 = vadd.f32 %v5085_v9, %v5072_v50 }
 0x37e   :  { %v5099_v5 = vpop.f32.mrf.mxu3  ;;  %5906 = vmatpush.bf16.msrb.mxu3 %v9526_v3  ;;  %v5128_v62 = vadd.f32 %v5127_v34, %v5114_v21 }
 0x37f   :  { %v5100_v33 = vadd.f32 %v5099_v5, %v5086_v29 }
 0x380   :  { %5893 = vmatpush.bf16.msrb.mxu2 %v9517_v49 }
 0x381   :  { %v5228_v31 = vmax.f32 %v5100_v33, 0.0 }
 0x382   :  { %5907 = vmatpush.bf16.msrb.mxu3 %v9525_v11 }
 0x39c   :  { %v5167_v55 = vpop.f32.mrf.mxu0 }
 0x39e   :  { %v5139_v61 = vpop.f32.mrf.mxu2  ;;  %v5181_v51 = vpop.f32.mrf.mxu1 }
 0x39f   :  { %v5140_v45 = vadd.f32 %v5139_v61, %v5126_v41 }
 0x3a0   :  { %v5153_v40 = vpop.f32.mrf.mxu3 }
 0x3a1   :  { %v5154_v60 = vadd.f32 %v5153_v40, %v5140_v45 }
 0x3a3   :  { %v5168_v17 = vadd.f32 %v5167_v55, %v5154_v60 }
 0x3a4   :  { %v5169_v0 = vpop.f32.mrf.mxu0 }
 0x3a5   :  { %v5182_v43 = vadd.f32 %v5181_v51, %v5168_v17 }
 0x3a6   :  { %v5141_v1 = vpop.f32.mrf.mxu2  ;;  %v5183_v7 = vpop.f32.mrf.mxu1 }
 0x3a7   :  { %v5142_v19 = vadd.f32 %v5141_v1, %v5128_v62 }
 0x3a8   :  { %v5155_v32 = vpop.f32.mrf.mxu3 }
 0x3a9   :  { %v5156_v47 = vadd.f32 %v5155_v32, %v5142_v19 }
 0x3ab   :  { %v5170_v46 = vadd.f32 %v5169_v0, %v5156_v47 }
 0x3ad   :  { %v5184_v24 = vadd.f32 %v5183_v7, %v5170_v46 }
 0x3bf   :  { %v5811_v58 = vpop.f32.mrf.mxu0 }
 0x3c0   :  { %v5825_v27 = vpop.f32.mrf.mxu1  ;;  %v5812_v5 = vadd.f32 %v9549_v25, %v5811_v58 }
 0x3c2   :  { %v5826_v61 = vadd.f32 %v5825_v27, %v5812_v5 }
 0x3c6   :  { %v5195_v52 = vpop.f32.mrf.mxu2 }
 0x3c7   :  { %v5196_v14 = vadd.f32 %v5195_v52, %v5182_v43  ;;  %v5813_v3 = vpop.f32.mrf.mxu0 }
 0x3c8   :  { %v5209_v63 = vpop.f32.mrf.mxu3  ;;  %v5827_v4 = vpop.f32.mrf.mxu1  ;;  %v5814_v23 = vadd.f32 %v9549_v25, %v5813_v3 }
 0x3c9   :  { %v5210_v6 = vadd.f32 %v5209_v63, %v5196_v14 }
 0x3ca   :  { %v5828_v57 = vadd.f32 %v5827_v4, %v5814_v23 }
 0x3cb   :  { %v5221_v38 = vmax.f32 %v5210_v6, 0.0 }
 0x3cd   :  { %v5233_v39 = vpack.c.bf16 %v5221_v38, %v5220_v54 }
 0x3ce   :  { %v5197_v28 = vpop.f32.mrf.mxu2 }
 0x3cf   :  { %5241 = vst [vmem:[#allocation15 + $0x18] sm:$0xff] %v5233_v39  ;;  %v5198_v10 = vadd.f32 %v5197_v28, %v5184_v24  ;;  %v5392_v22 = vunpack.c.l.b16 %v5233_v39  ;;  %v5393_v20 = vunpack.c.h.b16 %v5233_v39 }
 0x3d0   :  { %v5211_v13 = vpop.f32.mrf.mxu3 }
 0x3d1   :  { %v5212_v44 = vadd.f32 %v5211_v13, %v5198_v10 }
 0x3d3   :  { %v5229_v30 = vmax.f32 %v5212_v44, 0.0 }
 0x3d5   :  { %v5237_v35 = vpack.c.bf16 %v5229_v30, %v5228_v31 }
 0x3d7   :  { %5245 = vst [vmem:[#allocation15 + $0x38] sm:$0xff] %v5237_v35  ;;  %v5400_v42 = vunpack.c.l.b16 %v5237_v35  ;;  %v5401_v37 = vunpack.c.h.b16 %v5237_v35 }
 0x3d8   :  { %5971 = dma.vmem_to_hbm [thread:$0]  %s5964_s6, 1024, %s5966_s26, [#allocation16], %s9809_s17, %s9809_s17, %s9810_s18  }
 0x3d9   :  { %v5408_v36 = vpack.c.b16 %v5400_v42, %v5392_v22  ;;  %v5409_v9 = vpack.c.b16 %v5401_v37, %v5393_v20 }
 0x3db   :  { %5894 = vmatmul.bf16.vlgmr.msrb.gmra.mxu2 %v5408_v36  ;;  %5908 = vmatmul.bf16.vlgmr.msrb.gmra.mxu3 %v5409_v9 }
 0x3e0   :  { %v5867_v41 = vpop.f32.mrf.mxu0 }
 0x3e1   :  { %v5881_v15 = vpop.f32.mrf.mxu1 }
 0x3e6   :  { %v5839_v18 = vpop.f32.mrf.mxu2 }
 0x3e7   :  { %v5840_v40 = vadd.f32 %v5839_v18, %v5826_v61 }
 0x3e8   :  { %v5853_v2 = vpop.f32.mrf.mxu3  ;;  %v5869_v1 = vpop.f32.mrf.mxu0 }
 0x3e9   :  { %v5854_v8 = vadd.f32 %v5853_v2, %v5840_v40  ;;  %v5883_v12 = vpop.f32.mrf.mxu1 }
 0x3eb   :  { %v5868_v45 = vadd.f32 %v5867_v41, %v5854_v8 }
 0x3ed   :  { %v5882_v21 = vadd.f32 %v5881_v15, %v5868_v45 }
 0x3ee   :  { %v5841_v49 = vpop.f32.mrf.mxu2 }
 0x3ef   :  { %v5842_v34 = vadd.f32 %v5841_v49, %v5828_v57 }
 0x3f0   :  { %v5855_v11 = vpop.f32.mrf.mxu3 }
 0x3f1   :  { %v5856_v56 = vadd.f32 %v5855_v11, %v5842_v34 }
 0x3f3   :  { %v5870_v32 = vadd.f32 %v5869_v1, %v5856_v56 }
 0x3f5   :  { %v5884_v17 = vadd.f32 %v5883_v12, %v5870_v32 }
 0x45e   :  { %v5895_v59 = vpop.f32.mrf.mxu2  ;;  %v5909_v55 = vpop.f32.mrf.mxu3 }
 0x45f   :  { %v5896_v60 = vadd.f32 %v5895_v59, %v5882_v21 }
 0x461   :  { %v5910_v62 = vadd.f32 %v5909_v55, %v5896_v60 }
 0x463   :  { %v5914_v26 = vmul.f32 %v5910_v62, %v5910_v62 }
 0x465   :  { %5916 = vadd.xlane.f32.xlu0 %v5914_v26 }
 0x466   :  { %v5897_v19 = vpop.f32.mrf.mxu2  ;;  %v5911_v53 = vpop.f32.mrf.mxu3 }
 0x467   :  { %v5898_v51 = vadd.f32 %v5897_v19, %v5884_v17 }
 0x469   :  { %v5912_v16 = vadd.f32 %v5911_v53, %v5898_v51 }
 0x46b   :  { %v5915_v47 = vmul.f32 %v5912_v16, %v5912_v16 }
 0x46d   :  { %5918 = vadd.xlane.f32.xlu0 %v5915_v47 }
 0x4d8   :  { %v5917_v43 = vpop.xlane.xlu0 %5916 }
 0x4d9   :  { %v5920_v52 = vadd.f32 1e-30, %v5917_v43 }
 0x4db   :  { %9550 = vrsqrt.f32 %v5920_v52  ;;  %vm5928_vm1 = vweird.f32 %v5920_v52 }
 0x4e0   :  { %v5919_v63 = vpop.xlane.xlu0 %5918 }
 0x4e1   :  { %v9551_v48 = vpop.eup %9550  ;;  %v5921_v14 = vadd.f32 1e-30, %v5919_v63 }
 0x4e2   :  { %v5923_v0 = vmul.f32 %v9551_v48, %v5920_v52  ;;  %vm5929_vm0 = vweird.f32 %v9551_v48 }
 0x4e3   :  { %9552 = vrsqrt.f32 %v5921_v14  ;;  %vm5930_vm2 = vmor %vm5928_vm1, %vm5929_vm0  ;;  %vm5938_vm4 = vweird.f32 %v5921_v14 }
 0x4e4   :  { %v5924_v50 = vmul.f32 %v9551_v48, %v5923_v0 }
 0x4e6   :  { %v5925_v46 = vmul.f32 0.5, %v5924_v50 }
 0x4e8   :  { %v5926_v6 = vsub.f32 1.5, %v5925_v46 }
 0x4e9   :  { %v9553_v54 = vpop.eup %9552 }
 0x4ea   :  { %v5927_v29 = vmul.f32 %v9551_v48, %v5926_v6  ;;  %v5933_v38 = vmul.f32 %v9553_v54, %v5921_v14  ;;  %vm5939_vm3 = vweird.f32 %v9553_v54 }
 0x4eb   :  { %vm5940_vm5 = vmor %vm5938_vm4, %vm5939_vm3 }
 0x4ec   :  { %v5931_v7 = vsel %vm5930_vm2, %v9551_v48, %v5927_v29  ;;  %v5934_v39 = vmul.f32 %v9553_v54, %v5933_v38 }
 0x4ed   :  { %v5942_v24 = vmul.f32 %v5931_v7, %v5910_v62 }
 0x4ee   :  { %v5935_v28 = vmul.f32 0.5, %v5934_v39 }
 0x4ef   :  { %5944 = vst [vmem:[#allocation17] sm:$0xff] %v5942_v24 }
 0x4f0   :  { %v5936_v33 = vsub.f32 1.5, %v5935_v28 }
 0x4f2   :  { %v5937_v10 = vmul.f32 %v9553_v54, %v5936_v33 }
 0x4f4   :  { %v5941_v13 = vsel %vm5940_vm5, %v9553_v54, %v5937_v10 }
 0x4f5   :  { %v5943_v44 = vmul.f32 %v5941_v13, %v5912_v16 }
 0x4f7   :  { %5945 = vst [vmem:[#allocation17 + $0x8] sm:$0xff] %v5943_v44 }
 0x4f8   :  { %5984 = dma.vmem_to_hbm [thread:$0]  %s5977_s8, 256, %s5979_s12, [#allocation16], %s9816_s5, %s9816_s5, %s9817_s10  }
 0x4f9   :  { %9804 = dma.done.wait [#allocation4], 1024  }
 0x4fa   :  { %9805 = vsyncadd [#allocation4], 4294966272 }
 0x4fb   :  { %9806 = dma.done.wait [#allocation16], 1280  }
 0x4fc   :  { %9807 = vsyncadd [#allocation16], 4294966016 }
 0x4fd   :  { %5997 = vsyncpa [#allocation3], 1 }
 0x4fe   :  { %5998 = vsyncpa [#allocation6], 1 }
 0x4ff   :  { %5999 = vsyncpa [#allocation9], 1 }
 0x500   :  { %6000 = vsyncpa [#allocation12], 1 }
 0x501   :  { %6001 = vsyncpa [#allocation4], 1 }
 0x502   :  { %6002 = vsyncpa [#allocation16], 1 }

</bundles_post_ra>
